<compile_context>
chip_gen: v7x
topology: tpu7x:2x2x1
jax: 0.10.0
libtpu: 0.0.40
codegen_flags: <defaults>
</compile_context>

<pallas_src>
import jax
import jax.numpy as jnp
from jax import lax
from jax.experimental import pallas as pl
from jax.experimental.pallas import tpu as pltpu

# ----- hyperparameters (PyTorch module defaults) -----
VOCAB = 100
VOCAB_PAD = 128          # lane-dense padded vocab for the kernel output
EMBED = 32
BLOCK = 8                # block_size (max sequence length)
HEADS = 4
LAYERS = 4
HEAD_SIZE = EMBED // HEADS
FF = 4 * EMBED
EPS = 1e-5               # nn.LayerNorm default eps


def _layernorm(x, w, b):
    mu = jnp.mean(x, axis=-1, keepdims=True)
    xc = x - mu                                    # reuse centered x for var
    var = jnp.mean(xc * xc, axis=-1, keepdims=True)
    return xc * lax.rsqrt(var + EPS) * w + b


def fused_transformer_kernel(ids_ref,                       # SMEM (B, T) int32, scalar prefetch
                             tok_ref, pos_ref,              # embedding tables (VMEM, resident)
                             ln1w_ref, ln1b_ref, wqkv_ref, wproj_ref, bproj_ref,
                             ln2w_ref, ln2b_ref, w1_ref, b1_ref, w2_ref, b2_ref,
                             wh_ref, bh_ref,                # weights (VMEM, resident)
                             o_ref,                         # (b_tile, T, VOCAB_PAD) f32
                             x_scratch):                    # VMEM (b_tile*T, EMBED) f32
    bt = pl.program_id(0)
    b_tile, T, _ = o_ref.shape
    C = EMBED
    M = b_tile * T

    # ---- fused embedding gather: x[b, t] = tok_emb[ids[b, t]] + pos_emb[t] ----
    for bb in range(b_tile):
        for t in range(T):
            tid = ids_ref[bt * b_tile + bb, t]
            x_scratch[bb * T + t, :] = tok_ref[tid] + pos_ref[t]
    x = x_scratch[...]                                       # (M, C) f32 residual stream

    # additive causal mask, built once and reused by every layer / head
    row = lax.broadcasted_iota(jnp.int32, (T, T), 0)
    col = lax.broadcasted_iota(jnp.int32, (T, T), 1)
    mask_add = jnp.where(row >= col, jnp.float32(0.0), jnp.float32(-1e30))[None]  # (1, T, T)

    for l in range(LAYERS):                                  # static unroll (4 layers)
        # ---- multi-head causal self-attention over ln1(x) ----
        xn = _layernorm(x, ln1w_ref[l], ln1b_ref[l])
        # merged q/k/v projection (one 2D MXU push); C**-0.5 pre-folded into q columns
        qkv = jnp.dot(xn.astype(jnp.bfloat16), wqkv_ref[l],
                      preferred_element_type=jnp.float32)    # (M, 3C) f32
        qkv = qkv.astype(jnp.bfloat16).reshape(b_tile, T, 3 * C)
        x = x + bproj_ref[l]                                 # output-projection bias
        for h in range(HEADS):                               # static unroll (4 heads)
            qh = qkv[:, :, h * HEAD_SIZE:(h + 1) * HEAD_SIZE]
            kh = qkv[:, :, C + h * HEAD_SIZE:C + (h + 1) * HEAD_SIZE]
            vh = qkv[:, :, 2 * C + h * HEAD_SIZE:2 * C + (h + 1) * HEAD_SIZE]
            wei = jnp.einsum('btd,bsd->bts', qh, kh,
                             preferred_element_type=jnp.float32)
            wei = wei + mask_add                             # additive causal mask
            wei = wei - jnp.max(wei, axis=-1, keepdims=True)
            p = jnp.exp(wei)
            p = p * pl.reciprocal(jnp.sum(p, axis=-1, keepdims=True), approx=True)
            ctx = jnp.einsum('bts,bsd->btd', p.astype(jnp.bfloat16), vh,
                             preferred_element_type=jnp.float32)          # (b, T, D)
            # fold this head's slice of the output projection (no concat needed)
            x = x + jnp.dot(ctx.reshape(M, HEAD_SIZE).astype(jnp.bfloat16),
                            wproj_ref[l, h], preferred_element_type=jnp.float32)
        # TODO(synk): nn.Dropout (attn weights / proj / ffwd) are eval-mode no-ops.

        # ---- feed-forward over ln2(x) ----
        xn2 = _layernorm(x, ln2w_ref[l], ln2b_ref[l])
        h1 = jnp.dot(xn2.astype(jnp.bfloat16), w1_ref[l],
                     preferred_element_type=jnp.float32) + b1_ref[l]
        h1 = jnp.maximum(h1, 0.0)                            # ReLU
        ff = jnp.dot(h1.astype(jnp.bfloat16), w2_ref[l],
                     preferred_element_type=jnp.float32) + b2_ref[l]
        x = x + ff

    # NOTE: the PyTorch forward applies lm_head directly (ln_f is defined but unused).
    logits = jnp.dot(x.astype(jnp.bfloat16), wh_ref[...],
                     preferred_element_type=jnp.float32) + bh_ref[...]
    o_ref[...] = logits.reshape(b_tile, T, VOCAB_PAD)


# ----- deterministic parameter initialization (shapes from module __init__) -----
def init_params(key):
    keys = iter(jax.random.split(key, 32))

    def lin_w(shape, fan_in):
        bound = 1.0 / jnp.sqrt(fan_in)
        return jax.random.uniform(next(keys), shape, jnp.float32, -bound, bound)

    # attention scale: PyTorch AttentionHead uses C ** -0.5 with C = num_embed
    scale = EMBED ** (-0.5)
    wq = lin_w((LAYERS, EMBED, EMBED), EMBED) * scale     # fold scale into q columns
    wk = lin_w((LAYERS, EMBED, EMBED), EMBED)
    wv = lin_w((LAYERS, EMBED, EMBED), EMBED)
    wqkv = jnp.concatenate([wq, wk, wv], axis=-1)         # (L, C, 3C)

    # output projection stored per-head: (L, H, D, C) == rows h*D..(h+1)*D of (C, C)
    wproj = lin_w((LAYERS, EMBED, EMBED), EMBED).reshape(LAYERS, HEADS, HEAD_SIZE, EMBED)

    wh = lin_w((EMBED, VOCAB), EMBED)
    bh = lin_w((1, VOCAB), EMBED)
    # lane-dense lm_head: zero-pad vocab 100 -> 128 (padded cols sliced off later)
    wh = jnp.pad(wh, ((0, 0), (0, VOCAB_PAD - VOCAB)))
    bh = jnp.pad(bh, ((0, 0), (0, VOCAB_PAD - VOCAB)))

    return {
        'tok_emb': jax.random.normal(next(keys), (VOCAB, EMBED), jnp.float32),
        'pos_emb': jax.random.normal(next(keys), (BLOCK, EMBED), jnp.float32),
        'ln1_w': jnp.ones((LAYERS, EMBED), jnp.float32),
        'ln1_b': jnp.zeros((LAYERS, EMBED), jnp.float32),
        'wqkv': wqkv.astype(jnp.bfloat16),                # bf16 MXU operands
        'wproj': wproj.astype(jnp.bfloat16),
        'bproj': lin_w((LAYERS, EMBED), EMBED),
        'ln2_w': jnp.ones((LAYERS, EMBED), jnp.float32),
        'ln2_b': jnp.zeros((LAYERS, EMBED), jnp.float32),
        'w1': lin_w((LAYERS, EMBED, FF), EMBED).astype(jnp.bfloat16),
        'b1': lin_w((LAYERS, FF), EMBED),
        'w2': lin_w((LAYERS, FF, EMBED), FF).astype(jnp.bfloat16),
        'b2': lin_w((LAYERS, EMBED), FF),
        'wh': wh.astype(jnp.bfloat16),
        'bh': bh,
    }


def _choose_b_tile(B):
    # >=2 grid steps when possible: one per TensorCore on v7x (megacore) plus
    # pipelined output DMA, while keeping the per-step working set tiny so the
    # same tiling stays far under v7x's 64 MiB VMEM.
    bt = B // 2 if (B > 1 and B % 2 == 0) else B
    while bt > 64 and bt % 2 == 0:
        bt //= 2
    return bt


@jax.jit
def transformer_forward(input_ids, params):
    """Returns logits (B, T, VOCAB); loss is None (targets=None path)."""
    B, T = input_ids.shape
    assert T <= BLOCK, "sequence length exceeds block_size"
    b_tile = _choose_b_tile(B)
    num_tiles = B // b_tile

    ins = (params['tok_emb'], params['pos_emb'],
           params['ln1_w'], params['ln1_b'], params['wqkv'],
           params['wproj'], params['bproj'],
           params['ln2_w'], params['ln2_b'],
           params['w1'], params['b1'], params['w2'], params['b2'],
           params['wh'], params['bh'])

    def resident(arr):   # whole array in VMEM, constant block index -> DMA'd once
        return pl.BlockSpec(arr.shape, lambda i, ids, _n=arr.ndim: (0,) * _n)

    grid_spec = pltpu.PrefetchScalarGridSpec(
        num_scalar_prefetch=1,                      # input_ids -> SMEM
        grid=(num_tiles,),
        in_specs=[resident(a) for a in ins],
        out_specs=pl.BlockSpec((b_tile, T, VOCAB_PAD), lambda i, ids: (i, 0, 0)),
        scratch_shapes=[pltpu.VMEM((b_tile * T, EMBED), jnp.float32)],
    )

    logits_pad = pl.pallas_call(
        fused_transformer_kernel,
        out_shape=jax.ShapeDtypeStruct((B, T, VOCAB_PAD), jnp.float32),
        grid_spec=grid_spec,
        compiler_params=pltpu.CompilerParams(
            dimension_semantics=("parallel",),
            vmem_limit_bytes=32 * 1024 * 1024),
    )(input_ids.astype(jnp.int32), *ins)

    # padded vocab columns (100..127) are sliced off outside the kernel.
    return logits_pad[:, :, :VOCAB]                 # loss is None (targets=None)


if __name__ == "__main__":
    key = jax.random.PRNGKey(0)
    pkey, ikey = jax.random.split(key)
    params = init_params(pkey)

    B, T = 2, BLOCK
    input_ids = jax.random.randint(ikey, (B, T), 0, VOCAB, dtype=jnp.int32)

    logits = transformer_forward(input_ids, params)
    jax.block_until_ready(logits)

    assert logits.shape == (B, T, VOCAB), logits.shape
    assert logits.dtype == jnp.float32
    assert bool(jnp.all(jnp.isfinite(logits)))
    print("KERNEL_OK")
</pallas_src>

<mosaic_0001>
module attributes {stable_mosaic.version = 11 : i64} {
  func.func @fused_transformer_kernel(%arg0: i32, %arg1: memref<2x8xi32, #tpu.memory_space<smem>>, %arg2: memref<100x32xf32, #tpu.memory_space<vmem>>, %arg3: memref<8x32xf32, #tpu.memory_space<vmem>>, %arg4: memref<4x32xf32, #tpu.memory_space<vmem>>, %arg5: memref<4x32xf32, #tpu.memory_space<vmem>>, %arg6: memref<4x32x96xbf16, #tpu.memory_space<vmem>>, %arg7: memref<4x4x8x32xbf16, #tpu.memory_space<vmem>>, %arg8: memref<4x32xf32, #tpu.memory_space<vmem>>, %arg9: memref<4x32xf32, #tpu.memory_space<vmem>>, %arg10: memref<4x32xf32, #tpu.memory_space<vmem>>, %arg11: memref<4x32x128xbf16, #tpu.memory_space<vmem>>, %arg12: memref<4x128xf32, #tpu.memory_space<vmem>>, %arg13: memref<4x128x32xbf16, #tpu.memory_space<vmem>>, %arg14: memref<4x32xf32, #tpu.memory_space<vmem>>, %arg15: memref<32x128xbf16, #tpu.memory_space<vmem>>, %arg16: memref<1x128xf32, #tpu.memory_space<vmem>>, %arg17: memref<1x8x128xf32, #tpu.memory_space<vmem>>, %arg18: memref<8x32xf32, #tpu.memory_space<vmem>>) attributes {dimension_semantics = [#tpu.dimension_semantics<parallel>], iteration_bounds = array<i64: 2>, scalar_prefetch = 1 : i64, scratch_operands = 1 : i64, tpu.core_type = #tpu.core_type<tc>, window_params = [{pipeline_mode = #tpu.pipeline_mode<synchronous>, transform_indices = @transform_0, window_bounds = array<i64: 100, 32>}, {pipeline_mode = #tpu.pipeline_mode<synchronous>, transform_indices = @transform_1, window_bounds = array<i64: 8, 32>}, {pipeline_mode = #tpu.pipeline_mode<synchronous>, transform_indices = @transform_2, window_bounds = array<i64: 4, 32>}, {pipeline_mode = #tpu.pipeline_mode<synchronous>, transform_indices = @transform_3, window_bounds = array<i64: 4, 32>}, {pipeline_mode = #tpu.pipeline_mode<synchronous>, transform_indices = @transform_4, window_bounds = array<i64: 4, 32, 96>}, {pipeline_mode = #tpu.pipeline_mode<synchronous>, transform_indices = @transform_5, window_bounds = array<i64: 4, 4, 8, 32>}, {pipeline_mode = #tpu.pipeline_mode<synchronous>, transform_indices = @transform_6, window_bounds = array<i64: 4, 32>}, {pipeline_mode = #tpu.pipeline_mode<synchronous>, transform_indices = @transform_7, window_bounds = array<i64: 4, 32>}, {pipeline_mode = #tpu.pipeline_mode<synchronous>, transform_indices = @transform_8, window_bounds = array<i64: 4, 32>}, {pipeline_mode = #tpu.pipeline_mode<synchronous>, transform_indices = @transform_9, window_bounds = array<i64: 4, 32, 128>}, {pipeline_mode = #tpu.pipeline_mode<synchronous>, transform_indices = @transform_10, window_bounds = array<i64: 4, 128>}, {pipeline_mode = #tpu.pipeline_mode<synchronous>, transform_indices = @transform_11, window_bounds = array<i64: 4, 128, 32>}, {pipeline_mode = #tpu.pipeline_mode<synchronous>, transform_indices = @transform_12, window_bounds = array<i64: 4, 32>}, {pipeline_mode = #tpu.pipeline_mode<synchronous>, transform_indices = @transform_13, window_bounds = array<i64: 32, 128>}, {pipeline_mode = #tpu.pipeline_mode<synchronous>, transform_indices = @transform_14, window_bounds = array<i64: 1, 128>}, {transform_indices = @transform_15, window_bounds = array<i64: 1, 8, 128>}]} {
    %c1_i32 = arith.constant 1 : i32
    %0 = arith.muli %arg0, %c1_i32 : i32
    %c0_i32 = arith.constant 0 : i32
    %1 = arith.addi %0, %c0_i32 : i32
    %2 = arith.index_cast %1 : i32 to index
    %c0 = arith.constant 0 : index
    %3 = memref.load %arg1[%2, %c0] : memref<2x8xi32, #tpu.memory_space<smem>>
    %4 = arith.index_cast %3 : i32 to index
    %c0_0 = arith.constant 0 : index
    %5 = vector.load %arg2[%4, %c0_0] : memref<100x32xf32, #tpu.memory_space<vmem>>, vector<1x32xf32>
    %6 = vector.shape_cast %5 : vector<1x32xf32> to vector<32xf32>
    %c0_1 = arith.constant 0 : index
    %c0_2 = arith.constant 0 : index
    %7 = vector.load %arg3[%c0_1, %c0_2] : memref<8x32xf32, #tpu.memory_space<vmem>>, vector<1x32xf32>
    %8 = vector.shape_cast %7 : vector<1x32xf32> to vector<32xf32>
    %9 = arith.addf %6, %8 : vector<32xf32>
    %c0_3 = arith.constant 0 : index
    %c0_4 = arith.constant 0 : index
    %10 = vector.load %arg18[%c0_3, %c0_4] : memref<8x32xf32, #tpu.memory_space<vmem>>, vector<1x32xf32>
    %11 = vector.shape_cast %10 : vector<1x32xf32> to vector<32xf32>
    %12 = vector.shape_cast %9 : vector<32xf32> to vector<1x32xf32>
    tpu.vector_store %arg18[%c0_3, %c0_4], %12 {strides = array<i32>} : memref<8x32xf32, #tpu.memory_space<vmem>>, vector<1x32xf32>,
    %c1_i32_5 = arith.constant 1 : i32
    %13 = arith.muli %arg0, %c1_i32_5 : i32
    %c0_i32_6 = arith.constant 0 : i32
    %14 = arith.addi %13, %c0_i32_6 : i32
    %15 = arith.index_cast %14 : i32 to index
    %c1 = arith.constant 1 : index
    %16 = memref.load %arg1[%15, %c1] : memref<2x8xi32, #tpu.memory_space<smem>>
    %17 = arith.index_cast %16 : i32 to index
    %c0_7 = arith.constant 0 : index
    %18 = vector.load %arg2[%17, %c0_7] : memref<100x32xf32, #tpu.memory_space<vmem>>, vector<1x32xf32>
    %19 = vector.shape_cast %18 : vector<1x32xf32> to vector<32xf32>
    %c1_8 = arith.constant 1 : index
    %c0_9 = arith.constant 0 : index
    %20 = vector.load %arg3[%c1_8, %c0_9] : memref<8x32xf32, #tpu.memory_space<vmem>>, vector<1x32xf32>
    %21 = vector.shape_cast %20 : vector<1x32xf32> to vector<32xf32>
    %22 = arith.addf %19, %21 : vector<32xf32>
    %c1_10 = arith.constant 1 : index
    %c0_11 = arith.constant 0 : index
    %23 = vector.load %arg18[%c1_10, %c0_11] : memref<8x32xf32, #tpu.memory_space<vmem>>, vector<1x32xf32>
    %24 = vector.shape_cast %23 : vector<1x32xf32> to vector<32xf32>
    %25 = vector.shape_cast %22 : vector<32xf32> to vector<1x32xf32>
    tpu.vector_store %arg18[%c1_10, %c0_11], %25 {strides = array<i32>} : memref<8x32xf32, #tpu.memory_space<vmem>>, vector<1x32xf32>,
    %c1_i32_12 = arith.constant 1 : i32
    %26 = arith.muli %arg0, %c1_i32_12 : i32
    %c0_i32_13 = arith.constant 0 : i32
    %27 = arith.addi %26, %c0_i32_13 : i32
    %28 = arith.index_cast %27 : i32 to index
    %c2 = arith.constant 2 : index
    %29 = memref.load %arg1[%28, %c2] : memref<2x8xi32, #tpu.memory_space<smem>>
    %30 = arith.index_cast %29 : i32 to index
    %c0_14 = arith.constant 0 : index
    %31 = vector.load %arg2[%30, %c0_14] : memref<100x32xf32, #tpu.memory_space<vmem>>, vector<1x32xf32>
    %32 = vector.shape_cast %31 : vector<1x32xf32> to vector<32xf32>
    %c2_15 = arith.constant 2 : index
    %c0_16 = arith.constant 0 : index
    %33 = vector.load %arg3[%c2_15, %c0_16] : memref<8x32xf32, #tpu.memory_space<vmem>>, vector<1x32xf32>
    %34 = vector.shape_cast %33 : vector<1x32xf32> to vector<32xf32>
    %35 = arith.addf %32, %34 : vector<32xf32>
    %c2_17 = arith.constant 2 : index
    %c0_18 = arith.constant 0 : index
    %36 = vector.load %arg18[%c2_17, %c0_18] : memref<8x32xf32, #tpu.memory_space<vmem>>, vector<1x32xf32>
    %37 = vector.shape_cast %36 : vector<1x32xf32> to vector<32xf32>
    %38 = vector.shape_cast %35 : vector<32xf32> to vector<1x32xf32>
    tpu.vector_store %arg18[%c2_17, %c0_18], %38 {strides = array<i32>} : memref<8x32xf32, #tpu.memory_space<vmem>>, vector<1x32xf32>,
    %c1_i32_19 = arith.constant 1 : i32
    %39 = arith.muli %arg0, %c1_i32_19 : i32
    %c0_i32_20 = arith.constant 0 : i32
    %40 = arith.addi %39, %c0_i32_20 : i32
    %41 = arith.index_cast %40 : i32 to index
    %c3 = arith.constant 3 : index
    %42 = memref.load %arg1[%41, %c3] : memref<2x8xi32, #tpu.memory_space<smem>>
    %43 = arith.index_cast %42 : i32 to index
    %c0_21 = arith.constant 0 : index
    %44 = vector.load %arg2[%43, %c0_21] : memref<100x32xf32, #tpu.memory_space<vmem>>, vector<1x32xf32>
    %45 = vector.shape_cast %44 : vector<1x32xf32> to vector<32xf32>
    %c3_22 = arith.constant 3 : index
    %c0_23 = arith.constant 0 : index
    %46 = vector.load %arg3[%c3_22, %c0_23] : memref<8x32xf32, #tpu.memory_space<vmem>>, vector<1x32xf32>
    %47 = vector.shape_cast %46 : vector<1x32xf32> to vector<32xf32>
    %48 = arith.addf %45, %47 : vector<32xf32>
    %c3_24 = arith.constant 3 : index
    %c0_25 = arith.constant 0 : index
    %49 = vector.load %arg18[%c3_24, %c0_25] : memref<8x32xf32, #tpu.memory_space<vmem>>, vector<1x32xf32>
    %50 = vector.shape_cast %49 : vector<1x32xf32> to vector<32xf32>
    %51 = vector.shape_cast %48 : vector<32xf32> to vector<1x32xf32>
    tpu.vector_store %arg18[%c3_24, %c0_25], %51 {strides = array<i32>} : memref<8x32xf32, #tpu.memory_space<vmem>>, vector<1x32xf32>,
    %c1_i32_26 = arith.constant 1 : i32
    %52 = arith.muli %arg0, %c1_i32_26 : i32
    %c0_i32_27 = arith.constant 0 : i32
    %53 = arith.addi %52, %c0_i32_27 : i32
    %54 = arith.index_cast %53 : i32 to index
    %c4 = arith.constant 4 : index
    %55 = memref.load %arg1[%54, %c4] : memref<2x8xi32, #tpu.memory_space<smem>>
    %56 = arith.index_cast %55 : i32 to index
    %c0_28 = arith.constant 0 : index
    %57 = vector.load %arg2[%56, %c0_28] : memref<100x32xf32, #tpu.memory_space<vmem>>, vector<1x32xf32>
    %58 = vector.shape_cast %57 : vector<1x32xf32> to vector<32xf32>
    %c4_29 = arith.constant 4 : index
    %c0_30 = arith.constant 0 : index
    %59 = vector.load %arg3[%c4_29, %c0_30] : memref<8x32xf32, #tpu.memory_space<vmem>>, vector<1x32xf32>
    %60 = vector.shape_cast %59 : vector<1x32xf32> to vector<32xf32>
    %61 = arith.addf %58, %60 : vector<32xf32>
    %c4_31 = arith.constant 4 : index
    %c0_32 = arith.constant 0 : index
    %62 = vector.load %arg18[%c4_31, %c0_32] : memref<8x32xf32, #tpu.memory_space<vmem>>, vector<1x32xf32>
    %63 = vector.shape_cast %62 : vector<1x32xf32> to vector<32xf32>
    %64 = vector.shape_cast %61 : vector<32xf32> to vector<1x32xf32>
    tpu.vector_store %arg18[%c4_31, %c0_32], %64 {strides = array<i32>} : memref<8x32xf32, #tpu.memory_space<vmem>>, vector<1x32xf32>,
    %c1_i32_33 = arith.constant 1 : i32
    %65 = arith.muli %arg0, %c1_i32_33 : i32
    %c0_i32_34 = arith.constant 0 : i32
    %66 = arith.addi %65, %c0_i32_34 : i32
    %67 = arith.index_cast %66 : i32 to index
    %c5 = arith.constant 5 : index
    %68 = memref.load %arg1[%67, %c5] : memref<2x8xi32, #tpu.memory_space<smem>>
    %69 = arith.index_cast %68 : i32 to index
    %c0_35 = arith.constant 0 : index
    %70 = vector.load %arg2[%69, %c0_35] : memref<100x32xf32, #tpu.memory_space<vmem>>, vector<1x32xf32>
    %71 = vector.shape_cast %70 : vector<1x32xf32> to vector<32xf32>
    %c5_36 = arith.constant 5 : index
    %c0_37 = arith.constant 0 : index
    %72 = vector.load %arg3[%c5_36, %c0_37] : memref<8x32xf32, #tpu.memory_space<vmem>>, vector<1x32xf32>
    %73 = vector.shape_cast %72 : vector<1x32xf32> to vector<32xf32>
    %74 = arith.addf %71, %73 : vector<32xf32>
    %c5_38 = arith.constant 5 : index
    %c0_39 = arith.constant 0 : index
    %75 = vector.load %arg18[%c5_38, %c0_39] : memref<8x32xf32, #tpu.memory_space<vmem>>, vector<1x32xf32>
    %76 = vector.shape_cast %75 : vector<1x32xf32> to vector<32xf32>
    %77 = vector.shape_cast %74 : vector<32xf32> to vector<1x32xf32>
    tpu.vector_store %arg18[%c5_38, %c0_39], %77 {strides = array<i32>} : memref<8x32xf32, #tpu.memory_space<vmem>>, vector<1x32xf32>,
    %c1_i32_40 = arith.constant 1 : i32
    %78 = arith.muli %arg0, %c1_i32_40 : i32
    %c0_i32_41 = arith.constant 0 : i32
    %79 = arith.addi %78, %c0_i32_41 : i32
    %80 = arith.index_cast %79 : i32 to index
    %c6 = arith.constant 6 : index
    %81 = memref.load %arg1[%80, %c6] : memref<2x8xi32, #tpu.memory_space<smem>>
    %82 = arith.index_cast %81 : i32 to index
    %c0_42 = arith.constant 0 : index
    %83 = vector.load %arg2[%82, %c0_42] : memref<100x32xf32, #tpu.memory_space<vmem>>, vector<1x32xf32>
    %84 = vector.shape_cast %83 : vector<1x32xf32> to vector<32xf32>
    %c6_43 = arith.constant 6 : index
    %c0_44 = arith.constant 0 : index
    %85 = vector.load %arg3[%c6_43, %c0_44] : memref<8x32xf32, #tpu.memory_space<vmem>>, vector<1x32xf32>
    %86 = vector.shape_cast %85 : vector<1x32xf32> to vector<32xf32>
    %87 = arith.addf %84, %86 : vector<32xf32>
    %c6_45 = arith.constant 6 : index
    %c0_46 = arith.constant 0 : index
    %88 = vector.load %arg18[%c6_45, %c0_46] : memref<8x32xf32, #tpu.memory_space<vmem>>, vector<1x32xf32>
    %89 = vector.shape_cast %88 : vector<1x32xf32> to vector<32xf32>
    %90 = vector.shape_cast %87 : vector<32xf32> to vector<1x32xf32>
    tpu.vector_store %arg18[%c6_45, %c0_46], %90 {strides = array<i32>} : memref<8x32xf32, #tpu.memory_space<vmem>>, vector<1x32xf32>,
    %c1_i32_47 = arith.constant 1 : i32
    %91 = arith.muli %arg0, %c1_i32_47 : i32
    %c0_i32_48 = arith.constant 0 : i32
    %92 = arith.addi %91, %c0_i32_48 : i32
    %93 = arith.index_cast %92 : i32 to index
    %c7 = arith.constant 7 : index
    %94 = memref.load %arg1[%93, %c7] : memref<2x8xi32, #tpu.memory_space<smem>>
    %95 = arith.index_cast %94 : i32 to index
    %c0_49 = arith.constant 0 : index
    %96 = vector.load %arg2[%95, %c0_49] : memref<100x32xf32, #tpu.memory_space<vmem>>, vector<1x32xf32>
    %97 = vector.shape_cast %96 : vector<1x32xf32> to vector<32xf32>
    %c7_50 = arith.constant 7 : index
    %c0_51 = arith.constant 0 : index
    %98 = vector.load %arg3[%c7_50, %c0_51] : memref<8x32xf32, #tpu.memory_space<vmem>>, vector<1x32xf32>
    %99 = vector.shape_cast %98 : vector<1x32xf32> to vector<32xf32>
    %100 = arith.addf %97, %99 : vector<32xf32>
    %c7_52 = arith.constant 7 : index
    %c0_53 = arith.constant 0 : index
    %101 = vector.load %arg18[%c7_52, %c0_53] : memref<8x32xf32, #tpu.memory_space<vmem>>, vector<1x32xf32>
    %102 = vector.shape_cast %101 : vector<1x32xf32> to vector<32xf32>
    %103 = vector.shape_cast %100 : vector<32xf32> to vector<1x32xf32>
    tpu.vector_store %arg18[%c7_52, %c0_53], %103 {strides = array<i32>} : memref<8x32xf32, #tpu.memory_space<vmem>>, vector<1x32xf32>,
    %c0_54 = arith.constant 0 : index
    %c0_55 = arith.constant 0 : index
    %104 = vector.load %arg18[%c0_54, %c0_55] : memref<8x32xf32, #tpu.memory_space<vmem>>, vector<8x32xf32>
    %105 = tpu.iota {dimensions = array<i32: 0>} : vector<8x8xi32>
    %106 = tpu.iota {dimensions = array<i32: 1>} : vector<8x8xi32>
    %107 = arith.cmpi sge, %105, %106 : vector<8x8xi32>
    %cst = arith.constant 0.000000e+00 : f32
    %cst_56 = arith.constant -1.000000e+30 : f32
    %108 = vector.broadcast %cst : f32 to vector<8x8xf32>
    %109 = vector.broadcast %cst_56 : f32 to vector<8x8xf32>
    %110 = arith.select %107, %108, %109 : vector<8x8xi1>, vector<8x8xf32>
    %111 = vector.shape_cast %110 : vector<8x8xf32> to vector<1x8x8xf32>
    %c0_57 = arith.constant 0 : index
    %c0_58 = arith.constant 0 : index
    %112 = vector.load %arg4[%c0_57, %c0_58] : memref<4x32xf32, #tpu.memory_space<vmem>>, vector<1x32xf32>
    %113 = vector.shape_cast %112 : vector<1x32xf32> to vector<32xf32>
    %c0_59 = arith.constant 0 : index
    %c0_60 = arith.constant 0 : index
    %114 = vector.load %arg5[%c0_59, %c0_60] : memref<4x32xf32, #tpu.memory_space<vmem>>, vector<1x32xf32>
    %115 = vector.shape_cast %114 : vector<1x32xf32> to vector<32xf32>
    %cst_61 = arith.constant dense<0.000000e+00> : vector<8xf32>
    %116 = vector.multi_reduction <add>, %104, %cst_61 [1] : vector<8x32xf32> to vector<8xf32>
    %117 = vector.shape_cast %116 : vector<8xf32> to vector<8x1xf32>
    %cst_62 = arith.constant 3.200000e+01 : f32
    %118 = vector.broadcast %cst_62 : f32 to vector<8x1xf32>
    %119 = arith.divf %117, %118 : vector<8x1xf32>
    %120 = vector.broadcast %119 : vector<8x1xf32> to vector<8x32xf32>
    %121 = arith.subf %104, %120 : vector<8x32xf32>
    %122 = arith.mulf %121, %121 : vector<8x32xf32>
    %cst_63 = arith.constant dense<0.000000e+00> : vector<8xf32>
    %123 = vector.multi_reduction <add>, %122, %cst_63 [1] : vector<8x32xf32> to vector<8xf32>
    %124 = vector.shape_cast %123 : vector<8xf32> to vector<8x1xf32>
    %cst_64 = arith.constant 3.200000e+01 : f32
    %125 = vector.broadcast %cst_64 : f32 to vector<8x1xf32>
    %126 = arith.divf %124, %125 : vector<8x1xf32>
    %cst_65 = arith.constant 9.99999974E-6 : f32
    %127 = vector.broadcast %cst_65 : f32 to vector<8x1xf32>
    %128 = arith.addf %126, %127 : vector<8x1xf32>
    %129 = math.rsqrt %128 : vector<8x1xf32>
    %130 = vector.broadcast %129 : vector<8x1xf32> to vector<8x32xf32>
    %131 = arith.mulf %121, %130 : vector<8x32xf32>
    %132 = vector.shape_cast %113 : vector<32xf32> to vector<1x32xf32>
    %133 = vector.broadcast %132 : vector<1x32xf32> to vector<8x32xf32>
    %134 = arith.mulf %131, %133 : vector<8x32xf32>
    %135 = vector.shape_cast %115 : vector<32xf32> to vector<1x32xf32>
    %136 = vector.broadcast %135 : vector<1x32xf32> to vector<8x32xf32>
    %137 = arith.addf %134, %136 : vector<8x32xf32>
    %138 = arith.truncf %137 : vector<8x32xf32> to vector<8x32xbf16>
    %c0_66 = arith.constant 0 : index
    %c0_67 = arith.constant 0 : index
    %c0_68 = arith.constant 0 : index
    %139 = vector.load %arg6[%c0_66, %c0_67, %c0_68] : memref<4x32x96xbf16, #tpu.memory_space<vmem>>, vector<1x32x96xbf16>
    %140 = vector.shape_cast %139 : vector<1x32x96xbf16> to vector<32x96xbf16>
    %cst_69 = arith.constant dense<0.000000e+00> : vector<8x96xf32>
    %141 = tpu.matmul %138, %140, %cst_69 {dimension_numbers = #tpu.dot_dimension_numbers<[1], [0], [0], [1], [0, 0, 1, 1], [], []>} : vector<8x32xbf16>, vector<32x96xbf16>, vector<8x96xf32> -> vector<8x96xf32>
    %142 = arith.truncf %141 : vector<8x96xf32> to vector<8x96xbf16>
    %143 = vector.shape_cast %142 : vector<8x96xbf16> to vector<1x8x96xbf16>
    %c0_70 = arith.constant 0 : index
    %c0_71 = arith.constant 0 : index
    %144 = vector.load %arg8[%c0_70, %c0_71] : memref<4x32xf32, #tpu.memory_space<vmem>>, vector<1x32xf32>
    %145 = vector.shape_cast %144 : vector<1x32xf32> to vector<32xf32>
    %146 = vector.shape_cast %145 : vector<32xf32> to vector<1x32xf32>
    %147 = vector.broadcast %146 : vector<1x32xf32> to vector<8x32xf32>
    %148 = arith.addf %104, %147 : vector<8x32xf32>
    %149 = vector.extract_strided_slice %143 {offsets = [0, 0, 0], sizes = [1, 8, 8], strides = [1, 1, 1]} : vector<1x8x96xbf16> to vector<1x8x8xbf16>
    %150 = vector.extract_strided_slice %143 {offsets = [0, 0, 32], sizes = [1, 8, 8], strides = [1, 1, 1]} : vector<1x8x96xbf16> to vector<1x8x8xbf16>
    %151 = vector.extract_strided_slice %143 {offsets = [0, 0, 64], sizes = [1, 8, 8], strides = [1, 1, 1]} : vector<1x8x96xbf16> to vector<1x8x8xbf16>
    "tpu.trace_start"() <{level = 10 : i32, message = "btd,bsd->bts"}> : () -> ()
    %cst_72 = arith.constant dense<0.000000e+00> : vector<1x8x8xf32>
    %152 = tpu.matmul %149, %150, %cst_72 {dimension_numbers = #tpu.dot_dimension_numbers<[2], [2], [1], [1], [0, 0, 0, 1, 1, 1], [0], [0]>} : vector<1x8x8xbf16>, vector<1x8x8xbf16>, vector<1x8x8xf32> -> vector<1x8x8xf32>
    "tpu.trace_stop"() : () -> ()
    %153 = arith.addf %152, %111 : vector<1x8x8xf32>
    %cst_73 = arith.constant dense<0xFF800000> : vector<1x8xf32>
    %154 = vector.multi_reduction <maximumf>, %153, %cst_73 [2] : vector<1x8x8xf32> to vector<1x8xf32>
    %155 = vector.shape_cast %154 : vector<1x8xf32> to vector<1x8x1xf32>
    %156 = vector.broadcast %155 : vector<1x8x1xf32> to vector<1x8x8xf32>
    %157 = arith.subf %153, %156 : vector<1x8x8xf32>
    %158 = math.exp %157 : vector<1x8x8xf32>
    %cst_74 = arith.constant dense<0.000000e+00> : vector<1x8xf32>
    %159 = vector.multi_reduction <add>, %158, %cst_74 [2] : vector<1x8x8xf32> to vector<1x8xf32>
    %160 = vector.shape_cast %159 : vector<1x8xf32> to vector<1x8x1xf32>
    %161 = tpu.reciprocal %160 {approx = true} : vector<1x8x1xf32> -> vector<1x8x1xf32>
    %162 = vector.broadcast %161 : vector<1x8x1xf32> to vector<1x8x8xf32>
    %163 = arith.mulf %158, %162 : vector<1x8x8xf32>
    %164 = arith.truncf %163 : vector<1x8x8xf32> to vector<1x8x8xbf16>
    "tpu.trace_start"() <{level = 10 : i32, message = "bts,bsd->btd"}> : () -> ()
    %cst_75 = arith.constant dense<0.000000e+00> : vector<1x8x8xf32>
    %165 = tpu.matmul %164, %151, %cst_75 {dimension_numbers = #tpu.dot_dimension_numbers<[2], [1], [1], [2], [0, 0, 0, 1, 1, 2], [0], [0]>} : vector<1x8x8xbf16>, vector<1x8x8xbf16>, vector<1x8x8xf32> -> vector<1x8x8xf32>
    "tpu.trace_stop"() : () -> ()
    %166 = vector.shape_cast %165 : vector<1x8x8xf32> to vector<8x8xf32>
    %167 = arith.truncf %166 : vector<8x8xf32> to vector<8x8xbf16>
    %c0_76 = arith.constant 0 : index
    %c0_77 = arith.constant 0 : index
    %c0_78 = arith.constant 0 : index
    %c0_79 = arith.constant 0 : index
    %168 = vector.load %arg7[%c0_76, %c0_77, %c0_78, %c0_79] : memref<4x4x8x32xbf16, #tpu.memory_space<vmem>>, vector<1x1x8x32xbf16>
    %169 = vector.shape_cast %168 : vector<1x1x8x32xbf16> to vector<8x32xbf16>
    %cst_80 = arith.constant dense<0.000000e+00> : vector<8x32xf32>
    %170 = tpu.matmul %167, %169, %cst_80 {dimension_numbers = #tpu.dot_dimension_numbers<[1], [0], [0], [1], [0, 0, 1, 1], [], []>} : vector<8x8xbf16>, vector<8x32xbf16>, vector<8x32xf32> -> vector<8x32xf32>
    %171 = arith.addf %148, %170 : vector<8x32xf32>
    %172 = vector.extract_strided_slice %143 {offsets = [0, 0, 8], sizes = [1, 8, 8], strides = [1, 1, 1]} : vector<1x8x96xbf16> to vector<1x8x8xbf16>
    %173 = vector.extract_strided_slice %143 {offsets = [0, 0, 40], sizes = [1, 8, 8], strides = [1, 1, 1]} : vector<1x8x96xbf16> to vector<1x8x8xbf16>
    %174 = vector.extract_strided_slice %143 {offsets = [0, 0, 72], sizes = [1, 8, 8], strides = [1, 1, 1]} : vector<1x8x96xbf16> to vector<1x8x8xbf16>
    "tpu.trace_start"() <{level = 10 : i32, message = "btd,bsd->bts"}> : () -> ()
    %cst_81 = arith.constant dense<0.000000e+00> : vector<1x8x8xf32>
    %175 = tpu.matmul %172, %173, %cst_81 {dimension_numbers = #tpu.dot_dimension_numbers<[2], [2], [1], [1], [0, 0, 0, 1, 1, 1], [0], [0]>} : vector<1x8x8xbf16>, vector<1x8x8xbf16>, vector<1x8x8xf32> -> vector<1x8x8xf32>
    "tpu.trace_stop"() : () -> ()
    %176 = arith.addf %175, %111 : vector<1x8x8xf32>
    %cst_82 = arith.constant dense<0xFF800000> : vector<1x8xf32>
    %177 = vector.multi_reduction <maximumf>, %176, %cst_82 [2] : vector<1x8x8xf32> to vector<1x8xf32>
    %178 = vector.shape_cast %177 : vector<1x8xf32> to vector<1x8x1xf32>
    %179 = vector.broadcast %178 : vector<1x8x1xf32> to vector<1x8x8xf32>
    %180 = arith.subf %176, %179 : vector<1x8x8xf32>
    %181 = math.exp %180 : vector<1x8x8xf32>
    %cst_83 = arith.constant dense<0.000000e+00> : vector<1x8xf32>
    %182 = vector.multi_reduction <add>, %181, %cst_83 [2] : vector<1x8x8xf32> to vector<1x8xf32>
    %183 = vector.shape_cast %182 : vector<1x8xf32> to vector<1x8x1xf32>
    %184 = tpu.reciprocal %183 {approx = true} : vector<1x8x1xf32> -> vector<1x8x1xf32>
    %185 = vector.broadcast %184 : vector<1x8x1xf32> to vector<1x8x8xf32>
    %186 = arith.mulf %181, %185 : vector<1x8x8xf32>
    %187 = arith.truncf %186 : vector<1x8x8xf32> to vector<1x8x8xbf16>
    "tpu.trace_start"() <{level = 10 : i32, message = "bts,bsd->btd"}> : () -> ()
    %cst_84 = arith.constant dense<0.000000e+00> : vector<1x8x8xf32>
    %188 = tpu.matmul %187, %174, %cst_84 {dimension_numbers = #tpu.dot_dimension_numbers<[2], [1], [1], [2], [0, 0, 0, 1, 1, 2], [0], [0]>} : vector<1x8x8xbf16>, vector<1x8x8xbf16>, vector<1x8x8xf32> -> vector<1x8x8xf32>
    "tpu.trace_stop"() : () -> ()
    %189 = vector.shape_cast %188 : vector<1x8x8xf32> to vector<8x8xf32>
    %190 = arith.truncf %189 : vector<8x8xf32> to vector<8x8xbf16>
    %c0_85 = arith.constant 0 : index
    %c1_86 = arith.constant 1 : index
    %c0_87 = arith.constant 0 : index
    %c0_88 = arith.constant 0 : index
    %191 = vector.load %arg7[%c0_85, %c1_86, %c0_87, %c0_88] : memref<4x4x8x32xbf16, #tpu.memory_space<vmem>>, vector<1x1x8x32xbf16>
    %192 = vector.shape_cast %191 : vector<1x1x8x32xbf16> to vector<8x32xbf16>
    %cst_89 = arith.constant dense<0.000000e+00> : vector<8x32xf32>
    %193 = tpu.matmul %190, %192, %cst_89 {dimension_numbers = #tpu.dot_dimension_numbers<[1], [0], [0], [1], [0, 0, 1, 1], [], []>} : vector<8x8xbf16>, vector<8x32xbf16>, vector<8x32xf32> -> vector<8x32xf32>
    %194 = arith.addf %171, %193 : vector<8x32xf32>
    %195 = vector.extract_strided_slice %143 {offsets = [0, 0, 16], sizes = [1, 8, 8], strides = [1, 1, 1]} : vector<1x8x96xbf16> to vector<1x8x8xbf16>
    %196 = vector.extract_strided_slice %143 {offsets = [0, 0, 48], sizes = [1, 8, 8], strides = [1, 1, 1]} : vector<1x8x96xbf16> to vector<1x8x8xbf16>
    %197 = vector.extract_strided_slice %143 {offsets = [0, 0, 80], sizes = [1, 8, 8], strides = [1, 1, 1]} : vector<1x8x96xbf16> to vector<1x8x8xbf16>
    "tpu.trace_start"() <{level = 10 : i32, message = "btd,bsd->bts"}> : () -> ()
    %cst_90 = arith.constant dense<0.000000e+00> : vector<1x8x8xf32>
    %198 = tpu.matmul %195, %196, %cst_90 {dimension_numbers = #tpu.dot_dimension_numbers<[2], [2], [1], [1], [0, 0, 0, 1, 1, 1], [0], [0]>} : vector<1x8x8xbf16>, vector<1x8x8xbf16>, vector<1x8x8xf32> -> vector<1x8x8xf32>
    "tpu.trace_stop"() : () -> ()
    %199 = arith.addf %198, %111 : vector<1x8x8xf32>
    %cst_91 = arith.constant dense<0xFF800000> : vector<1x8xf32>
    %200 = vector.multi_reduction <maximumf>, %199, %cst_91 [2] : vector<1x8x8xf32> to vector<1x8xf32>
    %201 = vector.shape_cast %200 : vector<1x8xf32> to vector<1x8x1xf32>
    %202 = vector.broadcast %201 : vector<1x8x1xf32> to vector<1x8x8xf32>
    %203 = arith.subf %199, %202 : vector<1x8x8xf32>
    %204 = math.exp %203 : vector<1x8x8xf32>
    %cst_92 = arith.constant dense<0.000000e+00> : vector<1x8xf32>
    %205 = vector.multi_reduction <add>, %204, %cst_92 [2] : vector<1x8x8xf32> to vector<1x8xf32>
    %206 = vector.shape_cast %205 : vector<1x8xf32> to vector<1x8x1xf32>
    %207 = tpu.reciprocal %206 {approx = true} : vector<1x8x1xf32> -> vector<1x8x1xf32>
    %208 = vector.broadcast %207 : vector<1x8x1xf32> to vector<1x8x8xf32>
    %209 = arith.mulf %204, %208 : vector<1x8x8xf32>
    %210 = arith.truncf %209 : vector<1x8x8xf32> to vector<1x8x8xbf16>
    "tpu.trace_start"() <{level = 10 : i32, message = "bts,bsd->btd"}> : () -> ()
    %cst_93 = arith.constant dense<0.000000e+00> : vector<1x8x8xf32>
    %211 = tpu.matmul %210, %197, %cst_93 {dimension_numbers = #tpu.dot_dimension_numbers<[2], [1], [1], [2], [0, 0, 0, 1, 1, 2], [0], [0]>} : vector<1x8x8xbf16>, vector<1x8x8xbf16>, vector<1x8x8xf32> -> vector<1x8x8xf32>
    "tpu.trace_stop"() : () -> ()
    %212 = vector.shape_cast %211 : vector<1x8x8xf32> to vector<8x8xf32>
    %213 = arith.truncf %212 : vector<8x8xf32> to vector<8x8xbf16>
    %c0_94 = arith.constant 0 : index
    %c2_95 = arith.constant 2 : index
    %c0_96 = arith.constant 0 : index
    %c0_97 = arith.constant 0 : index
    %214 = vector.load %arg7[%c0_94, %c2_95, %c0_96, %c0_97] : memref<4x4x8x32xbf16, #tpu.memory_space<vmem>>, vector<1x1x8x32xbf16>
    %215 = vector.shape_cast %214 : vector<1x1x8x32xbf16> to vector<8x32xbf16>
    %cst_98 = arith.constant dense<0.000000e+00> : vector<8x32xf32>
    %216 = tpu.matmul %213, %215, %cst_98 {dimension_numbers = #tpu.dot_dimension_numbers<[1], [0], [0], [1], [0, 0, 1, 1], [], []>} : vector<8x8xbf16>, vector<8x32xbf16>, vector<8x32xf32> -> vector<8x32xf32>
    %217 = arith.addf %194, %216 : vector<8x32xf32>
    %218 = vector.extract_strided_slice %143 {offsets = [0, 0, 24], sizes = [1, 8, 8], strides = [1, 1, 1]} : vector<1x8x96xbf16> to vector<1x8x8xbf16>
    %219 = vector.extract_strided_slice %143 {offsets = [0, 0, 56], sizes = [1, 8, 8], strides = [1, 1, 1]} : vector<1x8x96xbf16> to vector<1x8x8xbf16>
    %220 = vector.extract_strided_slice %143 {offsets = [0, 0, 88], sizes = [1, 8, 8], strides = [1, 1, 1]} : vector<1x8x96xbf16> to vector<1x8x8xbf16>
    "tpu.trace_start"() <{level = 10 : i32, message = "btd,bsd->bts"}> : () -> ()
    %cst_99 = arith.constant dense<0.000000e+00> : vector<1x8x8xf32>
    %221 = tpu.matmul %218, %219, %cst_99 {dimension_numbers = #tpu.dot_dimension_numbers<[2], [2], [1], [1], [0, 0, 0, 1, 1, 1], [0], [0]>} : vector<1x8x8xbf16>, vector<1x8x8xbf16>, vector<1x8x8xf32> -> vector<1x8x8xf32>
    "tpu.trace_stop"() : () -> ()
    %222 = arith.addf %221, %111 : vector<1x8x8xf32>
    %cst_100 = arith.constant dense<0xFF800000> : vector<1x8xf32>
    %223 = vector.multi_reduction <maximumf>, %222, %cst_100 [2] : vector<1x8x8xf32> to vector<1x8xf32>
    %224 = vector.shape_cast %223 : vector<1x8xf32> to vector<1x8x1xf32>
    %225 = vector.broadcast %224 : vector<1x8x1xf32> to vector<1x8x8xf32>
    %226 = arith.subf %222, %225 : vector<1x8x8xf32>
    %227 = math.exp %226 : vector<1x8x8xf32>
    %cst_101 = arith.constant dense<0.000000e+00> : vector<1x8xf32>
    %228 = vector.multi_reduction <add>, %227, %cst_101 [2] : vector<1x8x8xf32> to vector<1x8xf32>
    %229 = vector.shape_cast %228 : vector<1x8xf32> to vector<1x8x1xf32>
    %230 = tpu.reciprocal %229 {approx = true} : vector<1x8x1xf32> -> vector<1x8x1xf32>
    %231 = vector.broadcast %230 : vector<1x8x1xf32> to vector<1x8x8xf32>
    %232 = arith.mulf %227, %231 : vector<1x8x8xf32>
    %233 = arith.truncf %232 : vector<1x8x8xf32> to vector<1x8x8xbf16>
    "tpu.trace_start"() <{level = 10 : i32, message = "bts,bsd->btd"}> : () -> ()
    %cst_102 = arith.constant dense<0.000000e+00> : vector<1x8x8xf32>
    %234 = tpu.matmul %233, %220, %cst_102 {dimension_numbers = #tpu.dot_dimension_numbers<[2], [1], [1], [2], [0, 0, 0, 1, 1, 2], [0], [0]>} : vector<1x8x8xbf16>, vector<1x8x8xbf16>, vector<1x8x8xf32> -> vector<1x8x8xf32>
    "tpu.trace_stop"() : () -> ()
    %235 = vector.shape_cast %234 : vector<1x8x8xf32> to vector<8x8xf32>
    %236 = arith.truncf %235 : vector<8x8xf32> to vector<8x8xbf16>
    %c0_103 = arith.constant 0 : index
    %c3_104 = arith.constant 3 : index
    %c0_105 = arith.constant 0 : index
    %c0_106 = arith.constant 0 : index
    %237 = vector.load %arg7[%c0_103, %c3_104, %c0_105, %c0_106] : memref<4x4x8x32xbf16, #tpu.memory_space<vmem>>, vector<1x1x8x32xbf16>
    %238 = vector.shape_cast %237 : vector<1x1x8x32xbf16> to vector<8x32xbf16>
    %cst_107 = arith.constant dense<0.000000e+00> : vector<8x32xf32>
    %239 = tpu.matmul %236, %238, %cst_107 {dimension_numbers = #tpu.dot_dimension_numbers<[1], [0], [0], [1], [0, 0, 1, 1], [], []>} : vector<8x8xbf16>, vector<8x32xbf16>, vector<8x32xf32> -> vector<8x32xf32>
    %240 = arith.addf %217, %239 : vector<8x32xf32>
    %c0_108 = arith.constant 0 : index
    %c0_109 = arith.constant 0 : index
    %241 = vector.load %arg9[%c0_108, %c0_109] : memref<4x32xf32, #tpu.memory_space<vmem>>, vector<1x32xf32>
    %242 = vector.shape_cast %241 : vector<1x32xf32> to vector<32xf32>
    %c0_110 = arith.constant 0 : index
    %c0_111 = arith.constant 0 : index
    %243 = vector.load %arg10[%c0_110, %c0_111] : memref<4x32xf32, #tpu.memory_space<vmem>>, vector<1x32xf32>
    %244 = vector.shape_cast %243 : vector<1x32xf32> to vector<32xf32>
    %cst_112 = arith.constant dense<0.000000e+00> : vector<8xf32>
    %245 = vector.multi_reduction <add>, %240, %cst_112 [1] : vector<8x32xf32> to vector<8xf32>
    %246 = vector.shape_cast %245 : vector<8xf32> to vector<8x1xf32>
    %cst_113 = arith.constant 3.200000e+01 : f32
    %247 = vector.broadcast %cst_113 : f32 to vector<8x1xf32>
    %248 = arith.divf %246, %247 : vector<8x1xf32>
    %249 = vector.broadcast %248 : vector<8x1xf32> to vector<8x32xf32>
    %250 = arith.subf %240, %249 : vector<8x32xf32>
    %251 = arith.mulf %250, %250 : vector<8x32xf32>
    %cst_114 = arith.constant dense<0.000000e+00> : vector<8xf32>
    %252 = vector.multi_reduction <add>, %251, %cst_114 [1] : vector<8x32xf32> to vector<8xf32>
    %253 = vector.shape_cast %252 : vector<8xf32> to vector<8x1xf32>
    %cst_115 = arith.constant 3.200000e+01 : f32
    %254 = vector.broadcast %cst_115 : f32 to vector<8x1xf32>
    %255 = arith.divf %253, %254 : vector<8x1xf32>
    %cst_116 = arith.constant 9.99999974E-6 : f32
    %256 = vector.broadcast %cst_116 : f32 to vector<8x1xf32>
    %257 = arith.addf %255, %256 : vector<8x1xf32>
    %258 = math.rsqrt %257 : vector<8x1xf32>
    %259 = vector.broadcast %258 : vector<8x1xf32> to vector<8x32xf32>
    %260 = arith.mulf %250, %259 : vector<8x32xf32>
    %261 = vector.shape_cast %242 : vector<32xf32> to vector<1x32xf32>
    %262 = vector.broadcast %261 : vector<1x32xf32> to vector<8x32xf32>
    %263 = arith.mulf %260, %262 : vector<8x32xf32>
    %264 = vector.shape_cast %244 : vector<32xf32> to vector<1x32xf32>
    %265 = vector.broadcast %264 : vector<1x32xf32> to vector<8x32xf32>
    %266 = arith.addf %263, %265 : vector<8x32xf32>
    %267 = arith.truncf %266 : vector<8x32xf32> to vector<8x32xbf16>
    %c0_117 = arith.constant 0 : index
    %c0_118 = arith.constant 0 : index
    %c0_119 = arith.constant 0 : index
    %268 = vector.load %arg11[%c0_117, %c0_118, %c0_119] : memref<4x32x128xbf16, #tpu.memory_space<vmem>>, vector<1x32x128xbf16>
    %269 = vector.shape_cast %268 : vector<1x32x128xbf16> to vector<32x128xbf16>
    %cst_120 = arith.constant dense<0.000000e+00> : vector<8x128xf32>
    %270 = tpu.matmul %267, %269, %cst_120 {dimension_numbers = #tpu.dot_dimension_numbers<[1], [0], [0], [1], [0, 0, 1, 1], [], []>} : vector<8x32xbf16>, vector<32x128xbf16>, vector<8x128xf32> -> vector<8x128xf32>
    %c0_121 = arith.constant 0 : index
    %c0_122 = arith.constant 0 : index
    %271 = vector.load %arg12[%c0_121, %c0_122] : memref<4x128xf32, #tpu.memory_space<vmem>>, vector<1x128xf32>
    %272 = vector.shape_cast %271 : vector<1x128xf32> to vector<128xf32>
    %273 = vector.shape_cast %272 : vector<128xf32> to vector<1x128xf32>
    %274 = vector.broadcast %273 : vector<1x128xf32> to vector<8x128xf32>
    %275 = arith.addf %270, %274 : vector<8x128xf32>
    %cst_123 = arith.constant 0.000000e+00 : f32
    %276 = vector.broadcast %cst_123 : f32 to vector<8x128xf32>
    %277 = arith.maximumf %275, %276 : vector<8x128xf32>
    %278 = arith.truncf %277 : vector<8x128xf32> to vector<8x128xbf16>
    %c0_124 = arith.constant 0 : index
    %c0_125 = arith.constant 0 : index
    %c0_126 = arith.constant 0 : index
    %279 = vector.load %arg13[%c0_124, %c0_125, %c0_126] : memref<4x128x32xbf16, #tpu.memory_space<vmem>>, vector<1x128x32xbf16>
    %280 = vector.shape_cast %279 : vector<1x128x32xbf16> to vector<128x32xbf16>
    %cst_127 = arith.constant dense<0.000000e+00> : vector<8x32xf32>
    %281 = tpu.matmul %278, %280, %cst_127 {dimension_numbers = #tpu.dot_dimension_numbers<[1], [0], [0], [1], [0, 0, 1, 1], [], []>} : vector<8x128xbf16>, vector<128x32xbf16>, vector<8x32xf32> -> vector<8x32xf32>
    %c0_128 = arith.constant 0 : index
    %c0_129 = arith.constant 0 : index
    %282 = vector.load %arg14[%c0_128, %c0_129] : memref<4x32xf32, #tpu.memory_space<vmem>>, vector<1x32xf32>
    %283 = vector.shape_cast %282 : vector<1x32xf32> to vector<32xf32>
    %284 = vector.shape_cast %283 : vector<32xf32> to vector<1x32xf32>
    %285 = vector.broadcast %284 : vector<1x32xf32> to vector<8x32xf32>
    %286 = arith.addf %281, %285 : vector<8x32xf32>
    %287 = arith.addf %240, %286 : vector<8x32xf32>
    %c1_130 = arith.constant 1 : index
    %c0_131 = arith.constant 0 : index
    %288 = vector.load %arg4[%c1_130, %c0_131] : memref<4x32xf32, #tpu.memory_space<vmem>>, vector<1x32xf32>
    %289 = vector.shape_cast %288 : vector<1x32xf32> to vector<32xf32>
    %c1_132 = arith.constant 1 : index
    %c0_133 = arith.constant 0 : index
    %290 = vector.load %arg5[%c1_132, %c0_133] : memref<4x32xf32, #tpu.memory_space<vmem>>, vector<1x32xf32>
    %291 = vector.shape_cast %290 : vector<1x32xf32> to vector<32xf32>
    %cst_134 = arith.constant dense<0.000000e+00> : vector<8xf32>
    %292 = vector.multi_reduction <add>, %287, %cst_134 [1] : vector<8x32xf32> to vector<8xf32>
    %293 = vector.shape_cast %292 : vector<8xf32> to vector<8x1xf32>
    %cst_135 = arith.constant 3.200000e+01 : f32
    %294 = vector.broadcast %cst_135 : f32 to vector<8x1xf32>
    %295 = arith.divf %293, %294 : vector<8x1xf32>
    %296 = vector.broadcast %295 : vector<8x1xf32> to vector<8x32xf32>
    %297 = arith.subf %287, %296 : vector<8x32xf32>
    %298 = arith.mulf %297, %297 : vector<8x32xf32>
    %cst_136 = arith.constant dense<0.000000e+00> : vector<8xf32>
    %299 = vector.multi_reduction <add>, %298, %cst_136 [1] : vector<8x32xf32> to vector<8xf32>
    %300 = vector.shape_cast %299 : vector<8xf32> to vector<8x1xf32>
    %cst_137 = arith.constant 3.200000e+01 : f32
    %301 = vector.broadcast %cst_137 : f32 to vector<8x1xf32>
    %302 = arith.divf %300, %301 : vector<8x1xf32>
    %cst_138 = arith.constant 9.99999974E-6 : f32
    %303 = vector.broadcast %cst_138 : f32 to vector<8x1xf32>
    %304 = arith.addf %302, %303 : vector<8x1xf32>
    %305 = math.rsqrt %304 : vector<8x1xf32>
    %306 = vector.broadcast %305 : vector<8x1xf32> to vector<8x32xf32>
    %307 = arith.mulf %297, %306 : vector<8x32xf32>
    %308 = vector.shape_cast %289 : vector<32xf32> to vector<1x32xf32>
    %309 = vector.broadcast %308 : vector<1x32xf32> to vector<8x32xf32>
    %310 = arith.mulf %307, %309 : vector<8x32xf32>
    %311 = vector.shape_cast %291 : vector<32xf32> to vector<1x32xf32>
    %312 = vector.broadcast %311 : vector<1x32xf32> to vector<8x32xf32>
    %313 = arith.addf %310, %312 : vector<8x32xf32>
    %314 = arith.truncf %313 : vector<8x32xf32> to vector<8x32xbf16>
    %c1_139 = arith.constant 1 : index
    %c0_140 = arith.constant 0 : index
    %c0_141 = arith.constant 0 : index
    %315 = vector.load %arg6[%c1_139, %c0_140, %c0_141] : memref<4x32x96xbf16, #tpu.memory_space<vmem>>, vector<1x32x96xbf16>
    %316 = vector.shape_cast %315 : vector<1x32x96xbf16> to vector<32x96xbf16>
    %cst_142 = arith.constant dense<0.000000e+00> : vector<8x96xf32>
    %317 = tpu.matmul %314, %316, %cst_142 {dimension_numbers = #tpu.dot_dimension_numbers<[1], [0], [0], [1], [0, 0, 1, 1], [], []>} : vector<8x32xbf16>, vector<32x96xbf16>, vector<8x96xf32> -> vector<8x96xf32>
    %318 = arith.truncf %317 : vector<8x96xf32> to vector<8x96xbf16>
    %319 = vector.shape_cast %318 : vector<8x96xbf16> to vector<1x8x96xbf16>
    %c1_143 = arith.constant 1 : index
    %c0_144 = arith.constant 0 : index
    %320 = vector.load %arg8[%c1_143, %c0_144] : memref<4x32xf32, #tpu.memory_space<vmem>>, vector<1x32xf32>
    %321 = vector.shape_cast %320 : vector<1x32xf32> to vector<32xf32>
    %322 = vector.shape_cast %321 : vector<32xf32> to vector<1x32xf32>
    %323 = vector.broadcast %322 : vector<1x32xf32> to vector<8x32xf32>
    %324 = arith.addf %287, %323 : vector<8x32xf32>
    %325 = vector.extract_strided_slice %319 {offsets = [0, 0, 0], sizes = [1, 8, 8], strides = [1, 1, 1]} : vector<1x8x96xbf16> to vector<1x8x8xbf16>
    %326 = vector.extract_strided_slice %319 {offsets = [0, 0, 32], sizes = [1, 8, 8], strides = [1, 1, 1]} : vector<1x8x96xbf16> to vector<1x8x8xbf16>
    %327 = vector.extract_strided_slice %319 {offsets = [0, 0, 64], sizes = [1, 8, 8], strides = [1, 1, 1]} : vector<1x8x96xbf16> to vector<1x8x8xbf16>
    "tpu.trace_start"() <{level = 10 : i32, message = "btd,bsd->bts"}> : () -> ()
    %cst_145 = arith.constant dense<0.000000e+00> : vector<1x8x8xf32>
    %328 = tpu.matmul %325, %326, %cst_145 {dimension_numbers = #tpu.dot_dimension_numbers<[2], [2], [1], [1], [0, 0, 0, 1, 1, 1], [0], [0]>} : vector<1x8x8xbf16>, vector<1x8x8xbf16>, vector<1x8x8xf32> -> vector<1x8x8xf32>
    "tpu.trace_stop"() : () -> ()
    %329 = arith.addf %328, %111 : vector<1x8x8xf32>
    %cst_146 = arith.constant dense<0xFF800000> : vector<1x8xf32>
    %330 = vector.multi_reduction <maximumf>, %329, %cst_146 [2] : vector<1x8x8xf32> to vector<1x8xf32>
    %331 = vector.shape_cast %330 : vector<1x8xf32> to vector<1x8x1xf32>
    %332 = vector.broadcast %331 : vector<1x8x1xf32> to vector<1x8x8xf32>
    %333 = arith.subf %329, %332 : vector<1x8x8xf32>
    %334 = math.exp %333 : vector<1x8x8xf32>
    %cst_147 = arith.constant dense<0.000000e+00> : vector<1x8xf32>
    %335 = vector.multi_reduction <add>, %334, %cst_147 [2] : vector<1x8x8xf32> to vector<1x8xf32>
    %336 = vector.shape_cast %335 : vector<1x8xf32> to vector<1x8x1xf32>
    %337 = tpu.reciprocal %336 {approx = true} : vector<1x8x1xf32> -> vector<1x8x1xf32>
    %338 = vector.broadcast %337 : vector<1x8x1xf32> to vector<1x8x8xf32>
    %339 = arith.mulf %334, %338 : vector<1x8x8xf32>
    %340 = arith.truncf %339 : vector<1x8x8xf32> to vector<1x8x8xbf16>
    "tpu.trace_start"() <{level = 10 : i32, message = "bts,bsd->btd"}> : () -> ()
    %cst_148 = arith.constant dense<0.000000e+00> : vector<1x8x8xf32>
    %341 = tpu.matmul %340, %327, %cst_148 {dimension_numbers = #tpu.dot_dimension_numbers<[2], [1], [1], [2], [0, 0, 0, 1, 1, 2], [0], [0]>} : vector<1x8x8xbf16>, vector<1x8x8xbf16>, vector<1x8x8xf32> -> vector<1x8x8xf32>
    "tpu.trace_stop"() : () -> ()
    %342 = vector.shape_cast %341 : vector<1x8x8xf32> to vector<8x8xf32>
    %343 = arith.truncf %342 : vector<8x8xf32> to vector<8x8xbf16>
    %c1_149 = arith.constant 1 : index
    %c0_150 = arith.constant 0 : index
    %c0_151 = arith.constant 0 : index
    %c0_152 = arith.constant 0 : index
    %344 = vector.load %arg7[%c1_149, %c0_150, %c0_151, %c0_152] : memref<4x4x8x32xbf16, #tpu.memory_space<vmem>>, vector<1x1x8x32xbf16>
    %345 = vector.shape_cast %344 : vector<1x1x8x32xbf16> to vector<8x32xbf16>
    %cst_153 = arith.constant dense<0.000000e+00> : vector<8x32xf32>
    %346 = tpu.matmul %343, %345, %cst_153 {dimension_numbers = #tpu.dot_dimension_numbers<[1], [0], [0], [1], [0, 0, 1, 1], [], []>} : vector<8x8xbf16>, vector<8x32xbf16>, vector<8x32xf32> -> vector<8x32xf32>
    %347 = arith.addf %324, %346 : vector<8x32xf32>
    %348 = vector.extract_strided_slice %319 {offsets = [0, 0, 8], sizes = [1, 8, 8], strides = [1, 1, 1]} : vector<1x8x96xbf16> to vector<1x8x8xbf16>
    %349 = vector.extract_strided_slice %319 {offsets = [0, 0, 40], sizes = [1, 8, 8], strides = [1, 1, 1]} : vector<1x8x96xbf16> to vector<1x8x8xbf16>
    %350 = vector.extract_strided_slice %319 {offsets = [0, 0, 72], sizes = [1, 8, 8], strides = [1, 1, 1]} : vector<1x8x96xbf16> to vector<1x8x8xbf16>
    "tpu.trace_start"() <{level = 10 : i32, message = "btd,bsd->bts"}> : () -> ()
    %cst_154 = arith.constant dense<0.000000e+00> : vector<1x8x8xf32>
    %351 = tpu.matmul %348, %349, %cst_154 {dimension_numbers = #tpu.dot_dimension_numbers<[2], [2], [1], [1], [0, 0, 0, 1, 1, 1], [0], [0]>} : vector<1x8x8xbf16>, vector<1x8x8xbf16>, vector<1x8x8xf32> -> vector<1x8x8xf32>
    "tpu.trace_stop"() : () -> ()
    %352 = arith.addf %351, %111 : vector<1x8x8xf32>
    %cst_155 = arith.constant dense<0xFF800000> : vector<1x8xf32>
    %353 = vector.multi_reduction <maximumf>, %352, %cst_155 [2] : vector<1x8x8xf32> to vector<1x8xf32>
    %354 = vector.shape_cast %353 : vector<1x8xf32> to vector<1x8x1xf32>
    %355 = vector.broadcast %354 : vector<1x8x1xf32> to vector<1x8x8xf32>
    %356 = arith.subf %352, %355 : vector<1x8x8xf32>
    %357 = math.exp %356 : vector<1x8x8xf32>
    %cst_156 = arith.constant dense<0.000000e+00> : vector<1x8xf32>
    %358 = vector.multi_reduction <add>, %357, %cst_156 [2] : vector<1x8x8xf32> to vector<1x8xf32>
    %359 = vector.shape_cast %358 : vector<1x8xf32> to vector<1x8x1xf32>
    %360 = tpu.reciprocal %359 {approx = true} : vector<1x8x1xf32> -> vector<1x8x1xf32>
    %361 = vector.broadcast %360 : vector<1x8x1xf32> to vector<1x8x8xf32>
    %362 = arith.mulf %357, %361 : vector<1x8x8xf32>
    %363 = arith.truncf %362 : vector<1x8x8xf32> to vector<1x8x8xbf16>
    "tpu.trace_start"() <{level = 10 : i32, message = "bts,bsd->btd"}> : () -> ()
    %cst_157 = arith.constant dense<0.000000e+00> : vector<1x8x8xf32>
    %364 = tpu.matmul %363, %350, %cst_157 {dimension_numbers = #tpu.dot_dimension_numbers<[2], [1], [1], [2], [0, 0, 0, 1, 1, 2], [0], [0]>} : vector<1x8x8xbf16>, vector<1x8x8xbf16>, vector<1x8x8xf32> -> vector<1x8x8xf32>
    "tpu.trace_stop"() : () -> ()
    %365 = vector.shape_cast %364 : vector<1x8x8xf32> to vector<8x8xf32>
    %366 = arith.truncf %365 : vector<8x8xf32> to vector<8x8xbf16>
    %c1_158 = arith.constant 1 : index
    %c1_159 = arith.constant 1 : index
    %c0_160 = arith.constant 0 : index
    %c0_161 = arith.constant 0 : index
    %367 = vector.load %arg7[%c1_158, %c1_159, %c0_160, %c0_161] : memref<4x4x8x32xbf16, #tpu.memory_space<vmem>>, vector<1x1x8x32xbf16>
    %368 = vector.shape_cast %367 : vector<1x1x8x32xbf16> to vector<8x32xbf16>
    %cst_162 = arith.constant dense<0.000000e+00> : vector<8x32xf32>
    %369 = tpu.matmul %366, %368, %cst_162 {dimension_numbers = #tpu.dot_dimension_numbers<[1], [0], [0], [1], [0, 0, 1, 1], [], []>} : vector<8x8xbf16>, vector<8x32xbf16>, vector<8x32xf32> -> vector<8x32xf32>
    %370 = arith.addf %347, %369 : vector<8x32xf32>
    %371 = vector.extract_strided_slice %319 {offsets = [0, 0, 16], sizes = [1, 8, 8], strides = [1, 1, 1]} : vector<1x8x96xbf16> to vector<1x8x8xbf16>
    %372 = vector.extract_strided_slice %319 {offsets = [0, 0, 48], sizes = [1, 8, 8], strides = [1, 1, 1]} : vector<1x8x96xbf16> to vector<1x8x8xbf16>
    %373 = vector.extract_strided_slice %319 {offsets = [0, 0, 80], sizes = [1, 8, 8], strides = [1, 1, 1]} : vector<1x8x96xbf16> to vector<1x8x8xbf16>
    "tpu.trace_start"() <{level = 10 : i32, message = "btd,bsd->bts"}> : () -> ()
    %cst_163 = arith.constant dense<0.000000e+00> : vector<1x8x8xf32>
    %374 = tpu.matmul %371, %372, %cst_163 {dimension_numbers = #tpu.dot_dimension_numbers<[2], [2], [1], [1], [0, 0, 0, 1, 1, 1], [0], [0]>} : vector<1x8x8xbf16>, vector<1x8x8xbf16>, vector<1x8x8xf32> -> vector<1x8x8xf32>
    "tpu.trace_stop"() : () -> ()
    %375 = arith.addf %374, %111 : vector<1x8x8xf32>
    %cst_164 = arith.constant dense<0xFF800000> : vector<1x8xf32>
    %376 = vector.multi_reduction <maximumf>, %375, %cst_164 [2] : vector<1x8x8xf32> to vector<1x8xf32>
    %377 = vector.shape_cast %376 : vector<1x8xf32> to vector<1x8x1xf32>
    %378 = vector.broadcast %377 : vector<1x8x1xf32> to vector<1x8x8xf32>
    %379 = arith.subf %375, %378 : vector<1x8x8xf32>
    %380 = math.exp %379 : vector<1x8x8xf32>
    %cst_165 = arith.constant dense<0.000000e+00> : vector<1x8xf32>
    %381 = vector.multi_reduction <add>, %380, %cst_165 [2] : vector<1x8x8xf32> to vector<1x8xf32>
    %382 = vector.shape_cast %381 : vector<1x8xf32> to vector<1x8x1xf32>
    %383 = tpu.reciprocal %382 {approx = true} : vector<1x8x1xf32> -> vector<1x8x1xf32>
    %384 = vector.broadcast %383 : vector<1x8x1xf32> to vector<1x8x8xf32>
    %385 = arith.mulf %380, %384 : vector<1x8x8xf32>
    %386 = arith.truncf %385 : vector<1x8x8xf32> to vector<1x8x8xbf16>
    "tpu.trace_start"() <{level = 10 : i32, message = "bts,bsd->btd"}> : () -> ()
    %cst_166 = arith.constant dense<0.000000e+00> : vector<1x8x8xf32>
    %387 = tpu.matmul %386, %373, %cst_166 {dimension_numbers = #tpu.dot_dimension_numbers<[2], [1], [1], [2], [0, 0, 0, 1, 1, 2], [0], [0]>} : vector<1x8x8xbf16>, vector<1x8x8xbf16>, vector<1x8x8xf32> -> vector<1x8x8xf32>
    "tpu.trace_stop"() : () -> ()
    %388 = vector.shape_cast %387 : vector<1x8x8xf32> to vector<8x8xf32>
    %389 = arith.truncf %388 : vector<8x8xf32> to vector<8x8xbf16>
    %c1_167 = arith.constant 1 : index
    %c2_168 = arith.constant 2 : index
    %c0_169 = arith.constant 0 : index
    %c0_170 = arith.constant 0 : index
    %390 = vector.load %arg7[%c1_167, %c2_168, %c0_169, %c0_170] : memref<4x4x8x32xbf16, #tpu.memory_space<vmem>>, vector<1x1x8x32xbf16>
    %391 = vector.shape_cast %390 : vector<1x1x8x32xbf16> to vector<8x32xbf16>
    %cst_171 = arith.constant dense<0.000000e+00> : vector<8x32xf32>
    %392 = tpu.matmul %389, %391, %cst_171 {dimension_numbers = #tpu.dot_dimension_numbers<[1], [0], [0], [1], [0, 0, 1, 1], [], []>} : vector<8x8xbf16>, vector<8x32xbf16>, vector<8x32xf32> -> vector<8x32xf32>
    %393 = arith.addf %370, %392 : vector<8x32xf32>
    %394 = vector.extract_strided_slice %319 {offsets = [0, 0, 24], sizes = [1, 8, 8], strides = [1, 1, 1]} : vector<1x8x96xbf16> to vector<1x8x8xbf16>
    %395 = vector.extract_strided_slice %319 {offsets = [0, 0, 56], sizes = [1, 8, 8], strides = [1, 1, 1]} : vector<1x8x96xbf16> to vector<1x8x8xbf16>
    %396 = vector.extract_strided_slice %319 {offsets = [0, 0, 88], sizes = [1, 8, 8], strides = [1, 1, 1]} : vector<1x8x96xbf16> to vector<1x8x8xbf16>
    "tpu.trace_start"() <{level = 10 : i32, message = "btd,bsd->bts"}> : () -> ()
    %cst_172 = arith.constant dense<0.000000e+00> : vector<1x8x8xf32>
    %397 = tpu.matmul %394, %395, %cst_172 {dimension_numbers = #tpu.dot_dimension_numbers<[2], [2], [1], [1], [0, 0, 0, 1, 1, 1], [0], [0]>} : vector<1x8x8xbf16>, vector<1x8x8xbf16>, vector<1x8x8xf32> -> vector<1x8x8xf32>
    "tpu.trace_stop"() : () -> ()
    %398 = arith.addf %397, %111 : vector<1x8x8xf32>
    %cst_173 = arith.constant dense<0xFF800000> : vector<1x8xf32>
    %399 = vector.multi_reduction <maximumf>, %398, %cst_173 [2] : vector<1x8x8xf32> to vector<1x8xf32>
    %400 = vector.shape_cast %399 : vector<1x8xf32> to vector<1x8x1xf32>
    %401 = vector.broadcast %400 : vector<1x8x1xf32> to vector<1x8x8xf32>
    %402 = arith.subf %398, %401 : vector<1x8x8xf32>
    %403 = math.exp %402 : vector<1x8x8xf32>
    %cst_174 = arith.constant dense<0.000000e+00> : vector<1x8xf32>
    %404 = vector.multi_reduction <add>, %403, %cst_174 [2] : vector<1x8x8xf32> to vector<1x8xf32>
    %405 = vector.shape_cast %404 : vector<1x8xf32> to vector<1x8x1xf32>
    %406 = tpu.reciprocal %405 {approx = true} : vector<1x8x1xf32> -> vector<1x8x1xf32>
    %407 = vector.broadcast %406 : vector<1x8x1xf32> to vector<1x8x8xf32>
    %408 = arith.mulf %403, %407 : vector<1x8x8xf32>
    %409 = arith.truncf %408 : vector<1x8x8xf32> to vector<1x8x8xbf16>
    "tpu.trace_start"() <{level = 10 : i32, message = "bts,bsd->btd"}> : () -> ()
    %cst_175 = arith.constant dense<0.000000e+00> : vector<1x8x8xf32>
    %410 = tpu.matmul %409, %396, %cst_175 {dimension_numbers = #tpu.dot_dimension_numbers<[2], [1], [1], [2], [0, 0, 0, 1, 1, 2], [0], [0]>} : vector<1x8x8xbf16>, vector<1x8x8xbf16>, vector<1x8x8xf32> -> vector<1x8x8xf32>
    "tpu.trace_stop"() : () -> ()
    %411 = vector.shape_cast %410 : vector<1x8x8xf32> to vector<8x8xf32>
    %412 = arith.truncf %411 : vector<8x8xf32> to vector<8x8xbf16>
    %c1_176 = arith.constant 1 : index
    %c3_177 = arith.constant 3 : index
    %c0_178 = arith.constant 0 : index
    %c0_179 = arith.constant 0 : index
    %413 = vector.load %arg7[%c1_176, %c3_177, %c0_178, %c0_179] : memref<4x4x8x32xbf16, #tpu.memory_space<vmem>>, vector<1x1x8x32xbf16>
    %414 = vector.shape_cast %413 : vector<1x1x8x32xbf16> to vector<8x32xbf16>
    %cst_180 = arith.constant dense<0.000000e+00> : vector<8x32xf32>
    %415 = tpu.matmul %412, %414, %cst_180 {dimension_numbers = #tpu.dot_dimension_numbers<[1], [0], [0], [1], [0, 0, 1, 1], [], []>} : vector<8x8xbf16>, vector<8x32xbf16>, vector<8x32xf32> -> vector<8x32xf32>
    %416 = arith.addf %393, %415 : vector<8x32xf32>
    %c1_181 = arith.constant 1 : index
    %c0_182 = arith.constant 0 : index
    %417 = vector.load %arg9[%c1_181, %c0_182] : memref<4x32xf32, #tpu.memory_space<vmem>>, vector<1x32xf32>
    %418 = vector.shape_cast %417 : vector<1x32xf32> to vector<32xf32>
    %c1_183 = arith.constant 1 : index
    %c0_184 = arith.constant 0 : index
    %419 = vector.load %arg10[%c1_183, %c0_184] : memref<4x32xf32, #tpu.memory_space<vmem>>, vector<1x32xf32>
    %420 = vector.shape_cast %419 : vector<1x32xf32> to vector<32xf32>
    %cst_185 = arith.constant dense<0.000000e+00> : vector<8xf32>
    %421 = vector.multi_reduction <add>, %416, %cst_185 [1] : vector<8x32xf32> to vector<8xf32>
    %422 = vector.shape_cast %421 : vector<8xf32> to vector<8x1xf32>
    %cst_186 = arith.constant 3.200000e+01 : f32
    %423 = vector.broadcast %cst_186 : f32 to vector<8x1xf32>
    %424 = arith.divf %422, %423 : vector<8x1xf32>
    %425 = vector.broadcast %424 : vector<8x1xf32> to vector<8x32xf32>
    %426 = arith.subf %416, %425 : vector<8x32xf32>
    %427 = arith.mulf %426, %426 : vector<8x32xf32>
    %cst_187 = arith.constant dense<0.000000e+00> : vector<8xf32>
    %428 = vector.multi_reduction <add>, %427, %cst_187 [1] : vector<8x32xf32> to vector<8xf32>
    %429 = vector.shape_cast %428 : vector<8xf32> to vector<8x1xf32>
    %cst_188 = arith.constant 3.200000e+01 : f32
    %430 = vector.broadcast %cst_188 : f32 to vector<8x1xf32>
    %431 = arith.divf %429, %430 : vector<8x1xf32>
    %cst_189 = arith.constant 9.99999974E-6 : f32
    %432 = vector.broadcast %cst_189 : f32 to vector<8x1xf32>
    %433 = arith.addf %431, %432 : vector<8x1xf32>
    %434 = math.rsqrt %433 : vector<8x1xf32>
    %435 = vector.broadcast %434 : vector<8x1xf32> to vector<8x32xf32>
    %436 = arith.mulf %426, %435 : vector<8x32xf32>
    %437 = vector.shape_cast %418 : vector<32xf32> to vector<1x32xf32>
    %438 = vector.broadcast %437 : vector<1x32xf32> to vector<8x32xf32>
    %439 = arith.mulf %436, %438 : vector<8x32xf32>
    %440 = vector.shape_cast %420 : vector<32xf32> to vector<1x32xf32>
    %441 = vector.broadcast %440 : vector<1x32xf32> to vector<8x32xf32>
    %442 = arith.addf %439, %441 : vector<8x32xf32>
    %443 = arith.truncf %442 : vector<8x32xf32> to vector<8x32xbf16>
    %c1_190 = arith.constant 1 : index
    %c0_191 = arith.constant 0 : index
    %c0_192 = arith.constant 0 : index
    %444 = vector.load %arg11[%c1_190, %c0_191, %c0_192] : memref<4x32x128xbf16, #tpu.memory_space<vmem>>, vector<1x32x128xbf16>
    %445 = vector.shape_cast %444 : vector<1x32x128xbf16> to vector<32x128xbf16>
    %cst_193 = arith.constant dense<0.000000e+00> : vector<8x128xf32>
    %446 = tpu.matmul %443, %445, %cst_193 {dimension_numbers = #tpu.dot_dimension_numbers<[1], [0], [0], [1], [0, 0, 1, 1], [], []>} : vector<8x32xbf16>, vector<32x128xbf16>, vector<8x128xf32> -> vector<8x128xf32>
    %c1_194 = arith.constant 1 : index
    %c0_195 = arith.constant 0 : index
    %447 = vector.load %arg12[%c1_194, %c0_195] : memref<4x128xf32, #tpu.memory_space<vmem>>, vector<1x128xf32>
    %448 = vector.shape_cast %447 : vector<1x128xf32> to vector<128xf32>
    %449 = vector.shape_cast %448 : vector<128xf32> to vector<1x128xf32>
    %450 = vector.broadcast %449 : vector<1x128xf32> to vector<8x128xf32>
    %451 = arith.addf %446, %450 : vector<8x128xf32>
    %cst_196 = arith.constant 0.000000e+00 : f32
    %452 = vector.broadcast %cst_196 : f32 to vector<8x128xf32>
    %453 = arith.maximumf %451, %452 : vector<8x128xf32>
    %454 = arith.truncf %453 : vector<8x128xf32> to vector<8x128xbf16>
    %c1_197 = arith.constant 1 : index
    %c0_198 = arith.constant 0 : index
    %c0_199 = arith.constant 0 : index
    %455 = vector.load %arg13[%c1_197, %c0_198, %c0_199] : memref<4x128x32xbf16, #tpu.memory_space<vmem>>, vector<1x128x32xbf16>
    %456 = vector.shape_cast %455 : vector<1x128x32xbf16> to vector<128x32xbf16>
    %cst_200 = arith.constant dense<0.000000e+00> : vector<8x32xf32>
    %457 = tpu.matmul %454, %456, %cst_200 {dimension_numbers = #tpu.dot_dimension_numbers<[1], [0], [0], [1], [0, 0, 1, 1], [], []>} : vector<8x128xbf16>, vector<128x32xbf16>, vector<8x32xf32> -> vector<8x32xf32>
    %c1_201 = arith.constant 1 : index
    %c0_202 = arith.constant 0 : index
    %458 = vector.load %arg14[%c1_201, %c0_202] : memref<4x32xf32, #tpu.memory_space<vmem>>, vector<1x32xf32>
    %459 = vector.shape_cast %458 : vector<1x32xf32> to vector<32xf32>
    %460 = vector.shape_cast %459 : vector<32xf32> to vector<1x32xf32>
    %461 = vector.broadcast %460 : vector<1x32xf32> to vector<8x32xf32>
    %462 = arith.addf %457, %461 : vector<8x32xf32>
    %463 = arith.addf %416, %462 : vector<8x32xf32>
    %c2_203 = arith.constant 2 : index
    %c0_204 = arith.constant 0 : index
    %464 = vector.load %arg4[%c2_203, %c0_204] : memref<4x32xf32, #tpu.memory_space<vmem>>, vector<1x32xf32>
    %465 = vector.shape_cast %464 : vector<1x32xf32> to vector<32xf32>
    %c2_205 = arith.constant 2 : index
    %c0_206 = arith.constant 0 : index
    %466 = vector.load %arg5[%c2_205, %c0_206] : memref<4x32xf32, #tpu.memory_space<vmem>>, vector<1x32xf32>
    %467 = vector.shape_cast %466 : vector<1x32xf32> to vector<32xf32>
    %cst_207 = arith.constant dense<0.000000e+00> : vector<8xf32>
    %468 = vector.multi_reduction <add>, %463, %cst_207 [1] : vector<8x32xf32> to vector<8xf32>
    %469 = vector.shape_cast %468 : vector<8xf32> to vector<8x1xf32>
    %cst_208 = arith.constant 3.200000e+01 : f32
    %470 = vector.broadcast %cst_208 : f32 to vector<8x1xf32>
    %471 = arith.divf %469, %470 : vector<8x1xf32>
    %472 = vector.broadcast %471 : vector<8x1xf32> to vector<8x32xf32>
    %473 = arith.subf %463, %472 : vector<8x32xf32>
    %474 = arith.mulf %473, %473 : vector<8x32xf32>
    %cst_209 = arith.constant dense<0.000000e+00> : vector<8xf32>
    %475 = vector.multi_reduction <add>, %474, %cst_209 [1] : vector<8x32xf32> to vector<8xf32>
    %476 = vector.shape_cast %475 : vector<8xf32> to vector<8x1xf32>
    %cst_210 = arith.constant 3.200000e+01 : f32
    %477 = vector.broadcast %cst_210 : f32 to vector<8x1xf32>
    %478 = arith.divf %476, %477 : vector<8x1xf32>
    %cst_211 = arith.constant 9.99999974E-6 : f32
    %479 = vector.broadcast %cst_211 : f32 to vector<8x1xf32>
    %480 = arith.addf %478, %479 : vector<8x1xf32>
    %481 = math.rsqrt %480 : vector<8x1xf32>
    %482 = vector.broadcast %481 : vector<8x1xf32> to vector<8x32xf32>
    %483 = arith.mulf %473, %482 : vector<8x32xf32>
    %484 = vector.shape_cast %465 : vector<32xf32> to vector<1x32xf32>
    %485 = vector.broadcast %484 : vector<1x32xf32> to vector<8x32xf32>
    %486 = arith.mulf %483, %485 : vector<8x32xf32>
    %487 = vector.shape_cast %467 : vector<32xf32> to vector<1x32xf32>
    %488 = vector.broadcast %487 : vector<1x32xf32> to vector<8x32xf32>
    %489 = arith.addf %486, %488 : vector<8x32xf32>
    %490 = arith.truncf %489 : vector<8x32xf32> to vector<8x32xbf16>
    %c2_212 = arith.constant 2 : index
    %c0_213 = arith.constant 0 : index
    %c0_214 = arith.constant 0 : index
    %491 = vector.load %arg6[%c2_212, %c0_213, %c0_214] : memref<4x32x96xbf16, #tpu.memory_space<vmem>>, vector<1x32x96xbf16>
    %492 = vector.shape_cast %491 : vector<1x32x96xbf16> to vector<32x96xbf16>
    %cst_215 = arith.constant dense<0.000000e+00> : vector<8x96xf32>
    %493 = tpu.matmul %490, %492, %cst_215 {dimension_numbers = #tpu.dot_dimension_numbers<[1], [0], [0], [1], [0, 0, 1, 1], [], []>} : vector<8x32xbf16>, vector<32x96xbf16>, vector<8x96xf32> -> vector<8x96xf32>
    %494 = arith.truncf %493 : vector<8x96xf32> to vector<8x96xbf16>
    %495 = vector.shape_cast %494 : vector<8x96xbf16> to vector<1x8x96xbf16>
    %c2_216 = arith.constant 2 : index
    %c0_217 = arith.constant 0 : index
    %496 = vector.load %arg8[%c2_216, %c0_217] : memref<4x32xf32, #tpu.memory_space<vmem>>, vector<1x32xf32>
    %497 = vector.shape_cast %496 : vector<1x32xf32> to vector<32xf32>
    %498 = vector.shape_cast %497 : vector<32xf32> to vector<1x32xf32>
    %499 = vector.broadcast %498 : vector<1x32xf32> to vector<8x32xf32>
    %500 = arith.addf %463, %499 : vector<8x32xf32>
    %501 = vector.extract_strided_slice %495 {offsets = [0, 0, 0], sizes = [1, 8, 8], strides = [1, 1, 1]} : vector<1x8x96xbf16> to vector<1x8x8xbf16>
    %502 = vector.extract_strided_slice %495 {offsets = [0, 0, 32], sizes = [1, 8, 8], strides = [1, 1, 1]} : vector<1x8x96xbf16> to vector<1x8x8xbf16>
    %503 = vector.extract_strided_slice %495 {offsets = [0, 0, 64], sizes = [1, 8, 8], strides = [1, 1, 1]} : vector<1x8x96xbf16> to vector<1x8x8xbf16>
    "tpu.trace_start"() <{level = 10 : i32, message = "btd,bsd->bts"}> : () -> ()
    %cst_218 = arith.constant dense<0.000000e+00> : vector<1x8x8xf32>
    %504 = tpu.matmul %501, %502, %cst_218 {dimension_numbers = #tpu.dot_dimension_numbers<[2], [2], [1], [1], [0, 0, 0, 1, 1, 1], [0], [0]>} : vector<1x8x8xbf16>, vector<1x8x8xbf16>, vector<1x8x8xf32> -> vector<1x8x8xf32>
    "tpu.trace_stop"() : () -> ()
    %505 = arith.addf %504, %111 : vector<1x8x8xf32>
    %cst_219 = arith.constant dense<0xFF800000> : vector<1x8xf32>
    %506 = vector.multi_reduction <maximumf>, %505, %cst_219 [2] : vector<1x8x8xf32> to vector<1x8xf32>
    %507 = vector.shape_cast %506 : vector<1x8xf32> to vector<1x8x1xf32>
    %508 = vector.broadcast %507 : vector<1x8x1xf32> to vector<1x8x8xf32>
    %509 = arith.subf %505, %508 : vector<1x8x8xf32>
    %510 = math.exp %509 : vector<1x8x8xf32>
    %cst_220 = arith.constant dense<0.000000e+00> : vector<1x8xf32>
    %511 = vector.multi_reduction <add>, %510, %cst_220 [2] : vector<1x8x8xf32> to vector<1x8xf32>
    %512 = vector.shape_cast %511 : vector<1x8xf32> to vector<1x8x1xf32>
    %513 = tpu.reciprocal %512 {approx = true} : vector<1x8x1xf32> -> vector<1x8x1xf32>
    %514 = vector.broadcast %513 : vector<1x8x1xf32> to vector<1x8x8xf32>
    %515 = arith.mulf %510, %514 : vector<1x8x8xf32>
    %516 = arith.truncf %515 : vector<1x8x8xf32> to vector<1x8x8xbf16>
    "tpu.trace_start"() <{level = 10 : i32, message = "bts,bsd->btd"}> : () -> ()
    %cst_221 = arith.constant dense<0.000000e+00> : vector<1x8x8xf32>
    %517 = tpu.matmul %516, %503, %cst_221 {dimension_numbers = #tpu.dot_dimension_numbers<[2], [1], [1], [2], [0, 0, 0, 1, 1, 2], [0], [0]>} : vector<1x8x8xbf16>, vector<1x8x8xbf16>, vector<1x8x8xf32> -> vector<1x8x8xf32>
    "tpu.trace_stop"() : () -> ()
    %518 = vector.shape_cast %517 : vector<1x8x8xf32> to vector<8x8xf32>
    %519 = arith.truncf %518 : vector<8x8xf32> to vector<8x8xbf16>
    %c2_222 = arith.constant 2 : index
    %c0_223 = arith.constant 0 : index
    %c0_224 = arith.constant 0 : index
    %c0_225 = arith.constant 0 : index
    %520 = vector.load %arg7[%c2_222, %c0_223, %c0_224, %c0_225] : memref<4x4x8x32xbf16, #tpu.memory_space<vmem>>, vector<1x1x8x32xbf16>
    %521 = vector.shape_cast %520 : vector<1x1x8x32xbf16> to vector<8x32xbf16>
    %cst_226 = arith.constant dense<0.000000e+00> : vector<8x32xf32>
    %522 = tpu.matmul %519, %521, %cst_226 {dimension_numbers = #tpu.dot_dimension_numbers<[1], [0], [0], [1], [0, 0, 1, 1], [], []>} : vector<8x8xbf16>, vector<8x32xbf16>, vector<8x32xf32> -> vector<8x32xf32>
    %523 = arith.addf %500, %522 : vector<8x32xf32>
    %524 = vector.extract_strided_slice %495 {offsets = [0, 0, 8], sizes = [1, 8, 8], strides = [1, 1, 1]} : vector<1x8x96xbf16> to vector<1x8x8xbf16>
    %525 = vector.extract_strided_slice %495 {offsets = [0, 0, 40], sizes = [1, 8, 8], strides = [1, 1, 1]} : vector<1x8x96xbf16> to vector<1x8x8xbf16>
    %526 = vector.extract_strided_slice %495 {offsets = [0, 0, 72], sizes = [1, 8, 8], strides = [1, 1, 1]} : vector<1x8x96xbf16> to vector<1x8x8xbf16>
    "tpu.trace_start"() <{level = 10 : i32, message = "btd,bsd->bts"}> : () -> ()
    %cst_227 = arith.constant dense<0.000000e+00> : vector<1x8x8xf32>
    %527 = tpu.matmul %524, %525, %cst_227 {dimension_numbers = #tpu.dot_dimension_numbers<[2], [2], [1], [1], [0, 0, 0, 1, 1, 1], [0], [0]>} : vector<1x8x8xbf16>, vector<1x8x8xbf16>, vector<1x8x8xf32> -> vector<1x8x8xf32>
    "tpu.trace_stop"() : () -> ()
    %528 = arith.addf %527, %111 : vector<1x8x8xf32>
    %cst_228 = arith.constant dense<0xFF800000> : vector<1x8xf32>
    %529 = vector.multi_reduction <maximumf>, %528, %cst_228 [2] : vector<1x8x8xf32> to vector<1x8xf32>
    %530 = vector.shape_cast %529 : vector<1x8xf32> to vector<1x8x1xf32>
    %531 = vector.broadcast %530 : vector<1x8x1xf32> to vector<1x8x8xf32>
    %532 = arith.subf %528, %531 : vector<1x8x8xf32>
    %533 = math.exp %532 : vector<1x8x8xf32>
    %cst_229 = arith.constant dense<0.000000e+00> : vector<1x8xf32>
    %534 = vector.multi_reduction <add>, %533, %cst_229 [2] : vector<1x8x8xf32> to vector<1x8xf32>
    %535 = vector.shape_cast %534 : vector<1x8xf32> to vector<1x8x1xf32>
    %536 = tpu.reciprocal %535 {approx = true} : vector<1x8x1xf32> -> vector<1x8x1xf32>
    %537 = vector.broadcast %536 : vector<1x8x1xf32> to vector<1x8x8xf32>
    %538 = arith.mulf %533, %537 : vector<1x8x8xf32>
    %539 = arith.truncf %538 : vector<1x8x8xf32> to vector<1x8x8xbf16>
    "tpu.trace_start"() <{level = 10 : i32, message = "bts,bsd->btd"}> : () -> ()
    %cst_230 = arith.constant dense<0.000000e+00> : vector<1x8x8xf32>
    %540 = tpu.matmul %539, %526, %cst_230 {dimension_numbers = #tpu.dot_dimension_numbers<[2], [1], [1], [2], [0, 0, 0, 1, 1, 2], [0], [0]>} : vector<1x8x8xbf16>, vector<1x8x8xbf16>, vector<1x8x8xf32> -> vector<1x8x8xf32>
    "tpu.trace_stop"() : () -> ()
    %541 = vector.shape_cast %540 : vector<1x8x8xf32> to vector<8x8xf32>
    %542 = arith.truncf %541 : vector<8x8xf32> to vector<8x8xbf16>
    %c2_231 = arith.constant 2 : index
    %c1_232 = arith.constant 1 : index
    %c0_233 = arith.constant 0 : index
    %c0_234 = arith.constant 0 : index
    %543 = vector.load %arg7[%c2_231, %c1_232, %c0_233, %c0_234] : memref<4x4x8x32xbf16, #tpu.memory_space<vmem>>, vector<1x1x8x32xbf16>
    %544 = vector.shape_cast %543 : vector<1x1x8x32xbf16> to vector<8x32xbf16>
    %cst_235 = arith.constant dense<0.000000e+00> : vector<8x32xf32>
    %545 = tpu.matmul %542, %544, %cst_235 {dimension_numbers = #tpu.dot_dimension_numbers<[1], [0], [0], [1], [0, 0, 1, 1], [], []>} : vector<8x8xbf16>, vector<8x32xbf16>, vector<8x32xf32> -> vector<8x32xf32>
    %546 = arith.addf %523, %545 : vector<8x32xf32>
    %547 = vector.extract_strided_slice %495 {offsets = [0, 0, 16], sizes = [1, 8, 8], strides = [1, 1, 1]} : vector<1x8x96xbf16> to vector<1x8x8xbf16>
    %548 = vector.extract_strided_slice %495 {offsets = [0, 0, 48], sizes = [1, 8, 8], strides = [1, 1, 1]} : vector<1x8x96xbf16> to vector<1x8x8xbf16>
    %549 = vector.extract_strided_slice %495 {offsets = [0, 0, 80], sizes = [1, 8, 8], strides = [1, 1, 1]} : vector<1x8x96xbf16> to vector<1x8x8xbf16>
    "tpu.trace_start"() <{level = 10 : i32, message = "btd,bsd->bts"}> : () -> ()
    %cst_236 = arith.constant dense<0.000000e+00> : vector<1x8x8xf32>
    %550 = tpu.matmul %547, %548, %cst_236 {dimension_numbers = #tpu.dot_dimension_numbers<[2], [2], [1], [1], [0, 0, 0, 1, 1, 1], [0], [0]>} : vector<1x8x8xbf16>, vector<1x8x8xbf16>, vector<1x8x8xf32> -> vector<1x8x8xf32>
    "tpu.trace_stop"() : () -> ()
    %551 = arith.addf %550, %111 : vector<1x8x8xf32>
    %cst_237 = arith.constant dense<0xFF800000> : vector<1x8xf32>
    %552 = vector.multi_reduction <maximumf>, %551, %cst_237 [2] : vector<1x8x8xf32> to vector<1x8xf32>
    %553 = vector.shape_cast %552 : vector<1x8xf32> to vector<1x8x1xf32>
    %554 = vector.broadcast %553 : vector<1x8x1xf32> to vector<1x8x8xf32>
    %555 = arith.subf %551, %554 : vector<1x8x8xf32>
    %556 = math.exp %555 : vector<1x8x8xf32>
    %cst_238 = arith.constant dense<0.000000e+00> : vector<1x8xf32>
    %557 = vector.multi_reduction <add>, %556, %cst_238 [2] : vector<1x8x8xf32> to vector<1x8xf32>
    %558 = vector.shape_cast %557 : vector<1x8xf32> to vector<1x8x1xf32>
    %559 = tpu.reciprocal %558 {approx = true} : vector<1x8x1xf32> -> vector<1x8x1xf32>
    %560 = vector.broadcast %559 : vector<1x8x1xf32> to vector<1x8x8xf32>
    %561 = arith.mulf %556, %560 : vector<1x8x8xf32>
    %562 = arith.truncf %561 : vector<1x8x8xf32> to vector<1x8x8xbf16>
    "tpu.trace_start"() <{level = 10 : i32, message = "bts,bsd->btd"}> : () -> ()
    %cst_239 = arith.constant dense<0.000000e+00> : vector<1x8x8xf32>
    %563 = tpu.matmul %562, %549, %cst_239 {dimension_numbers = #tpu.dot_dimension_numbers<[2], [1], [1], [2], [0, 0, 0, 1, 1, 2], [0], [0]>} : vector<1x8x8xbf16>, vector<1x8x8xbf16>, vector<1x8x8xf32> -> vector<1x8x8xf32>
    "tpu.trace_stop"() : () -> ()
    %564 = vector.shape_cast %563 : vector<1x8x8xf32> to vector<8x8xf32>
    %565 = arith.truncf %564 : vector<8x8xf32> to vector<8x8xbf16>
    %c2_240 = arith.constant 2 : index
    %c2_241 = arith.constant 2 : index
    %c0_242 = arith.constant 0 : index
    %c0_243 = arith.constant 0 : index
    %566 = vector.load %arg7[%c2_240, %c2_241, %c0_242, %c0_243] : memref<4x4x8x32xbf16, #tpu.memory_space<vmem>>, vector<1x1x8x32xbf16>
    %567 = vector.shape_cast %566 : vector<1x1x8x32xbf16> to vector<8x32xbf16>
    %cst_244 = arith.constant dense<0.000000e+00> : vector<8x32xf32>
    %568 = tpu.matmul %565, %567, %cst_244 {dimension_numbers = #tpu.dot_dimension_numbers<[1], [0], [0], [1], [0, 0, 1, 1], [], []>} : vector<8x8xbf16>, vector<8x32xbf16>, vector<8x32xf32> -> vector<8x32xf32>
    %569 = arith.addf %546, %568 : vector<8x32xf32>
    %570 = vector.extract_strided_slice %495 {offsets = [0, 0, 24], sizes = [1, 8, 8], strides = [1, 1, 1]} : vector<1x8x96xbf16> to vector<1x8x8xbf16>
    %571 = vector.extract_strided_slice %495 {offsets = [0, 0, 56], sizes = [1, 8, 8], strides = [1, 1, 1]} : vector<1x8x96xbf16> to vector<1x8x8xbf16>
    %572 = vector.extract_strided_slice %495 {offsets = [0, 0, 88], sizes = [1, 8, 8], strides = [1, 1, 1]} : vector<1x8x96xbf16> to vector<1x8x8xbf16>
    "tpu.trace_start"() <{level = 10 : i32, message = "btd,bsd->bts"}> : () -> ()
    %cst_245 = arith.constant dense<0.000000e+00> : vector<1x8x8xf32>
    %573 = tpu.matmul %570, %571, %cst_245 {dimension_numbers = #tpu.dot_dimension_numbers<[2], [2], [1], [1], [0, 0, 0, 1, 1, 1], [0], [0]>} : vector<1x8x8xbf16>, vector<1x8x8xbf16>, vector<1x8x8xf32> -> vector<1x8x8xf32>
    "tpu.trace_stop"() : () -> ()
    %574 = arith.addf %573, %111 : vector<1x8x8xf32>
    %cst_246 = arith.constant dense<0xFF800000> : vector<1x8xf32>
    %575 = vector.multi_reduction <maximumf>, %574, %cst_246 [2] : vector<1x8x8xf32> to vector<1x8xf32>
    %576 = vector.shape_cast %575 : vector<1x8xf32> to vector<1x8x1xf32>
    %577 = vector.broadcast %576 : vector<1x8x1xf32> to vector<1x8x8xf32>
    %578 = arith.subf %574, %577 : vector<1x8x8xf32>
    %579 = math.exp %578 : vector<1x8x8xf32>
    %cst_247 = arith.constant dense<0.000000e+00> : vector<1x8xf32>
    %580 = vector.multi_reduction <add>, %579, %cst_247 [2] : vector<1x8x8xf32> to vector<1x8xf32>
    %581 = vector.shape_cast %580 : vector<1x8xf32> to vector<1x8x1xf32>
    %582 = tpu.reciprocal %581 {approx = true} : vector<1x8x1xf32> -> vector<1x8x1xf32>
    %583 = vector.broadcast %582 : vector<1x8x1xf32> to vector<1x8x8xf32>
    %584 = arith.mulf %579, %583 : vector<1x8x8xf32>
    %585 = arith.truncf %584 : vector<1x8x8xf32> to vector<1x8x8xbf16>
    "tpu.trace_start"() <{level = 10 : i32, message = "bts,bsd->btd"}> : () -> ()
    %cst_248 = arith.constant dense<0.000000e+00> : vector<1x8x8xf32>
    %586 = tpu.matmul %585, %572, %cst_248 {dimension_numbers = #tpu.dot_dimension_numbers<[2], [1], [1], [2], [0, 0, 0, 1, 1, 2], [0], [0]>} : vector<1x8x8xbf16>, vector<1x8x8xbf16>, vector<1x8x8xf32> -> vector<1x8x8xf32>
    "tpu.trace_stop"() : () -> ()
    %587 = vector.shape_cast %586 : vector<1x8x8xf32> to vector<8x8xf32>
    %588 = arith.truncf %587 : vector<8x8xf32> to vector<8x8xbf16>
    %c2_249 = arith.constant 2 : index
    %c3_250 = arith.constant 3 : index
    %c0_251 = arith.constant 0 : index
    %c0_252 = arith.constant 0 : index
    %589 = vector.load %arg7[%c2_249, %c3_250, %c0_251, %c0_252] : memref<4x4x8x32xbf16, #tpu.memory_space<vmem>>, vector<1x1x8x32xbf16>
    %590 = vector.shape_cast %589 : vector<1x1x8x32xbf16> to vector<8x32xbf16>
    %cst_253 = arith.constant dense<0.000000e+00> : vector<8x32xf32>
    %591 = tpu.matmul %588, %590, %cst_253 {dimension_numbers = #tpu.dot_dimension_numbers<[1], [0], [0], [1], [0, 0, 1, 1], [], []>} : vector<8x8xbf16>, vector<8x32xbf16>, vector<8x32xf32> -> vector<8x32xf32>
    %592 = arith.addf %569, %591 : vector<8x32xf32>
    %c2_254 = arith.constant 2 : index
    %c0_255 = arith.constant 0 : index
    %593 = vector.load %arg9[%c2_254, %c0_255] : memref<4x32xf32, #tpu.memory_space<vmem>>, vector<1x32xf32>
    %594 = vector.shape_cast %593 : vector<1x32xf32> to vector<32xf32>
    %c2_256 = arith.constant 2 : index
    %c0_257 = arith.constant 0 : index
    %595 = vector.load %arg10[%c2_256, %c0_257] : memref<4x32xf32, #tpu.memory_space<vmem>>, vector<1x32xf32>
    %596 = vector.shape_cast %595 : vector<1x32xf32> to vector<32xf32>
    %cst_258 = arith.constant dense<0.000000e+00> : vector<8xf32>
    %597 = vector.multi_reduction <add>, %592, %cst_258 [1] : vector<8x32xf32> to vector<8xf32>
    %598 = vector.shape_cast %597 : vector<8xf32> to vector<8x1xf32>
    %cst_259 = arith.constant 3.200000e+01 : f32
    %599 = vector.broadcast %cst_259 : f32 to vector<8x1xf32>
    %600 = arith.divf %598, %599 : vector<8x1xf32>
    %601 = vector.broadcast %600 : vector<8x1xf32> to vector<8x32xf32>
    %602 = arith.subf %592, %601 : vector<8x32xf32>
    %603 = arith.mulf %602, %602 : vector<8x32xf32>
    %cst_260 = arith.constant dense<0.000000e+00> : vector<8xf32>
    %604 = vector.multi_reduction <add>, %603, %cst_260 [1] : vector<8x32xf32> to vector<8xf32>
    %605 = vector.shape_cast %604 : vector<8xf32> to vector<8x1xf32>
    %cst_261 = arith.constant 3.200000e+01 : f32
    %606 = vector.broadcast %cst_261 : f32 to vector<8x1xf32>
    %607 = arith.divf %605, %606 : vector<8x1xf32>
    %cst_262 = arith.constant 9.99999974E-6 : f32
    %608 = vector.broadcast %cst_262 : f32 to vector<8x1xf32>
    %609 = arith.addf %607, %608 : vector<8x1xf32>
    %610 = math.rsqrt %609 : vector<8x1xf32>
    %611 = vector.broadcast %610 : vector<8x1xf32> to vector<8x32xf32>
    %612 = arith.mulf %602, %611 : vector<8x32xf32>
    %613 = vector.shape_cast %594 : vector<32xf32> to vector<1x32xf32>
    %614 = vector.broadcast %613 : vector<1x32xf32> to vector<8x32xf32>
    %615 = arith.mulf %612, %614 : vector<8x32xf32>
    %616 = vector.shape_cast %596 : vector<32xf32> to vector<1x32xf32>
    %617 = vector.broadcast %616 : vector<1x32xf32> to vector<8x32xf32>
    %618 = arith.addf %615, %617 : vector<8x32xf32>
    %619 = arith.truncf %618 : vector<8x32xf32> to vector<8x32xbf16>
    %c2_263 = arith.constant 2 : index
    %c0_264 = arith.constant 0 : index
    %c0_265 = arith.constant 0 : index
    %620 = vector.load %arg11[%c2_263, %c0_264, %c0_265] : memref<4x32x128xbf16, #tpu.memory_space<vmem>>, vector<1x32x128xbf16>
    %621 = vector.shape_cast %620 : vector<1x32x128xbf16> to vector<32x128xbf16>
    %cst_266 = arith.constant dense<0.000000e+00> : vector<8x128xf32>
    %622 = tpu.matmul %619, %621, %cst_266 {dimension_numbers = #tpu.dot_dimension_numbers<[1], [0], [0], [1], [0, 0, 1, 1], [], []>} : vector<8x32xbf16>, vector<32x128xbf16>, vector<8x128xf32> -> vector<8x128xf32>
    %c2_267 = arith.constant 2 : index
    %c0_268 = arith.constant 0 : index
    %623 = vector.load %arg12[%c2_267, %c0_268] : memref<4x128xf32, #tpu.memory_space<vmem>>, vector<1x128xf32>
    %624 = vector.shape_cast %623 : vector<1x128xf32> to vector<128xf32>
    %625 = vector.shape_cast %624 : vector<128xf32> to vector<1x128xf32>
    %626 = vector.broadcast %625 : vector<1x128xf32> to vector<8x128xf32>
    %627 = arith.addf %622, %626 : vector<8x128xf32>
    %cst_269 = arith.constant 0.000000e+00 : f32
    %628 = vector.broadcast %cst_269 : f32 to vector<8x128xf32>
    %629 = arith.maximumf %627, %628 : vector<8x128xf32>
    %630 = arith.truncf %629 : vector<8x128xf32> to vector<8x128xbf16>
    %c2_270 = arith.constant 2 : index
    %c0_271 = arith.constant 0 : index
    %c0_272 = arith.constant 0 : index
    %631 = vector.load %arg13[%c2_270, %c0_271, %c0_272] : memref<4x128x32xbf16, #tpu.memory_space<vmem>>, vector<1x128x32xbf16>
    %632 = vector.shape_cast %631 : vector<1x128x32xbf16> to vector<128x32xbf16>
    %cst_273 = arith.constant dense<0.000000e+00> : vector<8x32xf32>
    %633 = tpu.matmul %630, %632, %cst_273 {dimension_numbers = #tpu.dot_dimension_numbers<[1], [0], [0], [1], [0, 0, 1, 1], [], []>} : vector<8x128xbf16>, vector<128x32xbf16>, vector<8x32xf32> -> vector<8x32xf32>
    %c2_274 = arith.constant 2 : index
    %c0_275 = arith.constant 0 : index
    %634 = vector.load %arg14[%c2_274, %c0_275] : memref<4x32xf32, #tpu.memory_space<vmem>>, vector<1x32xf32>
    %635 = vector.shape_cast %634 : vector<1x32xf32> to vector<32xf32>
    %636 = vector.shape_cast %635 : vector<32xf32> to vector<1x32xf32>
    %637 = vector.broadcast %636 : vector<1x32xf32> to vector<8x32xf32>
    %638 = arith.addf %633, %637 : vector<8x32xf32>
    %639 = arith.addf %592, %638 : vector<8x32xf32>
    %c3_276 = arith.constant 3 : index
    %c0_277 = arith.constant 0 : index
    %640 = vector.load %arg4[%c3_276, %c0_277] : memref<4x32xf32, #tpu.memory_space<vmem>>, vector<1x32xf32>
    %641 = vector.shape_cast %640 : vector<1x32xf32> to vector<32xf32>
    %c3_278 = arith.constant 3 : index
    %c0_279 = arith.constant 0 : index
    %642 = vector.load %arg5[%c3_278, %c0_279] : memref<4x32xf32, #tpu.memory_space<vmem>>, vector<1x32xf32>
    %643 = vector.shape_cast %642 : vector<1x32xf32> to vector<32xf32>
    %cst_280 = arith.constant dense<0.000000e+00> : vector<8xf32>
    %644 = vector.multi_reduction <add>, %639, %cst_280 [1] : vector<8x32xf32> to vector<8xf32>
    %645 = vector.shape_cast %644 : vector<8xf32> to vector<8x1xf32>
    %cst_281 = arith.constant 3.200000e+01 : f32
    %646 = vector.broadcast %cst_281 : f32 to vector<8x1xf32>
    %647 = arith.divf %645, %646 : vector<8x1xf32>
    %648 = vector.broadcast %647 : vector<8x1xf32> to vector<8x32xf32>
    %649 = arith.subf %639, %648 : vector<8x32xf32>
    %650 = arith.mulf %649, %649 : vector<8x32xf32>
    %cst_282 = arith.constant dense<0.000000e+00> : vector<8xf32>
    %651 = vector.multi_reduction <add>, %650, %cst_282 [1] : vector<8x32xf32> to vector<8xf32>
    %652 = vector.shape_cast %651 : vector<8xf32> to vector<8x1xf32>
    %cst_283 = arith.constant 3.200000e+01 : f32
    %653 = vector.broadcast %cst_283 : f32 to vector<8x1xf32>
    %654 = arith.divf %652, %653 : vector<8x1xf32>
    %cst_284 = arith.constant 9.99999974E-6 : f32
    %655 = vector.broadcast %cst_284 : f32 to vector<8x1xf32>
    %656 = arith.addf %654, %655 : vector<8x1xf32>
    %657 = math.rsqrt %656 : vector<8x1xf32>
    %658 = vector.broadcast %657 : vector<8x1xf32> to vector<8x32xf32>
    %659 = arith.mulf %649, %658 : vector<8x32xf32>
    %660 = vector.shape_cast %641 : vector<32xf32> to vector<1x32xf32>
    %661 = vector.broadcast %660 : vector<1x32xf32> to vector<8x32xf32>
    %662 = arith.mulf %659, %661 : vector<8x32xf32>
    %663 = vector.shape_cast %643 : vector<32xf32> to vector<1x32xf32>
    %664 = vector.broadcast %663 : vector<1x32xf32> to vector<8x32xf32>
    %665 = arith.addf %662, %664 : vector<8x32xf32>
    %666 = arith.truncf %665 : vector<8x32xf32> to vector<8x32xbf16>
    %c3_285 = arith.constant 3 : index
    %c0_286 = arith.constant 0 : index
    %c0_287 = arith.constant 0 : index
    %667 = vector.load %arg6[%c3_285, %c0_286, %c0_287] : memref<4x32x96xbf16, #tpu.memory_space<vmem>>, vector<1x32x96xbf16>
    %668 = vector.shape_cast %667 : vector<1x32x96xbf16> to vector<32x96xbf16>
    %cst_288 = arith.constant dense<0.000000e+00> : vector<8x96xf32>
    %669 = tpu.matmul %666, %668, %cst_288 {dimension_numbers = #tpu.dot_dimension_numbers<[1], [0], [0], [1], [0, 0, 1, 1], [], []>} : vector<8x32xbf16>, vector<32x96xbf16>, vector<8x96xf32> -> vector<8x96xf32>
    %670 = arith.truncf %669 : vector<8x96xf32> to vector<8x96xbf16>
    %671 = vector.shape_cast %670 : vector<8x96xbf16> to vector<1x8x96xbf16>
    %c3_289 = arith.constant 3 : index
    %c0_290 = arith.constant 0 : index
    %672 = vector.load %arg8[%c3_289, %c0_290] : memref<4x32xf32, #tpu.memory_space<vmem>>, vector<1x32xf32>
    %673 = vector.shape_cast %672 : vector<1x32xf32> to vector<32xf32>
    %674 = vector.shape_cast %673 : vector<32xf32> to vector<1x32xf32>
    %675 = vector.broadcast %674 : vector<1x32xf32> to vector<8x32xf32>
    %676 = arith.addf %639, %675 : vector<8x32xf32>
    %677 = vector.extract_strided_slice %671 {offsets = [0, 0, 0], sizes = [1, 8, 8], strides = [1, 1, 1]} : vector<1x8x96xbf16> to vector<1x8x8xbf16>
    %678 = vector.extract_strided_slice %671 {offsets = [0, 0, 32], sizes = [1, 8, 8], strides = [1, 1, 1]} : vector<1x8x96xbf16> to vector<1x8x8xbf16>
    %679 = vector.extract_strided_slice %671 {offsets = [0, 0, 64], sizes = [1, 8, 8], strides = [1, 1, 1]} : vector<1x8x96xbf16> to vector<1x8x8xbf16>
    "tpu.trace_start"() <{level = 10 : i32, message = "btd,bsd->bts"}> : () -> ()
    %cst_291 = arith.constant dense<0.000000e+00> : vector<1x8x8xf32>
    %680 = tpu.matmul %677, %678, %cst_291 {dimension_numbers = #tpu.dot_dimension_numbers<[2], [2], [1], [1], [0, 0, 0, 1, 1, 1], [0], [0]>} : vector<1x8x8xbf16>, vector<1x8x8xbf16>, vector<1x8x8xf32> -> vector<1x8x8xf32>
    "tpu.trace_stop"() : () -> ()
    %681 = arith.addf %680, %111 : vector<1x8x8xf32>
    %cst_292 = arith.constant dense<0xFF800000> : vector<1x8xf32>
    %682 = vector.multi_reduction <maximumf>, %681, %cst_292 [2] : vector<1x8x8xf32> to vector<1x8xf32>
    %683 = vector.shape_cast %682 : vector<1x8xf32> to vector<1x8x1xf32>
    %684 = vector.broadcast %683 : vector<1x8x1xf32> to vector<1x8x8xf32>
    %685 = arith.subf %681, %684 : vector<1x8x8xf32>
    %686 = math.exp %685 : vector<1x8x8xf32>
    %cst_293 = arith.constant dense<0.000000e+00> : vector<1x8xf32>
    %687 = vector.multi_reduction <add>, %686, %cst_293 [2] : vector<1x8x8xf32> to vector<1x8xf32>
    %688 = vector.shape_cast %687 : vector<1x8xf32> to vector<1x8x1xf32>
    %689 = tpu.reciprocal %688 {approx = true} : vector<1x8x1xf32> -> vector<1x8x1xf32>
    %690 = vector.broadcast %689 : vector<1x8x1xf32> to vector<1x8x8xf32>
    %691 = arith.mulf %686, %690 : vector<1x8x8xf32>
    %692 = arith.truncf %691 : vector<1x8x8xf32> to vector<1x8x8xbf16>
    "tpu.trace_start"() <{level = 10 : i32, message = "bts,bsd->btd"}> : () -> ()
    %cst_294 = arith.constant dense<0.000000e+00> : vector<1x8x8xf32>
    %693 = tpu.matmul %692, %679, %cst_294 {dimension_numbers = #tpu.dot_dimension_numbers<[2], [1], [1], [2], [0, 0, 0, 1, 1, 2], [0], [0]>} : vector<1x8x8xbf16>, vector<1x8x8xbf16>, vector<1x8x8xf32> -> vector<1x8x8xf32>
    "tpu.trace_stop"() : () -> ()
    %694 = vector.shape_cast %693 : vector<1x8x8xf32> to vector<8x8xf32>
    %695 = arith.truncf %694 : vector<8x8xf32> to vector<8x8xbf16>
    %c3_295 = arith.constant 3 : index
    %c0_296 = arith.constant 0 : index
    %c0_297 = arith.constant 0 : index
    %c0_298 = arith.constant 0 : index
    %696 = vector.load %arg7[%c3_295, %c0_296, %c0_297, %c0_298] : memref<4x4x8x32xbf16, #tpu.memory_space<vmem>>, vector<1x1x8x32xbf16>
    %697 = vector.shape_cast %696 : vector<1x1x8x32xbf16> to vector<8x32xbf16>
    %cst_299 = arith.constant dense<0.000000e+00> : vector<8x32xf32>
    %698 = tpu.matmul %695, %697, %cst_299 {dimension_numbers = #tpu.dot_dimension_numbers<[1], [0], [0], [1], [0, 0, 1, 1], [], []>} : vector<8x8xbf16>, vector<8x32xbf16>, vector<8x32xf32> -> vector<8x32xf32>
    %699 = arith.addf %676, %698 : vector<8x32xf32>
    %700 = vector.extract_strided_slice %671 {offsets = [0, 0, 8], sizes = [1, 8, 8], strides = [1, 1, 1]} : vector<1x8x96xbf16> to vector<1x8x8xbf16>
    %701 = vector.extract_strided_slice %671 {offsets = [0, 0, 40], sizes = [1, 8, 8], strides = [1, 1, 1]} : vector<1x8x96xbf16> to vector<1x8x8xbf16>
    %702 = vector.extract_strided_slice %671 {offsets = [0, 0, 72], sizes = [1, 8, 8], strides = [1, 1, 1]} : vector<1x8x96xbf16> to vector<1x8x8xbf16>
    "tpu.trace_start"() <{level = 10 : i32, message = "btd,bsd->bts"}> : () -> ()
    %cst_300 = arith.constant dense<0.000000e+00> : vector<1x8x8xf32>
    %703 = tpu.matmul %700, %701, %cst_300 {dimension_numbers = #tpu.dot_dimension_numbers<[2], [2], [1], [1], [0, 0, 0, 1, 1, 1], [0], [0]>} : vector<1x8x8xbf16>, vector<1x8x8xbf16>, vector<1x8x8xf32> -> vector<1x8x8xf32>
    "tpu.trace_stop"() : () -> ()
    %704 = arith.addf %703, %111 : vector<1x8x8xf32>
    %cst_301 = arith.constant dense<0xFF800000> : vector<1x8xf32>
    %705 = vector.multi_reduction <maximumf>, %704, %cst_301 [2] : vector<1x8x8xf32> to vector<1x8xf32>
    %706 = vector.shape_cast %705 : vector<1x8xf32> to vector<1x8x1xf32>
    %707 = vector.broadcast %706 : vector<1x8x1xf32> to vector<1x8x8xf32>
    %708 = arith.subf %704, %707 : vector<1x8x8xf32>
    %709 = math.exp %708 : vector<1x8x8xf32>
    %cst_302 = arith.constant dense<0.000000e+00> : vector<1x8xf32>
    %710 = vector.multi_reduction <add>, %709, %cst_302 [2] : vector<1x8x8xf32> to vector<1x8xf32>
    %711 = vector.shape_cast %710 : vector<1x8xf32> to vector<1x8x1xf32>
    %712 = tpu.reciprocal %711 {approx = true} : vector<1x8x1xf32> -> vector<1x8x1xf32>
    %713 = vector.broadcast %712 : vector<1x8x1xf32> to vector<1x8x8xf32>
    %714 = arith.mulf %709, %713 : vector<1x8x8xf32>
    %715 = arith.truncf %714 : vector<1x8x8xf32> to vector<1x8x8xbf16>
    "tpu.trace_start"() <{level = 10 : i32, message = "bts,bsd->btd"}> : () -> ()
    %cst_303 = arith.constant dense<0.000000e+00> : vector<1x8x8xf32>
    %716 = tpu.matmul %715, %702, %cst_303 {dimension_numbers = #tpu.dot_dimension_numbers<[2], [1], [1], [2], [0, 0, 0, 1, 1, 2], [0], [0]>} : vector<1x8x8xbf16>, vector<1x8x8xbf16>, vector<1x8x8xf32> -> vector<1x8x8xf32>
    "tpu.trace_stop"() : () -> ()
    %717 = vector.shape_cast %716 : vector<1x8x8xf32> to vector<8x8xf32>
    %718 = arith.truncf %717 : vector<8x8xf32> to vector<8x8xbf16>
    %c3_304 = arith.constant 3 : index
    %c1_305 = arith.constant 1 : index
    %c0_306 = arith.constant 0 : index
    %c0_307 = arith.constant 0 : index
    %719 = vector.load %arg7[%c3_304, %c1_305, %c0_306, %c0_307] : memref<4x4x8x32xbf16, #tpu.memory_space<vmem>>, vector<1x1x8x32xbf16>
    %720 = vector.shape_cast %719 : vector<1x1x8x32xbf16> to vector<8x32xbf16>
    %cst_308 = arith.constant dense<0.000000e+00> : vector<8x32xf32>
    %721 = tpu.matmul %718, %720, %cst_308 {dimension_numbers = #tpu.dot_dimension_numbers<[1], [0], [0], [1], [0, 0, 1, 1], [], []>} : vector<8x8xbf16>, vector<8x32xbf16>, vector<8x32xf32> -> vector<8x32xf32>
    %722 = arith.addf %699, %721 : vector<8x32xf32>
    %723 = vector.extract_strided_slice %671 {offsets = [0, 0, 16], sizes = [1, 8, 8], strides = [1, 1, 1]} : vector<1x8x96xbf16> to vector<1x8x8xbf16>
    %724 = vector.extract_strided_slice %671 {offsets = [0, 0, 48], sizes = [1, 8, 8], strides = [1, 1, 1]} : vector<1x8x96xbf16> to vector<1x8x8xbf16>
    %725 = vector.extract_strided_slice %671 {offsets = [0, 0, 80], sizes = [1, 8, 8], strides = [1, 1, 1]} : vector<1x8x96xbf16> to vector<1x8x8xbf16>
    "tpu.trace_start"() <{level = 10 : i32, message = "btd,bsd->bts"}> : () -> ()
    %cst_309 = arith.constant dense<0.000000e+00> : vector<1x8x8xf32>
    %726 = tpu.matmul %723, %724, %cst_309 {dimension_numbers = #tpu.dot_dimension_numbers<[2], [2], [1], [1], [0, 0, 0, 1, 1, 1], [0], [0]>} : vector<1x8x8xbf16>, vector<1x8x8xbf16>, vector<1x8x8xf32> -> vector<1x8x8xf32>
    "tpu.trace_stop"() : () -> ()
    %727 = arith.addf %726, %111 : vector<1x8x8xf32>
    %cst_310 = arith.constant dense<0xFF800000> : vector<1x8xf32>
    %728 = vector.multi_reduction <maximumf>, %727, %cst_310 [2] : vector<1x8x8xf32> to vector<1x8xf32>
    %729 = vector.shape_cast %728 : vector<1x8xf32> to vector<1x8x1xf32>
    %730 = vector.broadcast %729 : vector<1x8x1xf32> to vector<1x8x8xf32>
    %731 = arith.subf %727, %730 : vector<1x8x8xf32>
    %732 = math.exp %731 : vector<1x8x8xf32>
    %cst_311 = arith.constant dense<0.000000e+00> : vector<1x8xf32>
    %733 = vector.multi_reduction <add>, %732, %cst_311 [2] : vector<1x8x8xf32> to vector<1x8xf32>
    %734 = vector.shape_cast %733 : vector<1x8xf32> to vector<1x8x1xf32>
    %735 = tpu.reciprocal %734 {approx = true} : vector<1x8x1xf32> -> vector<1x8x1xf32>
    %736 = vector.broadcast %735 : vector<1x8x1xf32> to vector<1x8x8xf32>
    %737 = arith.mulf %732, %736 : vector<1x8x8xf32>
    %738 = arith.truncf %737 : vector<1x8x8xf32> to vector<1x8x8xbf16>
    "tpu.trace_start"() <{level = 10 : i32, message = "bts,bsd->btd"}> : () -> ()
    %cst_312 = arith.constant dense<0.000000e+00> : vector<1x8x8xf32>
    %739 = tpu.matmul %738, %725, %cst_312 {dimension_numbers = #tpu.dot_dimension_numbers<[2], [1], [1], [2], [0, 0, 0, 1, 1, 2], [0], [0]>} : vector<1x8x8xbf16>, vector<1x8x8xbf16>, vector<1x8x8xf32> -> vector<1x8x8xf32>
    "tpu.trace_stop"() : () -> ()
    %740 = vector.shape_cast %739 : vector<1x8x8xf32> to vector<8x8xf32>
    %741 = arith.truncf %740 : vector<8x8xf32> to vector<8x8xbf16>
    %c3_313 = arith.constant 3 : index
    %c2_314 = arith.constant 2 : index
    %c0_315 = arith.constant 0 : index
    %c0_316 = arith.constant 0 : index
    %742 = vector.load %arg7[%c3_313, %c2_314, %c0_315, %c0_316] : memref<4x4x8x32xbf16, #tpu.memory_space<vmem>>, vector<1x1x8x32xbf16>
    %743 = vector.shape_cast %742 : vector<1x1x8x32xbf16> to vector<8x32xbf16>
    %cst_317 = arith.constant dense<0.000000e+00> : vector<8x32xf32>
    %744 = tpu.matmul %741, %743, %cst_317 {dimension_numbers = #tpu.dot_dimension_numbers<[1], [0], [0], [1], [0, 0, 1, 1], [], []>} : vector<8x8xbf16>, vector<8x32xbf16>, vector<8x32xf32> -> vector<8x32xf32>
    %745 = arith.addf %722, %744 : vector<8x32xf32>
    %746 = vector.extract_strided_slice %671 {offsets = [0, 0, 24], sizes = [1, 8, 8], strides = [1, 1, 1]} : vector<1x8x96xbf16> to vector<1x8x8xbf16>
    %747 = vector.extract_strided_slice %671 {offsets = [0, 0, 56], sizes = [1, 8, 8], strides = [1, 1, 1]} : vector<1x8x96xbf16> to vector<1x8x8xbf16>
    %748 = vector.extract_strided_slice %671 {offsets = [0, 0, 88], sizes = [1, 8, 8], strides = [1, 1, 1]} : vector<1x8x96xbf16> to vector<1x8x8xbf16>
    "tpu.trace_start"() <{level = 10 : i32, message = "btd,bsd->bts"}> : () -> ()
    %cst_318 = arith.constant dense<0.000000e+00> : vector<1x8x8xf32>
    %749 = tpu.matmul %746, %747, %cst_318 {dimension_numbers = #tpu.dot_dimension_numbers<[2], [2], [1], [1], [0, 0, 0, 1, 1, 1], [0], [0]>} : vector<1x8x8xbf16>, vector<1x8x8xbf16>, vector<1x8x8xf32> -> vector<1x8x8xf32>
    "tpu.trace_stop"() : () -> ()
    %750 = arith.addf %749, %111 : vector<1x8x8xf32>
    %cst_319 = arith.constant dense<0xFF800000> : vector<1x8xf32>
    %751 = vector.multi_reduction <maximumf>, %750, %cst_319 [2] : vector<1x8x8xf32> to vector<1x8xf32>
    %752 = vector.shape_cast %751 : vector<1x8xf32> to vector<1x8x1xf32>
    %753 = vector.broadcast %752 : vector<1x8x1xf32> to vector<1x8x8xf32>
    %754 = arith.subf %750, %753 : vector<1x8x8xf32>
    %755 = math.exp %754 : vector<1x8x8xf32>
    %cst_320 = arith.constant dense<0.000000e+00> : vector<1x8xf32>
    %756 = vector.multi_reduction <add>, %755, %cst_320 [2] : vector<1x8x8xf32> to vector<1x8xf32>
    %757 = vector.shape_cast %756 : vector<1x8xf32> to vector<1x8x1xf32>
    %758 = tpu.reciprocal %757 {approx = true} : vector<1x8x1xf32> -> vector<1x8x1xf32>
    %759 = vector.broadcast %758 : vector<1x8x1xf32> to vector<1x8x8xf32>
    %760 = arith.mulf %755, %759 : vector<1x8x8xf32>
    %761 = arith.truncf %760 : vector<1x8x8xf32> to vector<1x8x8xbf16>
    "tpu.trace_start"() <{level = 10 : i32, message = "bts,bsd->btd"}> : () -> ()
    %cst_321 = arith.constant dense<0.000000e+00> : vector<1x8x8xf32>
    %762 = tpu.matmul %761, %748, %cst_321 {dimension_numbers = #tpu.dot_dimension_numbers<[2], [1], [1], [2], [0, 0, 0, 1, 1, 2], [0], [0]>} : vector<1x8x8xbf16>, vector<1x8x8xbf16>, vector<1x8x8xf32> -> vector<1x8x8xf32>
    "tpu.trace_stop"() : () -> ()
    %763 = vector.shape_cast %762 : vector<1x8x8xf32> to vector<8x8xf32>
    %764 = arith.truncf %763 : vector<8x8xf32> to vector<8x8xbf16>
    %c3_322 = arith.constant 3 : index
    %c3_323 = arith.constant 3 : index
    %c0_324 = arith.constant 0 : index
    %c0_325 = arith.constant 0 : index
    %765 = vector.load %arg7[%c3_322, %c3_323, %c0_324, %c0_325] : memref<4x4x8x32xbf16, #tpu.memory_space<vmem>>, vector<1x1x8x32xbf16>
    %766 = vector.shape_cast %765 : vector<1x1x8x32xbf16> to vector<8x32xbf16>
    %cst_326 = arith.constant dense<0.000000e+00> : vector<8x32xf32>
    %767 = tpu.matmul %764, %766, %cst_326 {dimension_numbers = #tpu.dot_dimension_numbers<[1], [0], [0], [1], [0, 0, 1, 1], [], []>} : vector<8x8xbf16>, vector<8x32xbf16>, vector<8x32xf32> -> vector<8x32xf32>
    %768 = arith.addf %745, %767 : vector<8x32xf32>
    %c3_327 = arith.constant 3 : index
    %c0_328 = arith.constant 0 : index
    %769 = vector.load %arg9[%c3_327, %c0_328] : memref<4x32xf32, #tpu.memory_space<vmem>>, vector<1x32xf32>
    %770 = vector.shape_cast %769 : vector<1x32xf32> to vector<32xf32>
    %c3_329 = arith.constant 3 : index
    %c0_330 = arith.constant 0 : index
    %771 = vector.load %arg10[%c3_329, %c0_330] : memref<4x32xf32, #tpu.memory_space<vmem>>, vector<1x32xf32>
    %772 = vector.shape_cast %771 : vector<1x32xf32> to vector<32xf32>
    %cst_331 = arith.constant dense<0.000000e+00> : vector<8xf32>
    %773 = vector.multi_reduction <add>, %768, %cst_331 [1] : vector<8x32xf32> to vector<8xf32>
    %774 = vector.shape_cast %773 : vector<8xf32> to vector<8x1xf32>
    %cst_332 = arith.constant 3.200000e+01 : f32
    %775 = vector.broadcast %cst_332 : f32 to vector<8x1xf32>
    %776 = arith.divf %774, %775 : vector<8x1xf32>
    %777 = vector.broadcast %776 : vector<8x1xf32> to vector<8x32xf32>
    %778 = arith.subf %768, %777 : vector<8x32xf32>
    %779 = arith.mulf %778, %778 : vector<8x32xf32>
    %cst_333 = arith.constant dense<0.000000e+00> : vector<8xf32>
    %780 = vector.multi_reduction <add>, %779, %cst_333 [1] : vector<8x32xf32> to vector<8xf32>
    %781 = vector.shape_cast %780 : vector<8xf32> to vector<8x1xf32>
    %cst_334 = arith.constant 3.200000e+01 : f32
    %782 = vector.broadcast %cst_334 : f32 to vector<8x1xf32>
    %783 = arith.divf %781, %782 : vector<8x1xf32>
    %cst_335 = arith.constant 9.99999974E-6 : f32
    %784 = vector.broadcast %cst_335 : f32 to vector<8x1xf32>
    %785 = arith.addf %783, %784 : vector<8x1xf32>
    %786 = math.rsqrt %785 : vector<8x1xf32>
    %787 = vector.broadcast %786 : vector<8x1xf32> to vector<8x32xf32>
    %788 = arith.mulf %778, %787 : vector<8x32xf32>
    %789 = vector.shape_cast %770 : vector<32xf32> to vector<1x32xf32>
    %790 = vector.broadcast %789 : vector<1x32xf32> to vector<8x32xf32>
    %791 = arith.mulf %788, %790 : vector<8x32xf32>
    %792 = vector.shape_cast %772 : vector<32xf32> to vector<1x32xf32>
    %793 = vector.broadcast %792 : vector<1x32xf32> to vector<8x32xf32>
    %794 = arith.addf %791, %793 : vector<8x32xf32>
    %795 = arith.truncf %794 : vector<8x32xf32> to vector<8x32xbf16>
    %c3_336 = arith.constant 3 : index
    %c0_337 = arith.constant 0 : index
    %c0_338 = arith.constant 0 : index
    %796 = vector.load %arg11[%c3_336, %c0_337, %c0_338] : memref<4x32x128xbf16, #tpu.memory_space<vmem>>, vector<1x32x128xbf16>
    %797 = vector.shape_cast %796 : vector<1x32x128xbf16> to vector<32x128xbf16>
    %cst_339 = arith.constant dense<0.000000e+00> : vector<8x128xf32>
    %798 = tpu.matmul %795, %797, %cst_339 {dimension_numbers = #tpu.dot_dimension_numbers<[1], [0], [0], [1], [0, 0, 1, 1], [], []>} : vector<8x32xbf16>, vector<32x128xbf16>, vector<8x128xf32> -> vector<8x128xf32>
    %c3_340 = arith.constant 3 : index
    %c0_341 = arith.constant 0 : index
    %799 = vector.load %arg12[%c3_340, %c0_341] : memref<4x128xf32, #tpu.memory_space<vmem>>, vector<1x128xf32>
    %800 = vector.shape_cast %799 : vector<1x128xf32> to vector<128xf32>
    %801 = vector.shape_cast %800 : vector<128xf32> to vector<1x128xf32>
    %802 = vector.broadcast %801 : vector<1x128xf32> to vector<8x128xf32>
    %803 = arith.addf %798, %802 : vector<8x128xf32>
    %cst_342 = arith.constant 0.000000e+00 : f32
    %804 = vector.broadcast %cst_342 : f32 to vector<8x128xf32>
    %805 = arith.maximumf %803, %804 : vector<8x128xf32>
    %806 = arith.truncf %805 : vector<8x128xf32> to vector<8x128xbf16>
    %c3_343 = arith.constant 3 : index
    %c0_344 = arith.constant 0 : index
    %c0_345 = arith.constant 0 : index
    %807 = vector.load %arg13[%c3_343, %c0_344, %c0_345] : memref<4x128x32xbf16, #tpu.memory_space<vmem>>, vector<1x128x32xbf16>
    %808 = vector.shape_cast %807 : vector<1x128x32xbf16> to vector<128x32xbf16>
    %cst_346 = arith.constant dense<0.000000e+00> : vector<8x32xf32>
    %809 = tpu.matmul %806, %808, %cst_346 {dimension_numbers = #tpu.dot_dimension_numbers<[1], [0], [0], [1], [0, 0, 1, 1], [], []>} : vector<8x128xbf16>, vector<128x32xbf16>, vector<8x32xf32> -> vector<8x32xf32>
    %c3_347 = arith.constant 3 : index
    %c0_348 = arith.constant 0 : index
    %810 = vector.load %arg14[%c3_347, %c0_348] : memref<4x32xf32, #tpu.memory_space<vmem>>, vector<1x32xf32>
    %811 = vector.shape_cast %810 : vector<1x32xf32> to vector<32xf32>
    %812 = vector.shape_cast %811 : vector<32xf32> to vector<1x32xf32>
    %813 = vector.broadcast %812 : vector<1x32xf32> to vector<8x32xf32>
    %814 = arith.addf %809, %813 : vector<8x32xf32>
    %815 = arith.addf %768, %814 : vector<8x32xf32>
    %816 = arith.truncf %815 : vector<8x32xf32> to vector<8x32xbf16>
    %c0_349 = arith.constant 0 : index
    %c0_350 = arith.constant 0 : index
    %817 = vector.load %arg15[%c0_349, %c0_350] : memref<32x128xbf16, #tpu.memory_space<vmem>>, vector<32x128xbf16>
    %cst_351 = arith.constant dense<0.000000e+00> : vector<8x128xf32>
    %818 = tpu.matmul %816, %817, %cst_351 {dimension_numbers = #tpu.dot_dimension_numbers<[1], [0], [0], [1], [0, 0, 1, 1], [], []>} : vector<8x32xbf16>, vector<32x128xbf16>, vector<8x128xf32> -> vector<8x128xf32>
    %c0_352 = arith.constant 0 : index
    %c0_353 = arith.constant 0 : index
    %819 = vector.load %arg16[%c0_352, %c0_353] : memref<1x128xf32, #tpu.memory_space<vmem>>, vector<1x128xf32>
    %820 = vector.broadcast %819 : vector<1x128xf32> to vector<8x128xf32>
    %821 = arith.addf %818, %820 : vector<8x128xf32>
    %822 = vector.shape_cast %821 : vector<8x128xf32> to vector<1x8x128xf32>
    %c0_354 = arith.constant 0 : index
    %c0_355 = arith.constant 0 : index
    %c0_356 = arith.constant 0 : index
    %823 = vector.load %arg17[%c0_354, %c0_355, %c0_356] : memref<1x8x128xf32, #tpu.memory_space<vmem>>, vector<1x8x128xf32>
    tpu.vector_store %arg17[%c0_354, %c0_355, %c0_356], %822 {strides = array<i32>} : memref<1x8x128xf32, #tpu.memory_space<vmem>>, vector<1x8x128xf32>,
    return
  }
  func.func @transform_0(%arg0: i32, %arg1: memref<2x8xi32, #tpu.memory_space<smem>>) -> (i32, i32) {
    %c0_i32 = arith.constant 0 : i32
    %c0_i32_0 = arith.constant 0 : i32
    %c0_i32_1 = arith.constant 0 : i32
    return %c0_i32, %c0_i32_0 : i32, i32
  }
  func.func @transform_1(%arg0: i32, %arg1: memref<2x8xi32, #tpu.memory_space<smem>>) -> (i32, i32) {
    %c0_i32 = arith.constant 0 : i32
    %c0_i32_0 = arith.constant 0 : i32
    %c0_i32_1 = arith.constant 0 : i32
    return %c0_i32, %c0_i32_0 : i32, i32
  }
  func.func @transform_2(%arg0: i32, %arg1: memref<2x8xi32, #tpu.memory_space<smem>>) -> (i32, i32) {
    %c0_i32 = arith.constant 0 : i32
    %c0_i32_0 = arith.constant 0 : i32
    %c0_i32_1 = arith.constant 0 : i32
    return %c0_i32, %c0_i32_0 : i32, i32
  }
  func.func @transform_3(%arg0: i32, %arg1: memref<2x8xi32, #tpu.memory_space<smem>>) -> (i32, i32) {
    %c0_i32 = arith.constant 0 : i32
    %c0_i32_0 = arith.constant 0 : i32
    %c0_i32_1 = arith.constant 0 : i32
    return %c0_i32, %c0_i32_0 : i32, i32
  }
  func.func @transform_4(%arg0: i32, %arg1: memref<2x8xi32, #tpu.memory_space<smem>>) -> (i32, i32, i32) {
    %c0_i32 = arith.constant 0 : i32
    %c0_i32_0 = arith.constant 0 : i32
    %c0_i32_1 = arith.constant 0 : i32
    %c0_i32_2 = arith.constant 0 : i32
    return %c0_i32, %c0_i32_0, %c0_i32_1 : i32, i32, i32
  }
  func.func @transform_5(%arg0: i32, %arg1: memref<2x8xi32, #tpu.memory_space<smem>>) -> (i32, i32, i32, i32) {
    %c0_i32 = arith.constant 0 : i32
    %c0_i32_0 = arith.constant 0 : i32
    %c0_i32_1 = arith.constant 0 : i32
    %c0_i32_2 = arith.constant 0 : i32
    %c0_i32_3 = arith.constant 0 : i32
    return %c0_i32, %c0_i32_0, %c0_i32_1, %c0_i32_2 : i32, i32, i32, i32
  }
  func.func @transform_6(%arg0: i32, %arg1: memref<2x8xi32, #tpu.memory_space<smem>>) -> (i32, i32) {
    %c0_i32 = arith.constant 0 : i32
    %c0_i32_0 = arith.constant 0 : i32
    %c0_i32_1 = arith.constant 0 : i32
    return %c0_i32, %c0_i32_0 : i32, i32
  }
  func.func @transform_7(%arg0: i32, %arg1: memref<2x8xi32, #tpu.memory_space<smem>>) -> (i32, i32) {
    %c0_i32 = arith.constant 0 : i32
    %c0_i32_0 = arith.constant 0 : i32
    %c0_i32_1 = arith.constant 0 : i32
    return %c0_i32, %c0_i32_0 : i32, i32
  }
  func.func @transform_8(%arg0: i32, %arg1: memref<2x8xi32, #tpu.memory_space<smem>>) -> (i32, i32) {
    %c0_i32 = arith.constant 0 : i32
    %c0_i32_0 = arith.constant 0 : i32
    %c0_i32_1 = arith.constant 0 : i32
    return %c0_i32, %c0_i32_0 : i32, i32
  }
  func.func @transform_9(%arg0: i32, %arg1: memref<2x8xi32, #tpu.memory_space<smem>>) -> (i32, i32, i32) {
    %c0_i32 = arith.constant 0 : i32
    %c0_i32_0 = arith.constant 0 : i32
    %c0_i32_1 = arith.constant 0 : i32
    %c0_i32_2 = arith.constant 0 : i32
    return %c0_i32, %c0_i32_0, %c0_i32_1 : i32, i32, i32
  }
  func.func @transform_10(%arg0: i32, %arg1: memref<2x8xi32, #tpu.memory_space<smem>>) -> (i32, i32) {
    %c0_i32 = arith.constant 0 : i32
    %c0_i32_0 = arith.constant 0 : i32
    %c0_i32_1 = arith.constant 0 : i32
    return %c0_i32, %c0_i32_0 : i32, i32
  }
  func.func @transform_11(%arg0: i32, %arg1: memref<2x8xi32, #tpu.memory_space<smem>>) -> (i32, i32, i32) {
    %c0_i32 = arith.constant 0 : i32
    %c0_i32_0 = arith.constant 0 : i32
    %c0_i32_1 = arith.constant 0 : i32
    %c0_i32_2 = arith.constant 0 : i32
    return %c0_i32, %c0_i32_0, %c0_i32_1 : i32, i32, i32
  }
  func.func @transform_12(%arg0: i32, %arg1: memref<2x8xi32, #tpu.memory_space<smem>>) -> (i32, i32) {
    %c0_i32 = arith.constant 0 : i32
    %c0_i32_0 = arith.constant 0 : i32
    %c0_i32_1 = arith.constant 0 : i32
    return %c0_i32, %c0_i32_0 : i32, i32
  }
  func.func @transform_13(%arg0: i32, %arg1: memref<2x8xi32, #tpu.memory_space<smem>>) -> (i32, i32) {
    %c0_i32 = arith.constant 0 : i32
    %c0_i32_0 = arith.constant 0 : i32
    %c0_i32_1 = arith.constant 0 : i32
    return %c0_i32, %c0_i32_0 : i32, i32
  }
  func.func @transform_14(%arg0: i32, %arg1: memref<2x8xi32, #tpu.memory_space<smem>>) -> (i32, i32) {
    %c0_i32 = arith.constant 0 : i32
    %c0_i32_0 = arith.constant 0 : i32
    %c0_i32_1 = arith.constant 0 : i32
    return %c0_i32, %c0_i32_0 : i32, i32
  }
  func.func @transform_15(%arg0: i32, %arg1: memref<2x8xi32, #tpu.memory_space<smem>>) -> (i32, i32, i32) {
    %c0_i32 = arith.constant 0 : i32
    %c0_i32_0 = arith.constant 0 : i32
    %c0_i32_1 = arith.constant 0 : i32
    return %arg0, %c0_i32, %c0_i32_0 : i32, i32, i32
  }
}

</mosaic_0001>

<bundles_post_ra>
// kernel: transformer_forward.1
= control target key start
LH: loop header
LB: loop body
LE: loop exit
PB: predicated region body
PF: predicated region fallthrough
CT: control target
= control target key end

     0   :  { %s6655_s0 = inlined_call_operand.vmem [shape: s32[2,8], index: 0, kind: input, shape index: {}]   ;;  %s6656_s1 = inlined_call_operand.vmem [shape: f32[100,32], index: 1, kind: input, shape index: {}]   ;;  %s6657_s2 = inlined_call_operand.vmem [shape: f32[8,32], index: 2, kind: input, shape index: {}]   ;;  %s6658_s3 = inlined_call_operand.vmem [shape: f32[4,32], index: 3, kind: input, shape index: {}]   ;;  %s6659_s4 = inlined_call_operand.vmem [shape: f32[4,32], index: 4, kind: input, shape index: {}]   ;;  %s6660_s5 = inlined_call_operand.vmem [shape: bf16[4,32,96], index: 5, kind: input, shape index: {}]   ;;  %s6661_s6 = inlined_call_operand.vmem [shape: bf16[4,4,8,32], index: 6, kind: input, shape index: {}]   ;;  %s6662_s7 = inlined_call_operand.vmem [shape: f32[4,32], index: 7, kind: input, shape index: {}]   ;;  %s6663_s8 = inlined_call_operand.vmem [shape: f32[4,32], index: 8, kind: input, shape index: {}]   ;;  %s6664_s9 = inlined_call_operand.vmem [shape: f32[4,32], index: 9, kind: input, shape index: {}]   ;;  %s6665_s10 = inlined_call_operand.vmem [shape: bf16[4,32,128], index: 10, kind: input, shape index: {}]   ;;  %s6666_s11 = inlined_call_operand.vmem [shape: f32[4,128], index: 11, kind: input, shape index: {}]   ;;  %s6667_s12 = inlined_call_operand.vmem [shape: bf16[4,128,32], index: 12, kind: input, shape index: {}]   ;;  %s6668_s13 = inlined_call_operand.vmem [shape: f32[4,32], index: 13, kind: input, shape index: {}]   ;;  %s6669_s14 = inlined_call_operand.vmem [shape: bf16[32,128], index: 14, kind: input, shape index: {}]   ;;  %s6670_s15 = inlined_call_operand.vmem [shape: f32[1,128], index: 15, kind: input, shape index: {}]   ;;  %s6671_s16 = inlined_call_operand.hbm [shape: f32[2,8,128], index: 16, kind: output, shape index: {}]  }
   0x1   :  { %6695 = sst [smem:[#allocation17_spill]] %s6655_s0 }
   0x2   :  { %6696 = sst [smem:[#allocation18_spill]] %s6664_s9  ;;  %s6701_s23 = sld [smem:[#allocation17_spill]] }
   0x3   :  { %6697 = sst [smem:[#allocation19_spill]] %s6668_s13 }
   0x4   :  { %6698 = sst [smem:[#allocation20_spill]] %s6669_s14 }
   0x5   :  { %6699 = sst [smem:[#allocation21_spill]] %s6670_s15 }
   0x6   :  { %6700 = sst [smem:[#allocation22_spill]] %s6671_s16 }
   0x8   :  { %s21_s9 = sshll.u32 %s6701_s23, 4  ;;  %s22_s9 = int_to_ptr.vmem [resolvable:$true] %s21_s9 }
   0x9   :  { %s5493_s24 = scalar_lea.vmem %s22_s9, 32  ;;  %p5498_p1 = scmp.lt.s32.totalorder %s22_s9, %s22_s9 }
   0xa   :  { %p5494_p0 = scmp.ne.s32.totalorder %s22_s9, %s5493_s24  ;;  %p5499_p2 = scmp.lt.s32.totalorder %s5493_s24, %s5493_s24 }
   0xc   :  { %p5500_p3 = por %p5499_p2, %p5498_p1 }
   0xe   :  { %p5501_p4 = pnand %p5500_p3, %p5494_p0 }
  0x10   :  { %5504 = shalt.err (!%p5501_p4)  }
  0x11   :  { %s5571_s25 = smov [#allocation4]  }
  0x12   :  { %24 = dma.vmem_to_smem %s22_s9, 32, %s5571_s25, [#allocation3] }
  0x13   :  { %5549 = dma.done.wait [#allocation3], 32 }
  0x14   :  { %5550 = vsyncadd [#allocation3], 4294967264 }
  0x15   :  { %26 = sfence }
  0x16   :  { %27 = vsyncpa [#allocation6], 0 }
  0x17   :  { %29 = vsyncpa [#allocation6 + $0x1], 0  ;;  %s5675_s26 = smov 0   ;;  %s5677_s27 = smov 0  }
  0x18   :  { %s5679_s28 = smov 0   ;;  %s5681_s29 = smov 0  }
  0x19 LB: > { %6702 = sst [smem:[#allocation9_spill]] %s5557_s26  ;;  %s4425_s9 = sadd.s32 4294967295, %s5569_s29   ;;  %s5569_s29 = sphi %s5681_s29, %s6731_s29   ;;  %s5565_s28 = sphi %s5679_s28, %s6734_s28   ;;  %s5561_s27 = sphi %s5677_s27, %s6733_s27   ;;  %s5557_s26 = sphi %s5675_s26, %s6732_s26  }
  0x1a   : > { %6703 = sst [smem:[#allocation10_spill]] %s5561_s27  ;;  %s4426_s30 = sadd.s32 4294967294, %s5569_s29  }
  0x1b   : > { %6704 = sst [smem:[#allocation11_spill]] %s5565_s28  ;;  %s5698_s0 = sadd.s32 1, %s5569_s29  }
  0x1c   : > { %6705 = sst [smem:[#allocation12_spill]] %s5569_s29  ;;  %s357_s17 = sadd.s32 1, %s5565_s28 }
  0x1d   : > { %6706 = sst [smem:[#allocation13_spill]] %s5698_s0  ;;  %s354_s18 = ssub.s32 %s5569_s29, %s5698_s0 }
  0x1e   : > { %p367_p5 = scmp.ne.s32.totalorder %s5565_s28, %s5561_s27  ;;  %p355_p6 = scmp.eq.s32.totalorder %s354_s18, 0 }
  0x1f   : > { %p368_p7 = scmp.eq.s32.totalorder %s4425_s9, 1  ;;  %p373_p8 = scmp.ne.s32.totalorder %s5561_s27, %s5557_s26 }
  0x20   : > { %p374_p9 = scmp.eq.s32.totalorder %s4426_s30, 1  ;;  %p4428_p12 = scmp.ge.s32.totalorder %s5569_s29, 1 }
  0x21   : > { %s5708_s19 = scalar_select %p355_p6, %s5565_s28, %s357_s17  }
  0x22   : > { %p5710_p10 = por %p368_p7, %p367_p5  ;;  %p5714_p11 = por %p374_p9, %p373_p8 }
  0x23   : > { %6707 = sst [smem:[#allocation14_spill]] %s5708_s19  ;;  %p437_p13 = scmp.lt.s32.totalorder %s5569_s29, 3 }
  0x24   : > { %s6708_s20 = scalar_select %p5710_p10, 1, 0 }
  0x25   : > { %s6710_s21 = scalar_select %p5714_p11, 1, 0 }
  0x26   : > { %6709 = sst [smem:[#allocation15_spill]] %s6708_s20  ;;  %p438_p0 = pnand %p4428_p12, %p437_p13 }
  0x27   : > { %6711 = sst [smem:[#allocation16_spill]] %s6710_s21  ;;  %s5720_s22 = sshll.u32 (!%p438_p0), %s4425_s9, 7  ;;  %v485_v0 = vld [vmem:[%s6657_s2] sm:$0x1] (!%p438_p0)  ;;  %v493_v1 = vld [vmem:[%s6657_s2 + $0x1] sm:$0x1] (!%p438_p0)  ;;  %v539_v53 = vlaneseq (!%p438_p0) }
  0x28   : > { %441 = sbr.rel (%p438_p0) target bundleno = 12454 (0x30a6), region = 80  ;;  %s482_s23 = sld [smem:[#allocation4 + %s5720_s22]] (!%p438_p0)  ;;  %v500_v2 = vld [vmem:[%s6657_s2 + $0x2] sm:$0x1] (!%p438_p0)  ;;  %v507_v3 = vld [vmem:[%s6657_s2 + $0x3] sm:$0x1] (!%p438_p0) }
  0x29   : > { %s489_s24 = sadd.s32 (!%p438_p0), 1, %s5720_s22  ;;  %s496_s30 = sadd.s32 (!%p438_p0), 2, %s5720_s22  ;;  %vm487_vm0 = vcmask (!%p438_p0), 253952   ;;  %v514_v5 = vld [vmem:[%s6657_s2 + $0x4] sm:$0x1] (!%p438_p0)  ;;  %vm547_vm1 = vcmask (!%p438_p0), 261120  }
  0x2a   : > { %s490_s25 = sld [smem:[#allocation4 + %s489_s24]] (!%p438_p0)  ;;  %s503_s18 = sadd.s32 (!%p438_p0), 3, %s5720_s22  ;;  %v521_v8 = vld [vmem:[%s6657_s2 + $0x5] sm:$0x1] (!%p438_p0)  ;;  %v528_v11 = vld [vmem:[%s6657_s2 + $0x6] sm:$0x1] (!%p438_p0) }
  0x2b   : > { %s497_s17 = sld [smem:[#allocation4 + %s496_s30]] (!%p438_p0)  ;;  %s510_s0 = sadd.s32 (!%p438_p0), 4, %s5720_s22  ;;  %v535_v16 = vld [vmem:[%s6657_s2 + $0x7] sm:$0x1] (!%p438_p0)  ;;  %v5572_v32 = vmov (!%p438_p0), 0.0   ;;  %vm5573_vm2 = vmmov (!%p438_p0), 0  }
  0x2c   : > { %s504_s9 = sld [smem:[#allocation4 + %s503_s18]] (!%p438_p0)  ;;  %s517_s16 = sadd.s32 (!%p438_p0), 5, %s5720_s22  ;;  %v5363_v31 = vld [vmem:[%s6660_s5] sm:$0xff] (!%p438_p0)   ;;  %4817 = vmatprep.subr.bf16.mxu1 (!%p438_p0), %v5572_v32  ;;  %4821 = vmatprep.mubr.msk.bf16.mxu1 (!%p438_p0), %vm5573_vm2, %v5572_v32  ;;  %v5364_v33 = vld [vmem:[%s6660_s5 + $0x8] sm:$0xff] (!%p438_p0)   ;;  %vm642_vm3 = vcmask (!%p438_p0), 64512   ;;  %vm706_vm4 = vcmask (!%p438_p0), 1043456  }
  0x2d   : > { %s511_s29 = sld [smem:[#allocation4 + %s510_s0]] (!%p438_p0)  ;;  %s524_s30 = sadd.s32 (!%p438_p0), 6, %s5720_s22  ;;  %4818 = vmatpush3.bf16.msra.mxu1 (!%p438_p0), %v5363_v31  ;;  %4831 = vmatprep.subr.bf16.mxu0 (!%p438_p0), %v5572_v32  ;;  %v4431_v38 = vld [vmem:[%s6658_s3] ss:$0 sm:$0xff] (!%p438_p0)  ;;  %v540_v54 = vshrl.u32 (!%p438_p0), %v539_v53, 7  ;;  %v542_v55 = vand.u32 (!%p438_p0), 127, %v539_v53 }
  0x2e   : > { %s5737_s24 = sld [smem:[#allocation4 + %s517_s16]] (!%p438_p0)  ;;  %s483_s28 = scalar_lea.vmem (!%p438_p0), %s6656_s1, %s482_s23  ;;  %4819 = vmatprep.subr.bf16.mxu1 (!%p438_p0), %v5572_v32  ;;  %4833 = vmatprep.mubr.msk.bf16.mxu0 (!%p438_p0), %vm5573_vm2, %v5572_v32  ;;  %v4432_v40 = vld [vmem:[%s6659_s4] ss:$0 sm:$0xff] (!%p438_p0)  ;;  %v5576_v56 = vmov (!%p438_p0), -1e+30  }
  0x2f   : > { %s5746_s13 = sld [smem:[#allocation4 + %s524_s30]]  ;;  %v484_v4 = vld [vmem:[%s483_s28] sm:$0x1]  ;;  %s531_s21 = sadd.s32 7, %s5720_s22  ;;  %vm543_vm5 = vcmp.ge.s32.totalorder %v540_v54, %v542_v55 }
  0x30   : > { %s491_s15 = scalar_lea.vmem %s6656_s1, %s490_s25  ;;  %v486_v6 = vadd.f32 %v485_v0, %v484_v4  ;;  %s532_s28 = sld [smem:[#allocation4 + %s531_s21]]  ;;  %v5835_v57 = vsel %vm543_vm5, 0.0, %v5576_v56 }
  0x31   : > { %v492_v7 = vld [vmem:[%s491_s15] sm:$0x1]  ;;  %s498_s23 = scalar_lea.vmem %s6656_s1, %s497_s17  ;;  %4820 = vmatpush3.bf16.msra.mxu1 %v5364_v33  ;;  %s6694_s21 = smov 64  }
  0x32   : > { %v494_v9 = vadd.f32 %v493_v1, %v492_v7  ;;  %v499_v10 = vld [vmem:[%s498_s23] sm:$0x1]  ;;  %s505_s26 = scalar_lea.vmem %s6656_s1, %s504_s9  ;;  %488 = vst.msk [vmem:[#allocation2] sm:$0x1] %vm487_vm0, %v486_v6  ;;  %4825 = vmatprep.subr.bf16.mxu1 %v5572_v32  ;;  %s5575_s14 = smov 96  }
  0x33   : > { %v501_v12 = vadd.f32 %v500_v2, %v499_v10  ;;  %v506_v13 = vld [vmem:[%s505_s26] sm:$0x1]  ;;  %s512_s16 = scalar_lea.vmem %s6656_s1, %s511_s29  ;;  %s5578_s27 = smov 88  }
  0x34   : > { %495 = vst.msk [vmem:[#allocation2 + $0x1] sm:$0x1] %vm487_vm0, %v494_v9  ;;  %v508_v14 = vadd.f32 %v507_v3, %v506_v13  ;;  %v513_v15 = vld [vmem:[%s512_s16] sm:$0x1]  ;;  %s519_s9 = scalar_lea.vmem %s6656_s1, %s5737_s24  ;;  %s5579_s23 = smov 120  }
  0x35   : > { %502 = vst.msk [vmem:[#allocation2 + $0x2] sm:$0x1] %vm487_vm0, %v501_v12  ;;  %v515_v17 = vadd.f32 %v514_v5, %v513_v15  ;;  %v520_v18 = vld [vmem:[%s519_s9] sm:$0x1]  ;;  %s526_s29 = scalar_lea.vmem %s6656_s1, %s5746_s13  ;;  %s5577_s9 = smov 80  }
  0x36   : > { %509 = vst.msk [vmem:[#allocation2 + $0x3] sm:$0x1] %vm487_vm0, %v508_v14  ;;  %v522_v19 = vadd.f32 %v521_v8, %v520_v18  ;;  %v527_v20 = vld [vmem:[%s526_s29] sm:$0x1]  ;;  %s533_s18 = scalar_lea.vmem %s6656_s1, %s532_s28  ;;  %s5580_s30 = smov 112  }
  0x37   : > { %516 = vst.msk [vmem:[#allocation2 + $0x4] sm:$0x1] %vm487_vm0, %v515_v17  ;;  %v529_v21 = vadd.f32 %v528_v11, %v527_v20  ;;  %v534_v22 = vld [vmem:[%s533_s18] sm:$0x1]  ;;  %s6693_s24 = smov 48   ;;  %s6689_s25 = smov 104  }
  0x38   : > { %523 = vst.msk [vmem:[#allocation2 + $0x5] sm:$0x1] %vm487_vm0, %v522_v19  ;;  %v536_v23 = vadd.f32 %v535_v16, %v534_v22  ;;  %v751_v15 = vld [vmem:[%s6661_s6] sm:$0xf]  ;;  %s6687_s18 = smov 56   ;;  %s6691_s13 = smov 72  }
  0x39   : > { %530 = vst.msk [vmem:[#allocation2 + $0x6] sm:$0x1] %vm487_vm0, %v529_v21  ;;  %v756_v16 = vsel %vm706_vm4, %v751_v15, 0  ;;  %s6685_s17 = smov 40   ;;  %s6712_s28 = sld [smem:[#allocation18_spill]] }
  0x3a   : > { %537 = vst.msk [vmem:[#allocation2 + $0x7] sm:$0x1] %vm487_vm0, %v536_v23  ;;  %s6714_s0 = sld [smem:[#allocation19_spill]]  ;;  %s6715_s20 = smov 56  }
  0x3b   : > { %s6717_s19 = smov 72   ;;  %s6718_s29 = smov 104  }
  0x3c   : > { %s5586_s16 = smov [#allocation5]  }
  0x41   : > { %v5792_v24 = vld [vmem:[#allocation2] sm:$0xff] }
  0x42   : > { %v548_v25 = vsel %vm547_vm1, %v5792_v24, 0.0 }
  0x43   : > { %549 = vadd.xlane.f32.xlu0 %v548_v25 }
  0xd0   : > { %v550_v26 = vpop.xlane.xlu0 %549 }
  0xd1   : > { %v552_v27 = vmul.f32 0.03125, %v550_v26 }
  0xd3   : > { %v553_v28 = vsub.f32 %v5792_v24, %v552_v27 }
  0xd5   : > { %v554_v29 = vmul.f32 %v553_v28, %v553_v28 }
  0xd7   : > { %v555_v30 = vsel %vm547_vm1, %v554_v29, 0.0 }
  0xd8   : > { %556 = vadd.xlane.f32.xlu0 %v555_v30 }
 0x165   : > { %v557_v34 = vpop.xlane.xlu0 %556 }
 0x166   : > { %v558_v35 = vmul.f32 0.03125, %v557_v34 }
 0x168   : > { %v559_v36 = vadd.f32 1e-05, %v558_v35 }
 0x16a   : > { %5413 = vrsqrt.f32 %v559_v36 }
 0x174   : > { %v5414_v37 = vpop.eup %5413 }
 0x175   : > { %v561_v39 = vmul.f32 %v5414_v37, %v553_v28 }
 0x177   : > { %v566_v41 = vmul.f32 %v4431_v38, %v561_v39 }
 0x179   : > { %v571_v42 = vadd.f32 %v4432_v40, %v566_v41 }
 0x17b   : > { %v572_v43 = vpack.c.bf16 %v571_v42, %v571_v42 }
 0x17d   : > { %4822 = vmatmul.mubr.msk.bf16.vlgmr.msra.gmra.mrb[0].mxu1 %vm547_vm1, %v572_v43 }
 0x17e   : > { %4827 = vmatprep.mubr.msk.bf16.mxu1 %vm5573_vm2, %v5572_v32 }
 0x250   : > { %v626_v44 = vpop.f32.mrb[0].mxu1 }
 0x251   : > { %v5821_v45 = vpack.c.bf16 %v626_v44, %v626_v44  ;;  %v4823_v46 = vpop.f32.mrb[1].mxu1 }
 0x252   : > { %v629_v47 = vpop.f32.mrb[2].mxu1 }
 0x253   : > { %701 = vrot.lane.b32.xlu0 %v5821_v45, %s6694_s21  ;;  %640 = vrot.lane.b32.xlu1 %v5821_v45, %s5575_s14  ;;  %v4824_v48 = vpop.f32.mrb[3].mxu1 }
 0x2c5   : > { %v702_v49 = vpop.permute.xlu0 %701  ;;  %v641_v50 = vpop.permute.xlu1 %640 }
 0x2c6   : > { %v647_v51 = vsel %vm642_vm3, %v641_v50, 0  ;;  %v708_v52 = vsel %vm706_vm4, %v702_v49, 0 }
 0x2c7   : > { %4826 = vmatpush3.bf16.xpose.msra.mxu1 %v647_v51  ;;  %4832 = vmatpush3.bf16.msra.mxu0 %v708_v52 }
 0x2c8   : > { %4843 = vmatprep.subr.bf16.mxu0 %v5572_v32  ;;  %4837 = vmatprep.subr.bf16.mxu1 %v5572_v32 }
 0x2ce   : > { %4828 = vmatmul.mubr.msk.bf16.vlgmr.msra.gmra.mrb[4].mxu1 %vm642_vm3, %v5821_v45 }
 0x2cf   : > { %4839 = vmatprep.mubr.msk.bf16.mxu1 %vm5573_vm2, %v5572_v32  ;;  %4838 = vmatpush3.bf16.msra.mxu1 %v756_v16 }
 0x2d0   : > { %4849 = vmatprep.subr.bf16.mxu1 %v5572_v32 }
 0x3a1   : > { %v683_v58 = vpop.f32.mrb[4].mxu1 }
 0x3a2   : > { %v684_v59 = vadd.f32 %v683_v58, %v5835_v57  ;;  %v4829_v60 = vpop.f32.mrb[5].mxu1 }
 0x3a3   : > { %v686_v61 = vpop.f32.mrb[6].mxu1 }
 0x3a4   : > { %v4830_v62 = vpop.f32.mrb[7].mxu1  ;;  %v689_v63 = vsel %vm642_vm3, %v684_v59, -inf }
 0x3a5   : > { %690 = vmax.xlane.f32.xlu1 %v689_v63  ;;  %v4442_v63 = vld [vmem:[%s6661_s6 + $0x4] sm:$0xf] }
 0x3b6   : > { %961 = vrot.lane.b32.xlu1 %v5821_v45, %s5577_s9 }
 0x432   : > { %v691_v0 = vpop.xlane.xlu1 %690 }
 0x433   : > { %v692_v1 = vsub.f32 %v684_v59, %v691_v0  ;;  %v916_v0 = vsel %vm706_vm4, %v4442_v63, 0  ;;  %v5367_v63 = vld [vmem:[%s6667_s12] sm:$0xff]  }
 0x435   : > { %v693_v2 = vmul.f32 1.442695, %v692_v1 }
 0x436   : > { %v962_v11 = vpop.permute.xlu1 %961 }
 0x437   : > { %5415 = vpow2.f32 %v693_v2  ;;  %v967_v13 = vsel %vm642_vm3, %v962_v11, 0  ;;  %v4446_v11 = vld [vmem:[%s6661_s6 + $0x8] sm:$0xf] }
 0x438   : > { %v1076_v15 = vsel %vm706_vm4, %v4446_v11, 0 }
 0x441   : > { %v5416_v3 = vpop.eup %5415 }
 0x442   : > { %v695_v4 = vsel %vm642_vm3, %v5416_v3, 0.0 }
 0x443   : > { %696 = vadd.xlane.f32.xlu0 %v695_v4 }
 0x459   : > { %801 = vrot.lane.b32.xlu0 %v5821_v45, %s5578_s27 }
 0x45d   : > { %799 = vrot.lane.b32.xlu0 %v5821_v45, %s5579_s23 }
 0x461   : > { %959 = vrot.lane.b32.xlu0 %v5821_v45, %s5580_s30 }
 0x4d0   : > { %v697_v5 = vpop.xlane.xlu0 %696 }
 0x4d1   : > { %5417 = vrcp.f32 %v697_v5 }
 0x4d4   : > { %v802_v8 = vpop.permute.xlu0 %801 }
 0x4d5   : > { %v807_v10 = vsel %vm642_vm3, %v802_v8, 0 }
 0x4d8   : > { %v800_v12 = vpop.permute.xlu0 %799 }
 0x4db   : > { %v5418_v6 = vpop.eup %5417 }
 0x4dc   : > { %v699_v7 = vmul.f32 %v5418_v6, %v5416_v3  ;;  %v960_v14 = vpop.permute.xlu0 %959 }
 0x4de   : > { %v700_v9 = vpack.c.bf16 %v699_v7, %v699_v7 }
 0x4e0   : > { %4834 = vmatmul.mubr.msk.bf16.vlgmr.msra.gmra.mrb[0].mxu0 %vm642_vm3, %v700_v9 }
 0x4e1   : > { %4844 = vmatpush3.bf16.xpose.msra.mxu0 %v807_v10  ;;  %4845 = vmatprep.mubr.msk.bf16.mxu0 %vm5573_vm2, %v5572_v32 }
 0x4e2   : > { %4861 = vmatprep.subr.bf16.mxu0 %v5572_v32 }
 0x4e8   : > { %4846 = vmatmul.mubr.msk.bf16.vlgmr.msra.gmra.mrb[4].mxu0 %vm642_vm3, %v800_v12 }
 0x4e9   : > { %4862 = vmatpush3.bf16.xpose.msra.mxu0 %v967_v13  ;;  %4863 = vmatprep.mubr.msk.bf16.mxu0 %vm5573_vm2, %v5572_v32 }
 0x4ea   : > { %4867 = vmatprep.subr.bf16.mxu0 %v5572_v32 }
 0x4f0   : > { %4864 = vmatmul.mubr.msk.bf16.vlgmr.msra.gmra.mrb[8].mxu0 %vm642_vm3, %v960_v14 }
 0x4f1   : > { %4869 = vmatprep.mubr.msk.bf16.mxu0 %vm5573_vm2, %v5572_v32 }
 0x5b3   : > { %v744_v17 = vpop.f32.mrb[0].mxu0 }
 0x5b4   : > { %v750_v18 = vpack.c.bf16 %v744_v17, %v744_v17  ;;  %v4835_v19 = vpop.f32.mrb[1].mxu0 }
 0x5b5   : > { %v747_v20 = vpop.f32.mrb[2].mxu0 }
 0x5b6   : > { %v4836_v21 = vpop.f32.mrb[3].mxu0  ;;  %4840 = vmatmul.mubr.msk.bf16.vlgmr.msra.gmra.mrb[8].mxu1 %vm642_vm3, %v750_v18 }
 0x5b7   : > { %4851 = vmatprep.mubr.msk.bf16.mxu1 %vm5573_vm2, %v5572_v32 }
 0x5bb   : > { %v843_v22 = vpop.f32.mrb[4].mxu0 }
 0x5bc   : > { %v4847_v23 = vpop.f32.mrb[5].mxu0  ;;  %v844_v34 = vadd.f32 %v843_v22, %v5835_v57 }
 0x5bd   : > { %v846_v25 = vpop.f32.mrb[6].mxu0 }
 0x5be   : > { %v4848_v26 = vpop.f32.mrb[7].mxu0  ;;  %v849_v35 = vsel %vm642_vm3, %v844_v34, -inf }
 0x5c3   : > { %v1003_v27 = vpop.f32.mrb[8].mxu0 }
 0x5c4   : > { %v1004_v28 = vadd.f32 %v1003_v27, %v5835_v57  ;;  %v4865_v29 = vpop.f32.mrb[9].mxu0 }
 0x5c5   : > { %v1006_v30 = vpop.f32.mrb[10].mxu0  ;;  %v4450_v29 = vld [vmem:[%s6661_s6 + $0xc] sm:$0xf] }
 0x5c6   : > { %v4866_v31 = vpop.f32.mrb[11].mxu0  ;;  %v1009_v33 = vsel %vm642_vm3, %v1004_v28, -inf }
 0x5c7   : > { %1010 = vmax.xlane.f32.xlu0 %v1009_v33  ;;  %v1236_v33 = vsel %vm706_vm4, %v4450_v29, 0 }
 0x5dd   : > { %1021 = vrot.lane.b32.xlu0 %v5821_v45, %s6693_s24 }
 0x5e1   : > { %1119 = vrot.lane.b32.xlu0 %v5821_v45, %s6689_s25 }
 0x600   : > { %850 = vmax.xlane.f32.xlu0 %v849_v35 }
 0x616   : > { %861 = vrot.lane.b32.xlu0 %v5821_v45, %s6687_s18  ;;  %s6716_s18 = smov 40  }
 0x654   : > { %v1011_v36 = vpop.xlane.xlu0 %1010 }
 0x655   : > { %v1012_v37 = vsub.f32 %v1004_v28, %v1011_v36 }
 0x657   : > { %v1013_v38 = vmul.f32 1.442695, %v1012_v37 }
 0x658   : > { %v1022_v39 = vpop.permute.xlu0 %1021 }
 0x659   : > { %5419 = vpow2.f32 %v1013_v38  ;;  %v1027_v40 = vsel %vm706_vm4, %v1022_v39, 0  ;;  %v4436_v38 = vld [vmem:[%s6662_s7] ss:$0 sm:$0xff] }
 0x65a   : > { %4868 = vmatpush3.bf16.msra.mxu0 %v1027_v40  ;;  %v638_v39 = vadd.f32 %v4436_v38, %v5792_v24  ;;  %v5365_v24 = vld [vmem:[%s6665_s10] sm:$0xff]  }
 0x65b   : > { %4879 = vmatprep.subr.bf16.mxu0 %v5572_v32  ;;  %v4468_v38 = vld [vmem:[%s6659_s4 + $0x1] ss:$0 sm:$0xff] }
 0x65c   : > { %v1120_v43 = vpop.permute.xlu0 %1119 }
 0x663   : > { %v5420_v41 = vpop.eup %5419 }
 0x664   : > { %v1015_v42 = vsel %vm642_vm3, %v5420_v41, 0.0 }
 0x665   : > { %1016 = vadd.xlane.f32.xlu1 %v1015_v42 }
 0x676   : > { %1121 = vrot.lane.b32.xlu1 %v5821_v45, %s6691_s13 }
 0x68d   : > { %v851_v44 = vpop.xlane.xlu0 %850 }
 0x68e   : > { %v852_v46 = vsub.f32 %v844_v34, %v851_v44 }
 0x690   : > { %v853_v47 = vmul.f32 1.442695, %v852_v46 }
 0x691   : > { %v862_v48 = vpop.permute.xlu0 %861 }
 0x692   : > { %5421 = vpow2.f32 %v853_v47  ;;  %v867_v49 = vsel %vm706_vm4, %v862_v48, 0 }
 0x693   : > { %4850 = vmatpush3.bf16.msra.mxu1 %v867_v49 }
 0x694   : > { %4855 = vmatprep.subr.bf16.mxu1 %v5572_v32 }
 0x69c   : > { %v5422_v50 = vpop.eup %5421 }
 0x69d   : > { %v855_v51 = vsel %vm642_vm3, %v5422_v50, 0.0 }
 0x69e   : > { %856 = vadd.xlane.f32.xlu1 %v855_v51 }
 0x6f2   : > { %v1017_v52 = vpop.xlane.xlu1 %1016 }
 0x6f3   : > { %5423 = vrcp.f32 %v1017_v52  ;;  %v5366_v52 = vld [vmem:[%s6665_s10 + $0x8] sm:$0xff]  }
 0x6f6   : > { %v1122_v55 = vpop.permute.xlu1 %1121 }
 0x6f7   : > { %v1127_v58 = vsel %vm642_vm3, %v1122_v55, 0 }
 0x6fd   : > { %v5424_v53 = vpop.eup %5423 }
 0x6fe   : > { %v1019_v54 = vmul.f32 %v5424_v53, %v5420_v41 }
 0x700   : > { %v1020_v56 = vpack.c.bf16 %v1019_v54, %v1019_v54 }
 0x702   : > { %4870 = vmatmul.mubr.msk.bf16.vlgmr.msra.gmra.mrb[12].mxu0 %vm642_vm3, %v1020_v56 }
 0x703   : > { %4880 = vmatpush3.bf16.xpose.msra.mxu0 %v1127_v58  ;;  %4881 = vmatprep.mubr.msk.bf16.mxu0 %vm5573_vm2, %v5572_v32  ;;  %v4452_v58 = vld [vmem:[%s6663_s8] ss:$0 sm:$0xff] }
 0x704   : > { %4897 = vmatprep.subr.bf16.mxu0 %v5572_v32 }
 0x70a   : > { %4882 = vmatmul.mubr.msk.bf16.vlgmr.msra.gmra.mrb[16].mxu0 %vm642_vm3, %v1120_v43 }
 0x70b   : > { %4901 = vmatprep.mubr.msk.bf16.mxu0 %vm5573_vm2, %v5572_v32  ;;  %4898 = vmatpush3.bf16.msra.mxu0 %v5365_v24 }
 0x70c   : > { %4899 = vmatprep.subr.bf16.mxu0 %v5572_v32 }
 0x70f   : > { %4900 = vmatpush3.bf16.msra.mxu0 %v5366_v52 }
 0x710   : > { %4905 = vmatprep.subr.bf16.mxu0 %v5572_v32 }
 0x72b   : > { %v857_v59 = vpop.xlane.xlu1 %856 }
 0x72c   : > { %5425 = vrcp.f32 %v857_v59 }
 0x736   : > { %v5426_v60 = vpop.eup %5425 }
 0x737   : > { %v859_v61 = vmul.f32 %v5426_v60, %v5422_v50  ;;  %v4453_v60 = vld [vmem:[%s6712_s28] ss:$0 sm:$0xff] }
 0x739   : > { %v860_v62 = vpack.c.bf16 %v859_v61, %v859_v61 }
 0x73b   : > { %4852 = vmatmul.mubr.msk.bf16.vlgmr.msra.gmra.mrb[12].mxu1 %vm642_vm3, %v860_v62 }
 0x73c   : > { %4857 = vmatprep.mubr.msk.bf16.mxu1 %vm5573_vm2, %v5572_v32  ;;  %4856 = vmatpush3.bf16.msra.mxu1 %v916_v0 }
 0x73d   : > { %4873 = vmatprep.subr.bf16.mxu1 %v5572_v32 }
 0x7d5   : > { %v1063_v1 = vpop.f32.mrb[12].mxu0 }
 0x7d6   : > { %v4871_v2 = vpop.f32.mrb[13].mxu0  ;;  %v1069_v18 = vpack.c.bf16 %v1063_v1, %v1063_v1  ;;  %v5368_v1 = vld [vmem:[%s6667_s12 + $0x8] sm:$0xff]  }
 0x7d7   : > { %v1066_v3 = vpop.f32.mrb[14].mxu0  ;;  %v5369_v2 = vld [vmem:[%s6667_s12 + $0x10] sm:$0xff]  }
 0x7d8   : > { %v4872_v4 = vpop.f32.mrb[15].mxu0  ;;  %v5370_v3 = vld [vmem:[%s6667_s12 + $0x18] sm:$0xff]  }
 0x7d9   : > { %v5371_v4 = vld [vmem:[%s6667_s12 + $0x20] sm:$0xff]  }
 0x7dd   : > { %v1163_v5 = vpop.f32.mrb[16].mxu0 }
 0x7de   : > { %v1164_v6 = vadd.f32 %v1163_v5, %v5835_v57  ;;  %v4883_v7 = vpop.f32.mrb[17].mxu0  ;;  %v5372_v5 = vld [vmem:[%s6667_s12 + $0x28] sm:$0xff]  }
 0x7df   : > { %v1166_v8 = vpop.f32.mrb[18].mxu0  ;;  %v5374_v7 = vld [vmem:[%s6667_s12 + $0x38] sm:$0xff]  }
 0x7e0   : > { %v4884_v9 = vpop.f32.mrb[19].mxu0  ;;  %v1169_v10 = vsel %vm642_vm3, %v1164_v6, -inf  ;;  %v4454_v8 = vld [vmem:[%s6666_s11] ss:$0 sm:$0xff] }
 0x7e1   : > { %1170 = vmax.xlane.f32.xlu1 %v1169_v10 }
 0x80e   : > { %v903_v12 = vpop.f32.mrb[12].mxu1 }
 0x80f   : > { %v909_v13 = vpack.c.bf16 %v903_v12, %v903_v12  ;;  %v4853_v14 = vpop.f32.mrb[13].mxu1 }
 0x810   : > { %v906_v16 = vpop.f32.mrb[14].mxu1 }
 0x811   : > { %v4854_v17 = vpop.f32.mrb[15].mxu1  ;;  %4858 = vmatmul.mubr.msk.bf16.vlgmr.msra.gmra.mrb[8].mxu1 %vm642_vm3, %v909_v13  ;;  %v4458_v16 = vld [vmem:[%s6714_s0] ss:$0 sm:$0xff] }
 0x812   : > { %4874 = vmatpush3.bf16.msra.mxu1 %v1076_v15  ;;  %4875 = vmatprep.mubr.msk.bf16.mxu1 %vm5573_vm2, %v5572_v32 }
 0x813   : > { %4885 = vmatprep.subr.bf16.mxu1 %v5572_v32 }
 0x81d   : > { %4876 = vmatmul.mubr.msk.bf16.vlgmr.msra.gmra.mrb[8].mxu1 %vm642_vm3, %v1069_v18 }
 0x81e   : > { %4887 = vmatprep.mubr.msk.bf16.mxu1 %vm5573_vm2, %v5572_v32 }
 0x86e   : > { %v1171_v19 = vpop.xlane.xlu1 %1170 }
 0x86f   : > { %v1172_v20 = vsub.f32 %v1164_v6, %v1171_v19  ;;  %v5373_v6 = vld [vmem:[%s6667_s12 + $0x30] sm:$0xff]  }
 0x871   : > { %v1173_v21 = vmul.f32 1.442695, %v1172_v20 }
 0x873   : > { %5427 = vpow2.f32 %v1173_v21 }
 0x87d   : > { %v5428_v22 = vpop.eup %5427 }
 0x87e   : > { %v1175_v23 = vsel %vm642_vm3, %v5428_v22, 0.0 }
 0x87f   : > { %1176 = vadd.xlane.f32.xlu1 %v1175_v23 }
 0x890   : > { %1181 = vrot.lane.b32.xlu1 %v5821_v45, %s6685_s17  ;;  %s6713_s17 = smov %s6712_s28 }
 0x90c   : > { %v1177_v25 = vpop.xlane.xlu1 %1176 }
 0x90d   : > { %5429 = vrcp.f32 %v1177_v25 }
 0x910   : > { %v1182_v26 = vpop.permute.xlu1 %1181 }
 0x911   : > { %v1187_v27 = vsel %vm706_vm4, %v1182_v26, 0 }
 0x912   : > { %4886 = vmatpush3.bf16.msra.mxu1 %v1187_v27 }
 0x913   : > { %4891 = vmatprep.subr.bf16.mxu1 %v5572_v32 }
 0x917   : > { %v5430_v28 = vpop.eup %5429 }
 0x918   : > { %v1179_v30 = vmul.f32 %v5430_v28, %v5428_v22 }
 0x91a   : > { %v1180_v31 = vpack.c.bf16 %v1179_v30, %v1179_v30  ;;  %v5375_v30 = vld [vmem:[%s6660_s5 + $0x10] sm:$0xff]  }
 0x91c   : > { %4888 = vmatmul.mubr.msk.bf16.vlgmr.msra.gmra.mrb[16].mxu1 %vm642_vm3, %v1180_v31  ;;  %v5376_v31 = vld [vmem:[%s6660_s5 + $0x18] sm:$0xff]  }
 0x91d   : > { %4892 = vmatpush3.bf16.msra.mxu1 %v1236_v33  ;;  %4893 = vmatprep.mubr.msk.bf16.mxu1 %vm5573_vm2, %v5572_v32 }
 0x91e   : > { %4925 = vmatprep.subr.bf16.mxu1 %v5572_v32 }
 0x9ef   : > { %v1223_v45 = vpop.f32.mrb[16].mxu1 }
 0x9f0   : > { %v1229_v34 = vpack.c.bf16 %v1223_v45, %v1223_v45  ;;  %v4889_v35 = vpop.f32.mrb[17].mxu1 }
 0x9f1   : > { %v1226_v36 = vpop.f32.mrb[18].mxu1 }
 0x9f2   : > { %v4890_v37 = vpop.f32.mrb[19].mxu1  ;;  %4894 = vmatmul.mubr.msk.bf16.vlgmr.msra.gmra.mrb[8].mxu1 %vm642_vm3, %v1229_v34  ;;  %v4467_v36 = vld [vmem:[%s6658_s3 + $0x1] ss:$0 sm:$0xff] }
 0x9f3   : > { %4929 = vmatprep.mubr.msk.bf16.mxu1 %vm5573_vm2, %v5572_v32  ;;  %4926 = vmatpush3.bf16.msra.mxu1 %v5375_v30 }
 0x9f4   : > { %4927 = vmatprep.subr.bf16.mxu1 %v5572_v32 }
 0x9f7   : > { %4928 = vmatpush3.bf16.msra.mxu1 %v5376_v31 }
 0x9f8   : > { %4933 = vmatprep.subr.bf16.mxu1 %v5572_v32 }
 0xac5   : > { %v1272_v40 = vpop.f32.mrb[8].mxu1 }
 0xac6   : > { %v5936_v41 = vadd.f32 %v1272_v40, %v638_v39  ;;  %v4895_v42 = vpop.f32.mrb[9].mxu1 }
 0xac7   : > { %v1275_v43 = vpop.f32.mrb[10].mxu1 }
 0xac8   : > { %v4896_v44 = vpop.f32.mrb[11].mxu1  ;;  %v1281_v46 = vsel %vm547_vm1, %v5936_v41, 0.0 }
 0xac9   : > { %1282 = vadd.xlane.f32.xlu0 %v1281_v46 }
 0xb56   : > { %v1283_v47 = vpop.xlane.xlu0 %1282 }
 0xb57   : > { %v1284_v48 = vmul.f32 0.03125, %v1283_v47 }
 0xb59   : > { %v1285_v49 = vsub.f32 %v5936_v41, %v1284_v48 }
 0xb5b   : > { %v1286_v50 = vmul.f32 %v1285_v49, %v1285_v49 }
 0xb5d   : > { %v1287_v51 = vsel %vm547_vm1, %v1286_v50, 0.0 }
 0xb5e   : > { %1288 = vadd.xlane.f32.xlu1 %v1287_v51 }
 0xbeb   : > { %v1289_v53 = vpop.xlane.xlu1 %1288 }
 0xbec   : > { %v1290_v54 = vmul.f32 0.03125, %v1289_v53 }
 0xbee   : > { %v1291_v55 = vadd.f32 1e-05, %v1290_v54 }
 0xbf0   : > { %5431 = vrsqrt.f32 %v1291_v55 }
 0xbfa   : > { %v5432_v56 = vpop.eup %5431 }
 0xbfb   : > { %v1293_v59 = vmul.f32 %v5432_v56, %v1285_v49 }
 0xbfd   : > { %v1298_v61 = vmul.f32 %v4452_v58, %v1293_v59 }
 0xbff   : > { %v1303_v62 = vadd.f32 %v4453_v60, %v1298_v61 }
 0xc01   : > { %v1304_v0 = vpack.c.bf16 %v1303_v62, %v1303_v62 }
 0xc03   : > { %4902 = vmatmul.mubr.msk.bf16.vlgmr.msra.gmra.mrb[20].mxu0 %vm547_vm1, %v1304_v0 }
 0xc04   : > { %4906 = vmatpush3.bf16.msra.mxu0 %v5367_v63  ;;  %4921 = vmatprep.mubr.msk.bf16.mxu0 %vm5573_vm2, %v5572_v32 }
 0xc05   : > { %4907 = vmatprep.subr.bf16.mxu0 %v5572_v32 }
 0xc08   : > { %4908 = vmatpush3.bf16.msra.mxu0 %v5368_v1 }
 0xc09   : > { %4909 = vmatprep.subr.bf16.mxu0 %v5572_v32 }
 0xc0c   : > { %4910 = vmatpush3.bf16.msra.mxu0 %v5369_v2 }
 0xc0d   : > { %4911 = vmatprep.subr.bf16.mxu0 %v5572_v32 }
 0xc10   : > { %4912 = vmatpush3.bf16.msra.mxu0 %v5370_v3 }
 0xc11   : > { %4913 = vmatprep.subr.bf16.mxu0 %v5572_v32 }
 0xc14   : > { %4914 = vmatpush3.bf16.msra.mxu0 %v5371_v4 }
 0xc15   : > { %4915 = vmatprep.subr.bf16.mxu0 %v5572_v32 }
 0xc18   : > { %4916 = vmatpush3.bf16.msra.mxu0 %v5372_v5 }
 0xc19   : > { %4917 = vmatprep.subr.bf16.mxu0 %v5572_v32 }
 0xc1c   : > { %4918 = vmatpush3.bf16.msra.mxu0 %v5373_v6 }
 0xc1d   : > { %4919 = vmatprep.subr.bf16.mxu0 %v5572_v32 }
 0xc20   : > { %4920 = vmatpush3.bf16.msra.mxu0 %v5374_v7 }
 0xc21   : > { %4951 = vmatprep.subr.bf16.mxu0 %v5572_v32 }
 0xcd6   : > { %v1363_v9 = vpop.f32.mrb[20].mxu0 }
 0xcd7   : > { %v1364_v10 = vadd.f32 %v4454_v8, %v1363_v9  ;;  %v4903_v11 = vpop.f32.mrb[21].mxu0 }
 0xcd8   : > { %v1366_v12 = vpop.f32.mrb[22].mxu0 }
 0xcd9   : > { %v1369_v13 = vmax.f32 %v1364_v10, 0.0  ;;  %v4904_v14 = vpop.f32.mrb[23].mxu0 }
 0xcdb   : > { %v1370_v15 = vpack.c.bf16 %v1369_v13, %v1369_v13 }
 0xcdd   : > { %4922 = vmatmul.mubr.bf16.vlgmr.msra.gmra.mrb[24].mxu0 %v1370_v15 }
 0xcde   : > { %4953 = vmatprep.mubr.msk.bf16.mxu0 %vm5573_vm2, %v5572_v32 }
 0xdb0   : > { %v1474_v17 = vpop.f32.mrb[24].mxu0 }
 0xdb1   : > { %v1475_v18 = vadd.f32 %v4458_v16, %v1474_v17  ;;  %v4923_v19 = vpop.f32.mrb[25].mxu0 }
 0xdb2   : > { %v1477_v20 = vpop.f32.mrb[26].mxu0 }
 0xdb3   : > { %v6000_v21 = vadd.f32 %v5936_v41, %v1475_v18  ;;  %v4924_v22 = vpop.f32.mrb[27].mxu0 }
 0xdb5   : > { %v1483_v23 = vsel %vm547_vm1, %v6000_v21, 0.0 }
 0xdb6   : > { %1484 = vadd.xlane.f32.xlu0 %v1483_v23 }
 0xe43   : > { %v1485_v25 = vpop.xlane.xlu0 %1484 }
 0xe44   : > { %v1486_v26 = vmul.f32 0.03125, %v1485_v25 }
 0xe46   : > { %v1487_v27 = vsub.f32 %v6000_v21, %v1486_v26 }
 0xe48   : > { %v1488_v28 = vmul.f32 %v1487_v27, %v1487_v27 }
 0xe4a   : > { %v1489_v29 = vsel %vm547_vm1, %v1488_v28, 0.0 }
 0xe4b   : > { %1490 = vadd.xlane.f32.xlu0 %v1489_v29 }
 0xed8   : > { %v1491_v33 = vpop.xlane.xlu0 %1490 }
 0xed9   : > { %v1492_v45 = vmul.f32 0.03125, %v1491_v33 }
 0xedb   : > { %v1493_v34 = vadd.f32 1e-05, %v1492_v45 }
 0xedd   : > { %5433 = vrsqrt.f32 %v1493_v34 }
 0xee7   : > { %v5434_v35 = vpop.eup %5433 }
 0xee8   : > { %v1495_v37 = vmul.f32 %v5434_v35, %v1487_v27 }
 0xeea   : > { %v1500_v39 = vmul.f32 %v4467_v36, %v1495_v37 }
 0xeec   : > { %v1505_v40 = vadd.f32 %v4468_v38, %v1500_v39 }
 0xeee   : > { %v1506_v41 = vpack.c.bf16 %v1505_v40, %v1505_v40 }
 0xef0   : > { %4930 = vmatmul.mubr.msk.bf16.vlgmr.msra.gmra.mrb[20].mxu1 %vm547_vm1, %v1506_v41 }
 0xef1   : > { %4935 = vmatprep.mubr.msk.bf16.mxu1 %vm5573_vm2, %v5572_v32 }
 0xfc3   : > { %v1561_v42 = vpop.f32.mrb[20].mxu1 }
 0xfc4   : > { %v6023_v43 = vpack.c.bf16 %v1561_v42, %v1561_v42  ;;  %v4931_v44 = vpop.f32.mrb[21].mxu1  ;;  %v4479_v42 = vld [vmem:[%s6661_s6 + $0x10] sm:$0xf] }
 0xfc5   : > { %v1564_v46 = vpop.f32.mrb[22].mxu1  ;;  %v1690_v44 = vsel %vm706_vm4, %v4479_v42, 0 }
 0xfc6   : > { %1735 = vrot.lane.b32.xlu1 %v6023_v43, %s5578_s27  ;;  %1575 = vrot.lane.b32.xlu0 %v6023_v43, %s5575_s14  ;;  %v4932_v47 = vpop.f32.mrb[23].mxu1 }
 0xfca   : > { %1893 = vrot.lane.b32.xlu1 %v6023_v43, %s5580_s30  ;;  %1733 = vrot.lane.b32.xlu0 %v6023_v43, %s5579_s23 }
 0xfce   : > { %1895 = vrot.lane.b32.xlu0 %v6023_v43, %s5577_s9 }
0x1038   : > { %v1736_v48 = vpop.permute.xlu1 %1735  ;;  %v1576_v49 = vpop.permute.xlu0 %1575 }
0x1039   : > { %v1741_v50 = vsel %vm642_vm3, %v1736_v48, 0  ;;  %v1581_v51 = vsel %vm642_vm3, %v1576_v49, 0 }
0x103a   : > { %4934 = vmatpush3.bf16.xpose.msra.mxu1 %v1581_v51  ;;  %4952 = vmatpush3.bf16.xpose.msra.mxu0 %v1741_v50 }
0x103b   : > { %4969 = vmatprep.subr.bf16.mxu0 %v5572_v32  ;;  %4939 = vmatprep.subr.bf16.mxu1 %v5572_v32 }
0x103c   : > { %v1734_v24 = vpop.permute.xlu0 %1733  ;;  %v1894_v54 = vpop.permute.xlu1 %1893 }
0x1040   : > { %v1896_v52 = vpop.permute.xlu0 %1895 }
0x1041   : > { %v1901_v53 = vsel %vm642_vm3, %v1896_v52, 0  ;;  %4936 = vmatmul.mubr.msk.bf16.vlgmr.msra.gmra.mrb[24].mxu1 %vm642_vm3, %v6023_v43  ;;  %4954 = vmatmul.mubr.msk.bf16.vlgmr.msra.gmra.mrb[28].mxu0 %vm642_vm3, %v1734_v24 }
0x1042   : > { %4970 = vmatpush3.bf16.xpose.msra.mxu0 %v1901_v53  ;;  %4971 = vmatprep.mubr.msk.bf16.mxu0 %vm5573_vm2, %v5572_v32 }
0x1043   : > { %4975 = vmatprep.subr.bf16.mxu0 %v5572_v32  ;;  %4941 = vmatprep.mubr.msk.bf16.mxu1 %vm5573_vm2, %v5572_v32 }
0x1049   : > { %4972 = vmatmul.mubr.msk.bf16.vlgmr.msra.gmra.mrb[32].mxu0 %vm642_vm3, %v1894_v54 }
0x104a   : > { %4977 = vmatprep.mubr.msk.bf16.mxu0 %vm5573_vm2, %v5572_v32 }
0x1114   : > { %v1617_v55 = vpop.f32.mrb[24].mxu1  ;;  %v1777_v56 = vpop.f32.mrb[28].mxu0 }
0x1115   : > { %v1618_v58 = vadd.f32 %v1617_v55, %v5835_v57  ;;  %v4937_v59 = vpop.f32.mrb[25].mxu1  ;;  %v4955_v60 = vpop.f32.mrb[29].mxu0  ;;  %v1778_v18 = vadd.f32 %v1777_v56, %v5835_v57 }
0x1116   : > { %v1620_v61 = vpop.f32.mrb[26].mxu1  ;;  %v1780_v62 = vpop.f32.mrb[30].mxu0 }
0x1117   : > { %v4938_v63 = vpop.f32.mrb[27].mxu1  ;;  %v4956_v0 = vpop.f32.mrb[31].mxu0  ;;  %v1623_v1 = vsel %vm642_vm3, %v1618_v58, -inf  ;;  %v1783_v19 = vsel %vm642_vm3, %v1778_v18, -inf }
0x1118   : > { %1624 = vmax.xlane.f32.xlu0 %v1623_v1 }
0x111c   : > { %v1937_v2 = vpop.f32.mrb[32].mxu0 }
0x111d   : > { %v1938_v3 = vadd.f32 %v1937_v2, %v5835_v57  ;;  %v4973_v4 = vpop.f32.mrb[33].mxu0 }
0x111e   : > { %v1940_v5 = vpop.f32.mrb[34].mxu0 }
0x111f   : > { %v4974_v6 = vpop.f32.mrb[35].mxu0  ;;  %v1943_v7 = vsel %vm642_vm3, %v1938_v3, -inf }
0x1120   : > { %1944 = vmax.xlane.f32.xlu1 %v1943_v7 }
0x11a5   : > { %v1625_v8 = vpop.xlane.xlu0 %1624 }
0x11a6   : > { %v1626_v9 = vsub.f32 %v1618_v58, %v1625_v8 }
0x11a8   : > { %v1627_v10 = vmul.f32 1.442695, %v1626_v9 }
0x11aa   : > { %5435 = vpow2.f32 %v1627_v10  ;;  %v4487_v10 = vld [vmem:[%s6661_s6 + $0x18] sm:$0xf] }
0x11ad   : > { %v1945_v11 = vpop.xlane.xlu1 %1944 }
0x11ae   : > { %v1946_v12 = vsub.f32 %v1938_v3, %v1945_v11  ;;  %v4483_v3 = vld [vmem:[%s6661_s6 + $0x14] sm:$0xf] }
0x11af   : > { %v1850_v4 = vsel %vm706_vm4, %v4483_v3, 0 }
0x11b0   : > { %v1947_v13 = vmul.f32 1.442695, %v1946_v12 }
0x11b2   : > { %5437 = vpow2.f32 %v1947_v13 }
0x11b4   : > { %v5436_v14 = vpop.eup %5435 }
0x11b5   : > { %v1629_v15 = vsel %vm642_vm3, %v5436_v14, 0.0 }
0x11b6   : > { %1630 = vadd.xlane.f32.xlu0 %v1629_v15 }
0x11bc   : > { %v5438_v16 = vpop.eup %5437 }
0x11bd   : > { %v1949_v17 = vsel %vm642_vm3, %v5438_v16, 0.0 }
0x11be   : > { %1950 = vadd.xlane.f32.xlu1 %v1949_v17 }
0x11cc   : > { %1635 = vrot.lane.b32.xlu0 %v6023_v43, %s6694_s21 }
0x11cf   : > { %1955 = vrot.lane.b32.xlu1 %v6023_v43, %s6693_s24 }
0x11d0   : > { %2055 = vrot.lane.b32.xlu0 %v6023_v43, %s6691_s13 }
0x11d3   : > { %2053 = vrot.lane.b32.xlu1 %v6023_v43, %s6689_s25 }
0x11ef   : > { %1784 = vmax.xlane.f32.xlu0 %v1783_v19 }
0x1205   : > { %1795 = vrot.lane.b32.xlu0 %v6023_v43, %s6715_s20 }
0x1243   : > { %v1631_v20 = vpop.xlane.xlu0 %1630 }
0x1244   : > { %5439 = vrcp.f32 %v1631_v20 }
0x1247   : > { %v1636_v22 = vpop.permute.xlu0 %1635 }
0x1248   : > { %v1641_v23 = vsel %vm706_vm4, %v1636_v22, 0  ;;  %v4491_v22 = vld [vmem:[%s6661_s6 + $0x1c] sm:$0xf] }
0x1249   : > { %4940 = vmatpush3.bf16.msra.mxu1 %v1641_v23 }
0x124a   : > { %4945 = vmatprep.subr.bf16.mxu1 %v5572_v32 }
0x124b   : > { %v1951_v25 = vpop.xlane.xlu1 %1950  ;;  %v2056_v45 = vpop.permute.xlu0 %2055 }
0x124c   : > { %5441 = vrcp.f32 %v1951_v25  ;;  %v2061_v35 = vsel %vm642_vm3, %v2056_v45, 0 }
0x124e   : > { %v5440_v26 = vpop.eup %5439 }
0x124f   : > { %v1633_v27 = vmul.f32 %v5440_v26, %v5436_v14  ;;  %v1956_v28 = vpop.permute.xlu1 %1955  ;;  %v2010_v14 = vsel %vm706_vm4, %v4487_v10, 0  ;;  %v2170_v26 = vsel %vm706_vm4, %v4491_v22, 0  ;;  %v4519_v10 = vld [vmem:[%s6714_s0 + $0x1] ss:$0 sm:$0xff] }
0x1250   : > { %v1961_v29 = vsel %vm706_vm4, %v1956_v28, 0 }
0x1251   : > { %4976 = vmatpush3.bf16.msra.mxu0 %v1961_v29  ;;  %v1634_v30 = vpack.c.bf16 %v1633_v27, %v1633_v27 }
0x1252   : > { %4987 = vmatprep.subr.bf16.mxu0 %v5572_v32 }
0x1253   : > { %4942 = vmatmul.mubr.msk.bf16.vlgmr.msra.gmra.mrb[28].mxu1 %vm642_vm3, %v1634_v30  ;;  %v2054_v36 = vpop.permute.xlu1 %2053 }
0x1254   : > { %4947 = vmatprep.mubr.msk.bf16.mxu1 %vm5573_vm2, %v5572_v32  ;;  %4946 = vmatpush3.bf16.msra.mxu1 %v1690_v44 }
0x1255   : > { %4957 = vmatprep.subr.bf16.mxu1 %v5572_v32 }
0x1256   : > { %v5442_v31 = vpop.eup %5441 }
0x1257   : > { %v1953_v33 = vmul.f32 %v5442_v31, %v5438_v16 }
0x1259   : > { %v1954_v34 = vpack.c.bf16 %v1953_v33, %v1953_v33  ;;  %v4476_v33 = vld [vmem:[%s6662_s7 + $0x1] ss:$0 sm:$0xff] }
0x125a   : > { %v1573_v45 = vadd.f32 %v4476_v33, %v6000_v21  ;;  %v5377_v21 = vld [vmem:[%s6665_s10 + $0x10] sm:$0xff]   ;;  %v4529_v33 = vld [vmem:[%s6659_s4 + $0x2] ss:$0 sm:$0xff] }
0x125b   : > { %4978 = vmatmul.mubr.msk.bf16.vlgmr.msra.gmra.mrb[36].mxu0 %vm642_vm3, %v1954_v34 }
0x125c   : > { %4988 = vmatpush3.bf16.xpose.msra.mxu0 %v2061_v35  ;;  %4989 = vmatprep.mubr.msk.bf16.mxu0 %vm5573_vm2, %v5572_v32 }
0x125d   : > { %5005 = vmatprep.subr.bf16.mxu0 %v5572_v32 }
0x1263   : > { %4990 = vmatmul.mubr.msk.bf16.vlgmr.msra.gmra.mrb[40].mxu0 %vm642_vm3, %v2054_v36 }
0x1264   : > { %5009 = vmatprep.mubr.msk.bf16.mxu0 %vm5573_vm2, %v5572_v32  ;;  %5006 = vmatpush3.bf16.msra.mxu0 %v5377_v21 }
0x1265   : > { %5007 = vmatprep.subr.bf16.mxu0 %v5572_v32 }
0x127c   : > { %v1785_v37 = vpop.xlane.xlu0 %1784 }
0x127d   : > { %v1786_v38 = vsub.f32 %v1778_v18, %v1785_v37 }
0x127f   : > { %v1787_v39 = vmul.f32 1.442695, %v1786_v38 }
0x1280   : > { %v1796_v47 = vpop.permute.xlu0 %1795 }
0x1281   : > { %5443 = vpow2.f32 %v1787_v39  ;;  %v1801_v52 = vsel %vm706_vm4, %v1796_v47, 0  ;;  %v5378_v47 = vld [vmem:[%s6665_s10 + $0x18] sm:$0xff]  }
0x1282   : > { %5008 = vmatpush3.bf16.msra.mxu0 %v5378_v47 }
0x1283   : > { %5013 = vmatprep.subr.bf16.mxu0 %v5572_v32 }
0x128b   : > { %v5444_v40 = vpop.eup %5443 }
0x128c   : > { %v1789_v41 = vsel %vm642_vm3, %v5444_v40, 0.0 }
0x128d   : > { %1790 = vadd.xlane.f32.xlu1 %v1789_v41 }
0x131a   : > { %v1791_v46 = vpop.xlane.xlu1 %1790 }
0x131b   : > { %5445 = vrcp.f32 %v1791_v46 }
0x1325   : > { %v5446_v51 = vpop.eup %5445 }
0x1326   : > { %v1677_v48 = vpop.f32.mrb[28].mxu1  ;;  %v1793_v54 = vmul.f32 %v5446_v51, %v5444_v40 }
0x1327   : > { %v1683_v49 = vpack.c.bf16 %v1677_v48, %v1677_v48  ;;  %v4943_v50 = vpop.f32.mrb[29].mxu1 }
0x1328   : > { %v1680_v24 = vpop.f32.mrb[30].mxu1  ;;  %v1794_v58 = vpack.c.bf16 %v1793_v54, %v1793_v54 }
0x1329   : > { %v4944_v53 = vpop.f32.mrb[31].mxu1  ;;  %4948 = vmatmul.mubr.msk.bf16.vlgmr.msra.gmra.mrb[32].mxu1 %vm642_vm3, %v1683_v49  ;;  %v4493_v24 = vld [vmem:[%s6663_s8 + $0x1] ss:$0 sm:$0xff] }
0x132a   : > { %4958 = vmatpush3.bf16.msra.mxu1 %v1801_v52  ;;  %4959 = vmatprep.mubr.msk.bf16.mxu1 %vm5573_vm2, %v5572_v32  ;;  %v4494_v53 = vld [vmem:[%s6713_s17 + $0x1] ss:$0 sm:$0xff] }
0x132b   : > { %4963 = vmatprep.subr.bf16.mxu1 %v5572_v32 }
0x132e   : > { %v1997_v55 = vpop.f32.mrb[36].mxu0 }
0x132f   : > { %v4979_v56 = vpop.f32.mrb[37].mxu0 }
0x1330   : > { %v2000_v59 = vpop.f32.mrb[38].mxu0  ;;  %v5379_v56 = vld [vmem:[%s6667_s12 + $0x40] sm:$0xff]  }
0x1331   : > { %4960 = vmatmul.mubr.msk.bf16.vlgmr.msra.gmra.mrb[36].mxu1 %vm642_vm3, %v1794_v58  ;;  %v4980_v60 = vpop.f32.mrb[39].mxu0  ;;  %v5380_v59 = vld [vmem:[%s6667_s12 + $0x48] sm:$0xff]  }
0x1332   : > { %4965 = vmatprep.mubr.msk.bf16.mxu1 %vm5573_vm2, %v5572_v32  ;;  %4964 = vmatpush3.bf16.msra.mxu1 %v1850_v4  ;;  %v5381_v60 = vld [vmem:[%s6667_s12 + $0x50] sm:$0xff]  }
0x1333   : > { %4981 = vmatprep.subr.bf16.mxu1 %v5572_v32 }
0x1336   : > { %v2097_v61 = vpop.f32.mrb[40].mxu0 }
0x1337   : > { %v2098_v62 = vadd.f32 %v2097_v61, %v5835_v57  ;;  %v4991_v63 = vpop.f32.mrb[41].mxu0  ;;  %v5382_v61 = vld [vmem:[%s6667_s12 + $0x58] sm:$0xff]  }
0x1338   : > { %v2100_v0 = vpop.f32.mrb[42].mxu0  ;;  %v5384_v63 = vld [vmem:[%s6667_s12 + $0x68] sm:$0xff]  }
0x1339   : > { %v4992_v1 = vpop.f32.mrb[43].mxu0  ;;  %v2103_v2 = vsel %vm642_vm3, %v2098_v62, -inf  ;;  %v5385_v0 = vld [vmem:[%s6667_s12 + $0x70] sm:$0xff]  }
0x133a   : > { %2104 = vmax.xlane.f32.xlu1 %v2103_v2  ;;  %v5386_v1 = vld [vmem:[%s6667_s12 + $0x78] sm:$0xff]   ;;  %v4499_v2 = vld [vmem:[%s6666_s11 + $0x1] ss:$0 sm:$0xff] }
0x13c7   : > { %v2105_v5 = vpop.xlane.xlu1 %2104 }
0x13c8   : > { %v2106_v6 = vsub.f32 %v2098_v62, %v2105_v5  ;;  %v5383_v62 = vld [vmem:[%s6667_s12 + $0x60] sm:$0xff]  }
0x13ca   : > { %v2107_v7 = vmul.f32 1.442695, %v2106_v6 }
0x13cc   : > { %5447 = vpow2.f32 %v2107_v7 }
0x13d6   : > { %v5448_v8 = vpop.eup %5447 }
0x13d7   : > { %v2109_v9 = vsel %vm642_vm3, %v5448_v8, 0.0 }
0x13d8   : > { %2110 = vadd.xlane.f32.xlu1 %v2109_v9 }
0x13e9   : > { %2115 = vrot.lane.b32.xlu1 %v6023_v43, %s6716_s18  ;;  %v2003_v43 = vpack.c.bf16 %v1997_v55, %v1997_v55 }
0x1404   : > { %v1837_v11 = vpop.f32.mrb[36].mxu1 }
0x1405   : > { %v1843_v12 = vpack.c.bf16 %v1837_v11, %v1837_v11  ;;  %v4961_v13 = vpop.f32.mrb[37].mxu1 }
0x1406   : > { %v1840_v15 = vpop.f32.mrb[38].mxu1 }
0x1407   : > { %v4962_v16 = vpop.f32.mrb[39].mxu1  ;;  %4966 = vmatmul.mubr.msk.bf16.vlgmr.msra.gmra.mrb[32].mxu1 %vm642_vm3, %v1843_v12 }
0x1408   : > { %4982 = vmatpush3.bf16.msra.mxu1 %v2010_v14  ;;  %4983 = vmatprep.mubr.msk.bf16.mxu1 %vm5573_vm2, %v5572_v32 }
0x1409   : > { %4993 = vmatprep.subr.bf16.mxu1 %v5572_v32 }
0x1413   : > { %4984 = vmatmul.mubr.msk.bf16.vlgmr.msra.gmra.mrb[32].mxu1 %vm642_vm3, %v2003_v43 }
0x1414   : > { %4995 = vmatprep.mubr.msk.bf16.mxu1 %vm5573_vm2, %v5572_v32 }
0x1465   : > { %v2111_v17 = vpop.xlane.xlu1 %2110 }
0x1466   : > { %5449 = vrcp.f32 %v2111_v17 }
0x1469   : > { %v2116_v18 = vpop.permute.xlu1 %2115 }
0x146a   : > { %v2121_v19 = vsel %vm706_vm4, %v2116_v18, 0 }
0x146b   : > { %4994 = vmatpush3.bf16.msra.mxu1 %v2121_v19 }
0x146c   : > { %4999 = vmatprep.subr.bf16.mxu1 %v5572_v32 }
0x1470   : > { %v5450_v20 = vpop.eup %5449 }
0x1471   : > { %v2113_v23 = vmul.f32 %v5450_v20, %v5448_v8 }
0x1473   : > { %v2114_v25 = vpack.c.bf16 %v2113_v23, %v2113_v23  ;;  %v5387_v23 = vld [vmem:[%s6660_s5 + $0x20] sm:$0xff]  }
0x1475   : > { %4996 = vmatmul.mubr.msk.bf16.vlgmr.msra.gmra.mrb[40].mxu1 %vm642_vm3, %v2114_v25  ;;  %v5388_v25 = vld [vmem:[%s6660_s5 + $0x28] sm:$0xff]  }
0x1476   : > { %5000 = vmatpush3.bf16.msra.mxu1 %v2170_v26  ;;  %5001 = vmatprep.mubr.msk.bf16.mxu1 %vm5573_vm2, %v5572_v32 }
0x1477   : > { %5033 = vmatprep.subr.bf16.mxu1 %v5572_v32 }
0x1548   : > { %v2157_v27 = vpop.f32.mrb[40].mxu1 }
0x1549   : > { %v2163_v28 = vpack.c.bf16 %v2157_v27, %v2157_v27  ;;  %v4997_v29 = vpop.f32.mrb[41].mxu1 }
0x154a   : > { %v2160_v30 = vpop.f32.mrb[42].mxu1 }
0x154b   : > { %v4998_v31 = vpop.f32.mrb[43].mxu1  ;;  %5002 = vmatmul.mubr.msk.bf16.vlgmr.msra.gmra.mrb[32].mxu1 %vm642_vm3, %v2163_v28  ;;  %v4528_v30 = vld [vmem:[%s6658_s3 + $0x2] ss:$0 sm:$0xff] }
0x154c   : > { %5037 = vmatprep.mubr.msk.bf16.mxu1 %vm5573_vm2, %v5572_v32  ;;  %5034 = vmatpush3.bf16.msra.mxu1 %v5387_v23 }
0x154d   : > { %5035 = vmatprep.subr.bf16.mxu1 %v5572_v32 }
0x1550   : > { %5036 = vmatpush3.bf16.msra.mxu1 %v5388_v25 }
0x1551   : > { %5041 = vmatprep.subr.bf16.mxu1 %v5572_v32 }
0x161e   : > { %v2206_v34 = vpop.f32.mrb[32].mxu1 }
0x161f   : > { %v6136_v35 = vadd.f32 %v2206_v34, %v1573_v45  ;;  %v5003_v36 = vpop.f32.mrb[33].mxu1 }
0x1620   : > { %v2209_v37 = vpop.f32.mrb[34].mxu1 }
0x1621   : > { %v5004_v38 = vpop.f32.mrb[35].mxu1  ;;  %v2215_v39 = vsel %vm547_vm1, %v6136_v35, 0.0 }
0x1622   : > { %2216 = vadd.xlane.f32.xlu0 %v2215_v39 }
0x16af   : > { %v2217_v40 = vpop.xlane.xlu0 %2216 }
0x16b0   : > { %v2218_v41 = vmul.f32 0.03125, %v2217_v40 }
0x16b2   : > { %v2219_v42 = vsub.f32 %v6136_v35, %v2218_v41 }
0x16b4   : > { %v2220_v44 = vmul.f32 %v2219_v42, %v2219_v42 }
0x16b6   : > { %v2221_v46 = vsel %vm547_vm1, %v2220_v44, 0.0 }
0x16b7   : > { %2222 = vadd.xlane.f32.xlu1 %v2221_v46 }
0x1744   : > { %v2223_v48 = vpop.xlane.xlu1 %2222 }
0x1745   : > { %v2224_v49 = vmul.f32 0.03125, %v2223_v48 }
0x1747   : > { %v2225_v50 = vadd.f32 1e-05, %v2224_v49 }
0x1749   : > { %5451 = vrsqrt.f32 %v2225_v50 }
0x1753   : > { %v5452_v51 = vpop.eup %5451 }
0x1754   : > { %v2227_v52 = vmul.f32 %v5452_v51, %v2219_v42 }
0x1756   : > { %v2232_v54 = vmul.f32 %v4493_v24, %v2227_v52 }
0x1758   : > { %v2237_v55 = vadd.f32 %v4494_v53, %v2232_v54 }
0x175a   : > { %v2238_v58 = vpack.c.bf16 %v2237_v55, %v2237_v55 }
0x175c   : > { %5010 = vmatmul.mubr.msk.bf16.vlgmr.msra.gmra.mrb[44].mxu0 %vm547_vm1, %v2238_v58 }
0x175d   : > { %5014 = vmatpush3.bf16.msra.mxu0 %v5379_v56  ;;  %5029 = vmatprep.mubr.msk.bf16.mxu0 %vm5573_vm2, %v5572_v32 }
0x175e   : > { %5015 = vmatprep.subr.bf16.mxu0 %v5572_v32 }
0x1761   : > { %5016 = vmatpush3.bf16.msra.mxu0 %v5380_v59 }
0x1762   : > { %5017 = vmatprep.subr.bf16.mxu0 %v5572_v32 }
0x1765   : > { %5018 = vmatpush3.bf16.msra.mxu0 %v5381_v60 }
0x1766   : > { %5019 = vmatprep.subr.bf16.mxu0 %v5572_v32 }
0x1769   : > { %5020 = vmatpush3.bf16.msra.mxu0 %v5382_v61 }
0x176a   : > { %5021 = vmatprep.subr.bf16.mxu0 %v5572_v32 }
0x176d   : > { %5022 = vmatpush3.bf16.msra.mxu0 %v5383_v62 }
0x176e   : > { %5023 = vmatprep.subr.bf16.mxu0 %v5572_v32 }
0x1771   : > { %5024 = vmatpush3.bf16.msra.mxu0 %v5384_v63 }
0x1772   : > { %5025 = vmatprep.subr.bf16.mxu0 %v5572_v32 }
0x1775   : > { %5026 = vmatpush3.bf16.msra.mxu0 %v5385_v0 }
0x1776   : > { %5027 = vmatprep.subr.bf16.mxu0 %v5572_v32 }
0x1779   : > { %5028 = vmatpush3.bf16.msra.mxu0 %v5386_v1 }
0x177a   : > { %5059 = vmatprep.subr.bf16.mxu0 %v5572_v32 }
0x182f   : > { %v2298_v3 = vpop.f32.mrb[44].mxu0 }
0x1830   : > { %v2299_v4 = vadd.f32 %v4499_v2, %v2298_v3  ;;  %v5011_v5 = vpop.f32.mrb[45].mxu0 }
0x1831   : > { %v2301_v6 = vpop.f32.mrb[46].mxu0 }
0x1832   : > { %v2304_v7 = vmax.f32 %v2299_v4, 0.0  ;;  %v5012_v8 = vpop.f32.mrb[47].mxu0 }
0x1834   : > { %v2305_v9 = vpack.c.bf16 %v2304_v7, %v2304_v7 }
0x1836   : > { %5030 = vmatmul.mubr.bf16.vlgmr.msra.gmra.mrb[48].mxu0 %v2305_v9 }
0x1837   : > { %5061 = vmatprep.mubr.msk.bf16.mxu0 %vm5573_vm2, %v5572_v32 }
0x1909   : > { %v2410_v11 = vpop.f32.mrb[48].mxu0 }
0x190a   : > { %v2411_v12 = vadd.f32 %v4519_v10, %v2410_v11  ;;  %v5031_v13 = vpop.f32.mrb[49].mxu0 }
0x190b   : > { %v2413_v14 = vpop.f32.mrb[50].mxu0 }
0x190c   : > { %v6200_v15 = vadd.f32 %v6136_v35, %v2411_v12  ;;  %v5032_v16 = vpop.f32.mrb[51].mxu0 }
0x190e   : > { %v2419_v43 = vsel %vm547_vm1, %v6200_v15, 0.0 }
0x190f   : > { %2420 = vadd.xlane.f32.xlu0 %v2419_v43 }
0x199c   : > { %v2421_v17 = vpop.xlane.xlu0 %2420 }
0x199d   : > { %v2422_v18 = vmul.f32 0.03125, %v2421_v17 }
0x199f   : > { %v2423_v19 = vsub.f32 %v6200_v15, %v2422_v18 }
0x19a1   : > { %v2424_v20 = vmul.f32 %v2423_v19, %v2423_v19 }
0x19a3   : > { %v2425_v22 = vsel %vm547_vm1, %v2424_v20, 0.0 }
0x19a4   : > { %2426 = vadd.xlane.f32.xlu0 %v2425_v22 }
0x1a31   : > { %v2427_v26 = vpop.xlane.xlu0 %2426 }
0x1a32   : > { %v2428_v27 = vmul.f32 0.03125, %v2427_v26 }
0x1a34   : > { %v2429_v28 = vadd.f32 1e-05, %v2428_v27 }
0x1a36   : > { %5453 = vrsqrt.f32 %v2429_v28 }
0x1a40   : > { %v5454_v29 = vpop.eup %5453 }
0x1a41   : > { %v2431_v31 = vmul.f32 %v5454_v29, %v2423_v19 }
0x1a43   : > { %v2436_v45 = vmul.f32 %v4528_v30, %v2431_v31 }
0x1a45   : > { %v2441_v34 = vadd.f32 %v4529_v33, %v2436_v45 }
0x1a47   : > { %v2442_v35 = vpack.c.bf16 %v2441_v34, %v2441_v34 }
0x1a49   : > { %5038 = vmatmul.mubr.msk.bf16.vlgmr.msra.gmra.mrb[44].mxu1 %vm547_vm1, %v2442_v35 }
0x1a4a   : > { %5043 = vmatprep.mubr.msk.bf16.mxu1 %vm5573_vm2, %v5572_v32 }
0x1b1c   : > { %v2497_v36 = vpop.f32.mrb[44].mxu1 }
0x1b1d   : > { %v6223_v37 = vpack.c.bf16 %v2497_v36, %v2497_v36  ;;  %v5039_v38 = vpop.f32.mrb[45].mxu1  ;;  %v4540_v36 = vld [vmem:[%s6661_s6 + $0x20] sm:$0xf] }
0x1b1e   : > { %v2500_v39 = vpop.f32.mrb[46].mxu1  ;;  %v2626_v38 = vsel %vm706_vm4, %v4540_v36, 0 }
0x1b1f   : > { %2671 = vrot.lane.b32.xlu1 %v6223_v37, %s5578_s27  ;;  %2511 = vrot.lane.b32.xlu0 %v6223_v37, %s5575_s14  ;;  %v5040_v40 = vpop.f32.mrb[47].mxu1 }
0x1b23   : > { %2831 = vrot.lane.b32.xlu1 %v6223_v37, %s5577_s9  ;;  %2669 = vrot.lane.b32.xlu0 %v6223_v37, %s5579_s23 }
0x1b27   : > { %2829 = vrot.lane.b32.xlu0 %v6223_v37, %s5580_s30 }
0x1b91   : > { %v2672_v41 = vpop.permute.xlu1 %2671  ;;  %v2512_v42 = vpop.permute.xlu0 %2511 }
0x1b92   : > { %v2677_v44 = vsel %vm642_vm3, %v2672_v41, 0  ;;  %v2517_v46 = vsel %vm642_vm3, %v2512_v42, 0 }
0x1b93   : > { %5042 = vmatpush3.bf16.xpose.msra.mxu1 %v2517_v46  ;;  %5060 = vmatpush3.bf16.xpose.msra.mxu0 %v2677_v44 }
0x1b94   : > { %5077 = vmatprep.subr.bf16.mxu0 %v5572_v32  ;;  %5047 = vmatprep.subr.bf16.mxu1 %v5572_v32 }
0x1b95   : > { %v2832_v21 = vpop.permute.xlu1 %2831  ;;  %v2670_v47 = vpop.permute.xlu0 %2669 }
0x1b96   : > { %v2837_v48 = vsel %vm642_vm3, %v2832_v21, 0 }
0x1b99   : > { %v2830_v49 = vpop.permute.xlu0 %2829 }
0x1b9a   : > { %5044 = vmatmul.mubr.msk.bf16.vlgmr.msra.gmra.mrb[48].mxu1 %vm642_vm3, %v6223_v37  ;;  %5062 = vmatmul.mubr.msk.bf16.vlgmr.msra.gmra.mrb[52].mxu0 %vm642_vm3, %v2670_v47 }
0x1b9b   : > { %5078 = vmatpush3.bf16.xpose.msra.mxu0 %v2837_v48  ;;  %5079 = vmatprep.mubr.msk.bf16.mxu0 %vm5573_vm2, %v5572_v32 }
0x1b9c   : > { %5083 = vmatprep.subr.bf16.mxu0 %v5572_v32  ;;  %5049 = vmatprep.mubr.msk.bf16.mxu1 %vm5573_vm2, %v5572_v32 }
0x1ba2   : > { %5080 = vmatmul.mubr.msk.bf16.vlgmr.msra.gmra.mrb[56].mxu0 %vm642_vm3, %v2830_v49 }
0x1ba3   : > { %5085 = vmatprep.mubr.msk.bf16.mxu0 %vm5573_vm2, %v5572_v32 }
0x1c6d   : > { %v2553_v50 = vpop.f32.mrb[48].mxu1  ;;  %v2713_v51 = vpop.f32.mrb[52].mxu0 }
0x1c6e   : > { %v2554_v24 = vadd.f32 %v2553_v50, %v5835_v57  ;;  %v5045_v52 = vpop.f32.mrb[49].mxu1  ;;  %v5063_v53 = vpop.f32.mrb[53].mxu0  ;;  %v2714_v14 = vadd.f32 %v2713_v51, %v5835_v57 }
0x1c6f   : > { %v2556_v54 = vpop.f32.mrb[50].mxu1  ;;  %v2716_v55 = vpop.f32.mrb[54].mxu0 }
0x1c70   : > { %v5046_v56 = vpop.f32.mrb[51].mxu1  ;;  %v5064_v58 = vpop.f32.mrb[55].mxu0  ;;  %v2559_v59 = vsel %vm642_vm3, %v2554_v24, -inf  ;;  %v2719_v16 = vsel %vm642_vm3, %v2714_v14, -inf }
0x1c71   : > { %2560 = vmax.xlane.f32.xlu1 %v2559_v59 }
0x1c75   : > { %v2873_v60 = vpop.f32.mrb[56].mxu0 }
0x1c76   : > { %v2874_v61 = vadd.f32 %v2873_v60, %v5835_v57  ;;  %v5081_v62 = vpop.f32.mrb[57].mxu0 }
0x1c77   : > { %v2876_v63 = vpop.f32.mrb[58].mxu0 }
0x1c78   : > { %v5082_v0 = vpop.f32.mrb[59].mxu0  ;;  %v2879_v1 = vsel %vm642_vm3, %v2874_v61, -inf }
0x1c79   : > { %2880 = vmax.xlane.f32.xlu0 %v2879_v1 }
0x1c82   : > { %2891 = vrot.lane.b32.xlu1 %v6223_v37, %s6693_s24 }
0x1cfe   : > { %v2561_v2 = vpop.xlane.xlu1 %2560 }
0x1cff   : > { %v2562_v3 = vsub.f32 %v2554_v24, %v2561_v2 }
0x1d01   : > { %v2563_v4 = vmul.f32 1.442695, %v2562_v3 }
0x1d02   : > { %v2892_v5 = vpop.permute.xlu1 %2891 }
0x1d03   : > { %5455 = vpow2.f32 %v2563_v4  ;;  %v2897_v6 = vsel %vm706_vm4, %v2892_v5, 0  ;;  %v4548_v4 = vld [vmem:[%s6661_s6 + $0x28] sm:$0xf] }
0x1d04   : > { %5084 = vmatpush3.bf16.msra.mxu0 %v2897_v6 }
0x1d05   : > { %5095 = vmatprep.subr.bf16.mxu0 %v5572_v32 }
0x1d06   : > { %v2881_v7 = vpop.xlane.xlu0 %2880 }
0x1d07   : > { %v2882_v8 = vsub.f32 %v2874_v61, %v2881_v7  ;;  %v4544_v61 = vld [vmem:[%s6661_s6 + $0x24] sm:$0xf] }
0x1d08   : > { %v2786_v62 = vsel %vm706_vm4, %v4544_v61, 0 }
0x1d09   : > { %v2883_v9 = vmul.f32 1.442695, %v2882_v8  ;;  %v2946_v8 = vsel %vm706_vm4, %v4548_v4, 0  ;;  %v4580_v4 = vld [vmem:[%s6714_s0 + $0x2] ss:$0 sm:$0xff] }
0x1d0b   : > { %5457 = vpow2.f32 %v2883_v9 }
0x1d0d   : > { %v5456_v10 = vpop.eup %5455 }
0x1d0e   : > { %v2565_v11 = vsel %vm642_vm3, %v5456_v10, 0.0 }
0x1d0f   : > { %2566 = vadd.xlane.f32.xlu0 %v2565_v11 }
0x1d15   : > { %v5458_v12 = vpop.eup %5457 }
0x1d16   : > { %v2885_v13 = vsel %vm642_vm3, %v5458_v12, 0.0 }
0x1d17   : > { %2886 = vadd.xlane.f32.xlu1 %v2885_v13 }
0x1d25   : > { %2571 = vrot.lane.b32.xlu0 %v6223_v37, %s6694_s21 }
0x1d28   : > { %2991 = vrot.lane.b32.xlu1 %v6223_v37, %s6717_s19 }
0x1d29   : > { %2989 = vrot.lane.b32.xlu0 %v6223_v37, %s6718_s29 }
0x1d4c   : > { %2720 = vmax.xlane.f32.xlu1 %v2719_v16  ;;  %v4552_v16 = vld [vmem:[%s6661_s6 + $0x2c] sm:$0xf] }
0x1d9c   : > { %v2567_v43 = vpop.xlane.xlu0 %2566 }
0x1d9d   : > { %5459 = vrcp.f32 %v2567_v43 }
0x1da0   : > { %v2572_v17 = vpop.permute.xlu0 %2571 }
0x1da1   : > { %v2577_v18 = vsel %vm706_vm4, %v2572_v17, 0 }
0x1da2   : > { %5048 = vmatpush3.bf16.msra.mxu1 %v2577_v18  ;;  %v3106_v18 = vsel %vm706_vm4, %v4552_v16, 0 }
0x1da3   : > { %5053 = vmatprep.subr.bf16.mxu1 %v5572_v32 }
0x1da4   : > { %v2887_v19 = vpop.xlane.xlu1 %2886  ;;  %v2990_v30 = vpop.permute.xlu0 %2989 }
0x1da5   : > { %5461 = vrcp.f32 %v2887_v19 }
0x1da7   : > { %v5460_v20 = vpop.eup %5459 }
0x1da8   : > { %v2569_v22 = vmul.f32 %v5460_v20, %v5456_v10  ;;  %v2992_v27 = vpop.permute.xlu1 %2991 }
0x1da9   : > { %v2997_v29 = vsel %vm642_vm3, %v2992_v27, 0 }
0x1daa   : > { %v2570_v23 = vpack.c.bf16 %v2569_v22, %v2569_v22 }
0x1dac   : > { %5050 = vmatmul.mubr.msk.bf16.vlgmr.msra.gmra.mrb[52].mxu1 %vm642_vm3, %v2570_v23 }
0x1dad   : > { %5055 = vmatprep.mubr.msk.bf16.mxu1 %vm5573_vm2, %v5572_v32  ;;  %5054 = vmatpush3.bf16.msra.mxu1 %v2626_v38 }
0x1dae   : > { %5065 = vmatprep.subr.bf16.mxu1 %v5572_v32 }
0x1daf   : > { %v5462_v25 = vpop.eup %5461 }
0x1db0   : > { %v2889_v26 = vmul.f32 %v5462_v25, %v5458_v12 }
0x1db2   : > { %v2890_v28 = vpack.c.bf16 %v2889_v26, %v2889_v26  ;;  %v4537_v26 = vld [vmem:[%s6662_s7 + $0x2] ss:$0 sm:$0xff] }
0x1db3   : > { %v2509_v27 = vadd.f32 %v4537_v26, %v6200_v15  ;;  %v5389_v15 = vld [vmem:[%s6665_s10 + $0x20] sm:$0xff]  }
0x1db4   : > { %5086 = vmatmul.mubr.msk.bf16.vlgmr.msra.gmra.mrb[60].mxu0 %vm642_vm3, %v2890_v28  ;;  %v4590_v26 = vld [vmem:[%s6659_s4 + $0x3] ss:$0 sm:$0xff] }
0x1db5   : > { %5096 = vmatpush3.bf16.xpose.msra.mxu0 %v2997_v29  ;;  %5097 = vmatprep.mubr.msk.bf16.mxu0 %vm5573_vm2, %v5572_v32 }
0x1db6   : > { %5113 = vmatprep.subr.bf16.mxu0 %v5572_v32 }
0x1dbc   : > { %5098 = vmatmul.mubr.msk.bf16.vlgmr.msra.gmra.mrb[64].mxu0 %vm642_vm3, %v2990_v30 }
0x1dbd   : > { %5117 = vmatprep.mubr.msk.bf16.mxu0 %vm5573_vm2, %v5572_v32  ;;  %5114 = vmatpush3.bf16.msra.mxu0 %v5389_v15 }
0x1dbe   : > { %5115 = vmatprep.subr.bf16.mxu0 %v5572_v32 }
0x1dd9   : > { %v2721_v31 = vpop.xlane.xlu1 %2720 }
0x1dda   : > { %v2722_v33 = vsub.f32 %v2714_v14, %v2721_v31 }
0x1ddc   : > { %v2723_v45 = vmul.f32 1.442695, %v2722_v33 }
0x1dde   : > { %5463 = vpow2.f32 %v2723_v45 }
0x1de8   : > { %v5464_v34 = vpop.eup %5463 }
0x1de9   : > { %v2725_v35 = vsel %vm642_vm3, %v5464_v34, 0.0 }
0x1dea   : > { %2726 = vadd.xlane.f32.xlu0 %v2725_v35 }
0x1e00   : > { %2731 = vrot.lane.b32.xlu0 %v6223_v37, %s6715_s20 }
0x1e77   : > { %v2727_v39 = vpop.xlane.xlu0 %2726 }
0x1e78   : > { %5465 = vrcp.f32 %v2727_v39 }
0x1e7b   : > { %v2732_v40 = vpop.permute.xlu0 %2731 }
0x1e7c   : > { %v2737_v47 = vsel %vm706_vm4, %v2732_v40, 0  ;;  %v5390_v40 = vld [vmem:[%s6665_s10 + $0x28] sm:$0xff]  }
0x1e7d   : > { %5116 = vmatpush3.bf16.msra.mxu0 %v5390_v40 }
0x1e7e   : > { %5121 = vmatprep.subr.bf16.mxu0 %v5572_v32 }
0x1e7f   : > { %v2613_v41 = vpop.f32.mrb[52].mxu1 }
0x1e80   : > { %v2619_v42 = vpack.c.bf16 %v2613_v41, %v2613_v41  ;;  %v5051_v44 = vpop.f32.mrb[53].mxu1 }
0x1e81   : > { %v2616_v46 = vpop.f32.mrb[54].mxu1 }
0x1e82   : > { %v5466_v21 = vpop.eup %5465  ;;  %v5052_v48 = vpop.f32.mrb[55].mxu1  ;;  %5056 = vmatmul.mubr.msk.bf16.vlgmr.msra.gmra.mrb[56].mxu1 %vm642_vm3, %v2619_v42 }
0x1e83   : > { %5066 = vmatpush3.bf16.msra.mxu1 %v2737_v47  ;;  %5067 = vmatprep.mubr.msk.bf16.mxu1 %vm5573_vm2, %v5572_v32  ;;  %v2729_v49 = vmul.f32 %v5466_v21, %v5464_v34  ;;  %v4554_v21 = vld [vmem:[%s6663_s8 + $0x2] ss:$0 sm:$0xff] }
0x1e84   : > { %5071 = vmatprep.subr.bf16.mxu1 %v5572_v32  ;;  %v4555_v48 = vld [vmem:[%s6713_s17 + $0x2] ss:$0 sm:$0xff] }
0x1e85   : > { %v2730_v24 = vpack.c.bf16 %v2729_v49, %v2729_v49 }
0x1e87   : > { %v2933_v50 = vpop.f32.mrb[60].mxu0 }
0x1e88   : > { %v5087_v51 = vpop.f32.mrb[61].mxu0 }
0x1e89   : > { %v2936_v52 = vpop.f32.mrb[62].mxu0  ;;  %v5391_v51 = vld [vmem:[%s6667_s12 + $0x80] sm:$0xff]  }
0x1e8a   : > { %5068 = vmatmul.mubr.msk.bf16.vlgmr.msra.gmra.mrb[60].mxu1 %vm642_vm3, %v2730_v24  ;;  %v5088_v53 = vpop.f32.mrb[63].mxu0  ;;  %v5392_v52 = vld [vmem:[%s6667_s12 + $0x88] sm:$0xff]  }
0x1e8b   : > { %5073 = vmatprep.mubr.msk.bf16.mxu1 %vm5573_vm2, %v5572_v32  ;;  %5072 = vmatpush3.bf16.msra.mxu1 %v2786_v62  ;;  %v5393_v53 = vld [vmem:[%s6667_s12 + $0x90] sm:$0xff]  }
0x1e8c   : > { %5089 = vmatprep.subr.bf16.mxu1 %v5572_v32 }
0x1e8f   : > { %v3033_v54 = vpop.f32.mrb[64].mxu0 }
0x1e90   : > { %v3034_v55 = vadd.f32 %v3033_v54, %v5835_v57  ;;  %v5099_v56 = vpop.f32.mrb[65].mxu0  ;;  %v5394_v54 = vld [vmem:[%s6667_s12 + $0x98] sm:$0xff]  }
0x1e91   : > { %v3036_v58 = vpop.f32.mrb[66].mxu0  ;;  %v5396_v56 = vld [vmem:[%s6667_s12 + $0xa8] sm:$0xff]  }
0x1e92   : > { %v5100_v59 = vpop.f32.mrb[67].mxu0  ;;  %v3039_v60 = vsel %vm642_vm3, %v3034_v55, -inf  ;;  %v5397_v58 = vld [vmem:[%s6667_s12 + $0xb0] sm:$0xff]  }
0x1e93   : > { %3040 = vmax.xlane.f32.xlu1 %v3039_v60  ;;  %v5398_v59 = vld [vmem:[%s6667_s12 + $0xb8] sm:$0xff]   ;;  %v4560_v60 = vld [vmem:[%s6666_s11 + $0x2] ss:$0 sm:$0xff] }
0x1f20   : > { %v3041_v63 = vpop.xlane.xlu1 %3040 }
0x1f21   : > { %v3042_v0 = vsub.f32 %v3034_v55, %v3041_v63  ;;  %v5395_v55 = vld [vmem:[%s6667_s12 + $0xa0] sm:$0xff]  }
0x1f23   : > { %v3043_v1 = vmul.f32 1.442695, %v3042_v0 }
0x1f25   : > { %5467 = vpow2.f32 %v3043_v1 }
0x1f2f   : > { %v5468_v2 = vpop.eup %5467 }
0x1f30   : > { %v3045_v3 = vsel %vm642_vm3, %v5468_v2, 0.0 }
0x1f31   : > { %3046 = vadd.xlane.f32.xlu1 %v3045_v3 }
0x1f42   : > { %3051 = vrot.lane.b32.xlu1 %v6223_v37, %s6716_s18  ;;  %v2939_v37 = vpack.c.bf16 %v2933_v50, %v2933_v50 }
0x1f5d   : > { %v2773_v5 = vpop.f32.mrb[60].mxu1 }
0x1f5e   : > { %v2779_v6 = vpack.c.bf16 %v2773_v5, %v2773_v5  ;;  %v5069_v7 = vpop.f32.mrb[61].mxu1 }
0x1f5f   : > { %v2776_v9 = vpop.f32.mrb[62].mxu1 }
0x1f60   : > { %v5070_v10 = vpop.f32.mrb[63].mxu1  ;;  %5074 = vmatmul.mubr.msk.bf16.vlgmr.msra.gmra.mrb[56].mxu1 %vm642_vm3, %v2779_v6 }
0x1f61   : > { %5090 = vmatpush3.bf16.msra.mxu1 %v2946_v8  ;;  %5091 = vmatprep.mubr.msk.bf16.mxu1 %vm5573_vm2, %v5572_v32 }
0x1f62   : > { %5101 = vmatprep.subr.bf16.mxu1 %v5572_v32 }
0x1f6c   : > { %5092 = vmatmul.mubr.msk.bf16.vlgmr.msra.gmra.mrb[56].mxu1 %vm642_vm3, %v2939_v37 }
0x1f6d   : > { %5103 = vmatprep.mubr.msk.bf16.mxu1 %vm5573_vm2, %v5572_v32 }
0x1fbe   : > { %v3047_v11 = vpop.xlane.xlu1 %3046 }
0x1fbf   : > { %5469 = vrcp.f32 %v3047_v11 }
0x1fc2   : > { %v3052_v12 = vpop.permute.xlu1 %3051 }
0x1fc3   : > { %v3057_v13 = vsel %vm706_vm4, %v3052_v12, 0 }
0x1fc4   : > { %5102 = vmatpush3.bf16.msra.mxu1 %v3057_v13 }
0x1fc5   : > { %5107 = vmatprep.subr.bf16.mxu1 %v5572_v32 }
0x1fc9   : > { %v5470_v14 = vpop.eup %5469 }
0x1fca   : > { %v3049_v43 = vmul.f32 %v5470_v14, %v5468_v2 }
0x1fcc   : > { %v3050_v17 = vpack.c.bf16 %v3049_v43, %v3049_v43  ;;  %v5399_v43 = vld [vmem:[%s6660_s5 + $0x30] sm:$0xff]  }
0x1fce   : > { %5104 = vmatmul.mubr.msk.bf16.vlgmr.msra.gmra.mrb[64].mxu1 %vm642_vm3, %v3050_v17  ;;  %v5400_v17 = vld [vmem:[%s6660_s5 + $0x38] sm:$0xff]  }
0x1fcf   : > { %5108 = vmatpush3.bf16.msra.mxu1 %v3106_v18  ;;  %5109 = vmatprep.mubr.msk.bf16.mxu1 %vm5573_vm2, %v5572_v32 }
0x1fd0   : > { %5141 = vmatprep.subr.bf16.mxu1 %v5572_v32 }
0x20a1   : > { %v3093_v19 = vpop.f32.mrb[64].mxu1 }
0x20a2   : > { %v3099_v20 = vpack.c.bf16 %v3093_v19, %v3093_v19  ;;  %v5105_v22 = vpop.f32.mrb[65].mxu1 }
0x20a3   : > { %v3096_v23 = vpop.f32.mrb[66].mxu1 }
0x20a4   : > { %v5106_v25 = vpop.f32.mrb[67].mxu1  ;;  %5110 = vmatmul.mubr.msk.bf16.vlgmr.msra.gmra.mrb[56].mxu1 %vm642_vm3, %v3099_v20  ;;  %v4589_v23 = vld [vmem:[%s6658_s3 + $0x3] ss:$0 sm:$0xff] }
0x20a5   : > { %5145 = vmatprep.mubr.msk.bf16.mxu1 %vm5573_vm2, %v5572_v32  ;;  %5142 = vmatpush3.bf16.msra.mxu1 %v5399_v43 }
0x20a6   : > { %5143 = vmatprep.subr.bf16.mxu1 %v5572_v32 }
0x20a9   : > { %5144 = vmatpush3.bf16.msra.mxu1 %v5400_v17 }
0x20aa   : > { %5149 = vmatprep.subr.bf16.mxu1 %v5572_v32 }
0x2177   : > { %v3142_v28 = vpop.f32.mrb[56].mxu1 }
0x2178   : > { %v6336_v29 = vadd.f32 %v3142_v28, %v2509_v27  ;;  %v5111_v30 = vpop.f32.mrb[57].mxu1 }
0x2179   : > { %v3145_v31 = vpop.f32.mrb[58].mxu1 }
0x217a   : > { %v5112_v33 = vpop.f32.mrb[59].mxu1  ;;  %v3151_v45 = vsel %vm547_vm1, %v6336_v29, 0.0 }
0x217b   : > { %3152 = vadd.xlane.f32.xlu0 %v3151_v45 }
0x2208   : > { %v3153_v34 = vpop.xlane.xlu0 %3152 }
0x2209   : > { %v3154_v35 = vmul.f32 0.03125, %v3153_v34 }
0x220b   : > { %v3155_v36 = vsub.f32 %v6336_v29, %v3154_v35 }
0x220d   : > { %v3156_v38 = vmul.f32 %v3155_v36, %v3155_v36 }
0x220f   : > { %v3157_v39 = vsel %vm547_vm1, %v3156_v38, 0.0 }
0x2210   : > { %3158 = vadd.xlane.f32.xlu1 %v3157_v39 }
0x229d   : > { %v3159_v41 = vpop.xlane.xlu1 %3158 }
0x229e   : > { %v3160_v42 = vmul.f32 0.03125, %v3159_v41 }
0x22a0   : > { %v3161_v44 = vadd.f32 1e-05, %v3160_v42 }
0x22a2   : > { %5471 = vrsqrt.f32 %v3161_v44 }
0x22ac   : > { %v5472_v46 = vpop.eup %5471 }
0x22ad   : > { %v3163_v47 = vmul.f32 %v5472_v46, %v3155_v36 }
0x22af   : > { %v3168_v49 = vmul.f32 %v4554_v21, %v3163_v47 }
0x22b1   : > { %v3173_v50 = vadd.f32 %v4555_v48, %v3168_v49 }
0x22b3   : > { %v3174_v24 = vpack.c.bf16 %v3173_v50, %v3173_v50 }
0x22b5   : > { %5118 = vmatmul.mubr.msk.bf16.vlgmr.msra.gmra.mrb[68].mxu0 %vm547_vm1, %v3174_v24 }
0x22b6   : > { %5122 = vmatpush3.bf16.msra.mxu0 %v5391_v51  ;;  %5137 = vmatprep.mubr.msk.bf16.mxu0 %vm5573_vm2, %v5572_v32 }
0x22b7   : > { %5123 = vmatprep.subr.bf16.mxu0 %v5572_v32 }
0x22ba   : > { %5124 = vmatpush3.bf16.msra.mxu0 %v5392_v52 }
0x22bb   : > { %5125 = vmatprep.subr.bf16.mxu0 %v5572_v32 }
0x22be   : > { %5126 = vmatpush3.bf16.msra.mxu0 %v5393_v53 }
0x22bf   : > { %5127 = vmatprep.subr.bf16.mxu0 %v5572_v32 }
0x22c2   : > { %5128 = vmatpush3.bf16.msra.mxu0 %v5394_v54 }
0x22c3   : > { %5129 = vmatprep.subr.bf16.mxu0 %v5572_v32 }
0x22c6   : > { %5130 = vmatpush3.bf16.msra.mxu0 %v5395_v55 }
0x22c7   : > { %5131 = vmatprep.subr.bf16.mxu0 %v5572_v32 }
0x22ca   : > { %5132 = vmatpush3.bf16.msra.mxu0 %v5396_v56 }
0x22cb   : > { %5133 = vmatprep.subr.bf16.mxu0 %v5572_v32 }
0x22ce   : > { %5134 = vmatpush3.bf16.msra.mxu0 %v5397_v58 }
0x22cf   : > { %5135 = vmatprep.subr.bf16.mxu0 %v5572_v32 }
0x22d2   : > { %5136 = vmatpush3.bf16.msra.mxu0 %v5398_v59 }
0x22d3   : > { %5167 = vmatprep.subr.bf16.mxu0 %v5572_v32 }
0x2388   : > { %v3234_v61 = vpop.f32.mrb[68].mxu0 }
0x2389   : > { %v3235_v62 = vadd.f32 %v4560_v60, %v3234_v61  ;;  %v5119_v63 = vpop.f32.mrb[69].mxu0 }
0x238a   : > { %v3237_v0 = vpop.f32.mrb[70].mxu0 }
0x238b   : > { %v3240_v1 = vmax.f32 %v3235_v62, 0.0  ;;  %v5120_v2 = vpop.f32.mrb[71].mxu0 }
0x238d   : > { %v3241_v3 = vpack.c.bf16 %v3240_v1, %v3240_v1 }
0x238f   : > { %5138 = vmatmul.mubr.bf16.vlgmr.msra.gmra.mrb[72].mxu0 %v3241_v3 }
0x2390   : > { %5169 = vmatprep.mubr.msk.bf16.mxu0 %vm5573_vm2, %v5572_v32 }
0x2462   : > { %v3346_v5 = vpop.f32.mrb[72].mxu0 }
0x2463   : > { %v3347_v6 = vadd.f32 %v4580_v4, %v3346_v5  ;;  %v5139_v7 = vpop.f32.mrb[73].mxu0 }
0x2464   : > { %v3349_v8 = vpop.f32.mrb[74].mxu0 }
0x2465   : > { %v6400_v9 = vadd.f32 %v6336_v29, %v3347_v6  ;;  %v5140_v10 = vpop.f32.mrb[75].mxu0 }
0x2467   : > { %v3355_v37 = vsel %vm547_vm1, %v6400_v9, 0.0 }
0x2468   : > { %3356 = vadd.xlane.f32.xlu0 %v3355_v37 }
0x24f5   : > { %v3357_v11 = vpop.xlane.xlu0 %3356 }
0x24f6   : > { %v3358_v12 = vmul.f32 0.03125, %v3357_v11 }
0x24f8   : > { %v3359_v13 = vsub.f32 %v6400_v9, %v3358_v12 }
0x24fa   : > { %v3360_v14 = vmul.f32 %v3359_v13, %v3359_v13 }
0x24fc   : > { %v3361_v16 = vsel %vm547_vm1, %v3360_v14, 0.0 }
0x24fd   : > { %3362 = vadd.xlane.f32.xlu0 %v3361_v16 }
0x258a   : > { %v3363_v18 = vpop.xlane.xlu0 %3362 }
0x258b   : > { %v3364_v19 = vmul.f32 0.03125, %v3363_v18 }
0x258d   : > { %v3365_v20 = vadd.f32 1e-05, %v3364_v19 }
0x258f   : > { %5473 = vrsqrt.f32 %v3365_v20 }
0x2599   : > { %v5474_v22 = vpop.eup %5473 }
0x259a   : > { %v3367_v25 = vmul.f32 %v5474_v22, %v3359_v13 }
0x259c   : > { %v3372_v27 = vmul.f32 %v4589_v23, %v3367_v25 }
0x259e   : > { %v3377_v28 = vadd.f32 %v4590_v26, %v3372_v27 }
0x25a0   : > { %v3378_v29 = vpack.c.bf16 %v3377_v28, %v3377_v28 }
0x25a2   : > { %5146 = vmatmul.mubr.msk.bf16.vlgmr.msra.gmra.mrb[68].mxu1 %vm547_vm1, %v3378_v29 }
0x25a3   : > { %5151 = vmatprep.mubr.msk.bf16.mxu1 %vm5573_vm2, %v5572_v32 }
0x2675   : > { %v3433_v30 = vpop.f32.mrb[68].mxu1 }
0x2676   : > { %v6423_v31 = vpack.c.bf16 %v3433_v30, %v3433_v30  ;;  %v5147_v33 = vpop.f32.mrb[69].mxu1  ;;  %v4601_v30 = vld [vmem:[%s6661_s6 + $0x30] sm:$0xf] }
0x2677   : > { %v3436_v45 = vpop.f32.mrb[70].mxu1  ;;  %v3562_v33 = vsel %vm706_vm4, %v4601_v30, 0 }
0x2678   : > { %3607 = vrot.lane.b32.xlu1 %v6423_v31, %s5578_s27  ;;  %3447 = vrot.lane.b32.xlu0 %v6423_v31, %s5575_s14  ;;  %v5148_v34 = vpop.f32.mrb[71].mxu1  ;;  %s6719_s14 = smov 64  }
0x267c   : > { %3605 = vrot.lane.b32.xlu1 %v6423_v31, %s5579_s23  ;;  %3767 = vrot.lane.b32.xlu0 %v6423_v31, %s5577_s9  ;;  %s6720_s9 = smov 48  }
0x2680   : > { %3765 = vrot.lane.b32.xlu1 %v6423_v31, %s5580_s30  ;;  %s6721_s30 = sld [smem:[#allocation10_spill]] }
0x2686   : > { %s477_s21 = sand.u32 1, %s6721_s30  }
0x2687   : > { %s4429_s28 = sshll.u32 %s477_s21, 3  ;;  %s4358_s30 = scalar_lea.sflag [#allocation6], %s477_s21 }
0x2688   : > { %s479_s27 = scalar_lea.vmem [#allocation5], %s4429_s28  ;;  %s5509_s28 = sshll.u32 %s5586_s16, 4  ;;  %s5510_s28 = int_to_ptr.vmem [resolvable:$false] %s5509_s28 }
0x2689   : > { %s4371_s23 = sshll.u32 %s479_s27, 4  ;;  %s5511_s26 = scalar_lea.vmem %s5510_s28, 256  ;;  %s6615_s23 = int_to_ptr.vmem [resolvable:$true] %s4371_s23 }
0x268a   : > { %s5505_s15 = scalar_lea.vmem %s6615_s23, 128  ;;  %p5512_p4 = scmp.lt.s32.totalorder %s6615_s23, %s5510_s28 }
0x268b   : > { %p5506_p1 = scmp.ne.s32.totalorder %s6615_s23, %s5505_s15  ;;  %p5513_p5 = scmp.lt.s32.totalorder %s5511_s26, %s5505_s15 }
0x268d   : > { %p5507_p2 = pnand %p5506_p1, %p5710_p10  ;;  %p5514_p6 = por %p5513_p5, %p5512_p4 }
0x268f   : > { %p5508_p3 = pneg %p5507_p2 }
0x2691   : > { %p5515_p7 = pnand %p5514_p6, %p5508_p3 }
0x26ea   : > { %v3608_v35 = vpop.permute.xlu1 %3607  ;;  %v3448_v36 = vpop.permute.xlu0 %3447 }
0x26eb   : > { %v3613_v38 = vsel %vm642_vm3, %v3608_v35, 0  ;;  %v3453_v39 = vsel %vm642_vm3, %v3448_v36, 0 }
0x26ec   : > { %5150 = vmatpush3.bf16.xpose.msra.mxu1 %v3453_v39  ;;  %5168 = vmatpush3.bf16.xpose.msra.mxu0 %v3613_v38 }
0x26ed   : > { %5185 = vmatprep.subr.bf16.mxu0 %v5572_v32  ;;  %5155 = vmatprep.subr.bf16.mxu1 %v5572_v32 }
0x26ee   : > { %v3768_v15 = vpop.permute.xlu0 %3767  ;;  %v3606_v40 = vpop.permute.xlu1 %3605 }
0x26ef   : > { %v3773_v41 = vsel %vm642_vm3, %v3768_v15, 0 }
0x26f2   : > { %v3766_v42 = vpop.permute.xlu1 %3765 }
0x26f3   : > { %5152 = vmatmul.mubr.msk.bf16.vlgmr.msra.gmra.mrb[72].mxu1 %vm642_vm3, %v6423_v31  ;;  %5170 = vmatmul.mubr.msk.bf16.vlgmr.msra.gmra.mrb[76].mxu0 %vm642_vm3, %v3606_v40 }
0x26f4   : > { %5186 = vmatpush3.bf16.xpose.msra.mxu0 %v3773_v41  ;;  %5187 = vmatprep.mubr.msk.bf16.mxu0 %vm5573_vm2, %v5572_v32 }
0x26f5   : > { %5191 = vmatprep.subr.bf16.mxu0 %v5572_v32  ;;  %5157 = vmatprep.mubr.msk.bf16.mxu1 %vm5573_vm2, %v5572_v32 }
0x26fb   : > { %5188 = vmatmul.mubr.msk.bf16.vlgmr.msra.gmra.mrb[80].mxu0 %vm642_vm3, %v3766_v42 }
0x26fc   : > { %5193 = vmatprep.mubr.msk.bf16.mxu0 %vm5573_vm2, %v5572_v32 }
0x27c6   : > { %v3489_v44 = vpop.f32.mrb[72].mxu1  ;;  %v3649_v46 = vpop.f32.mrb[76].mxu0 }
0x27c7   : > { %v3490_v21 = vadd.f32 %v3489_v44, %v5835_v57  ;;  %v5153_v47 = vpop.f32.mrb[73].mxu1  ;;  %v5171_v48 = vpop.f32.mrb[77].mxu0  ;;  %v3650_v6 = vadd.f32 %v3649_v46, %v5835_v57 }
0x27c8   : > { %v3492_v49 = vpop.f32.mrb[74].mxu1  ;;  %v3652_v50 = vpop.f32.mrb[78].mxu0 }
0x27c9   : > { %v5154_v51 = vpop.f32.mrb[75].mxu1  ;;  %v5172_v24 = vpop.f32.mrb[79].mxu0  ;;  %v3495_v52 = vsel %vm642_vm3, %v3490_v21, -inf  ;;  %v3655_v7 = vsel %vm642_vm3, %v3650_v6, -inf }
0x27ca   : > { %3496 = vmax.xlane.f32.xlu0 %v3495_v52 }
0x27ce   : > { %v3809_v53 = vpop.f32.mrb[80].mxu0 }
0x27cf   : > { %v3810_v54 = vadd.f32 %v3809_v53, %v5835_v57  ;;  %v5189_v55 = vpop.f32.mrb[81].mxu0 }
0x27d0   : > { %v3812_v56 = vpop.f32.mrb[82].mxu0 }
0x27d1   : > { %v5190_v58 = vpop.f32.mrb[83].mxu0  ;;  %v3815_v59 = vsel %vm642_vm3, %v3810_v54, -inf }
0x27d2   : > { %3816 = vmax.xlane.f32.xlu1 %v3815_v59 }
0x2857   : > { %v3497_v60 = vpop.xlane.xlu0 %3496 }
0x2858   : > { %v3498_v61 = vsub.f32 %v3490_v21, %v3497_v60 }
0x285a   : > { %v3499_v62 = vmul.f32 1.442695, %v3498_v61  ;;  %v4609_v61 = vld [vmem:[%s6661_s6 + $0x38] sm:$0xf] }
0x285c   : > { %5475 = vpow2.f32 %v3499_v62 }
0x285f   : > { %v3817_v63 = vpop.xlane.xlu1 %3816 }
0x2860   : > { %v3818_v0 = vsub.f32 %v3810_v54, %v3817_v63  ;;  %v4605_v54 = vld [vmem:[%s6661_s6 + $0x34] sm:$0xf] }
0x2861   : > { %v3722_v55 = vsel %vm706_vm4, %v4605_v54, 0 }
0x2862   : > { %v3819_v1 = vmul.f32 1.442695, %v3818_v0 }
0x2864   : > { %5477 = vpow2.f32 %v3819_v1  ;;  %v3882_v1 = vsel %vm706_vm4, %v4609_v61, 0 }
0x2866   : > { %v5476_v2 = vpop.eup %5475 }
0x2867   : > { %v3501_v3 = vsel %vm642_vm3, %v5476_v2, 0.0 }
0x2868   : > { %3502 = vadd.xlane.f32.xlu0 %v3501_v3 }
0x286e   : > { %v5478_v4 = vpop.eup %5477 }
0x286f   : > { %v3821_v5 = vsel %vm642_vm3, %v5478_v4, 0.0 }
0x2870   : > { %3822 = vadd.xlane.f32.xlu1 %v3821_v5 }
0x287e   : > { %3507 = vrot.lane.b32.xlu0 %v6423_v31, %s6719_s14 }
0x2881   : > { %3827 = vrot.lane.b32.xlu1 %v6423_v31, %s6720_s9  ;;  %s6725_s9 = sld [smem:[#allocation21_spill]] }
0x2882   : > { %3927 = vrot.lane.b32.xlu0 %v6423_v31, %s6717_s19 }
0x2885   : > { %3925 = vrot.lane.b32.xlu1 %v6423_v31, %s6718_s29  ;;  %s6722_s29 = sld [smem:[#allocation20_spill]] }
0x28a1   : > { %3656 = vmax.xlane.f32.xlu0 %v3655_v7 }
0x28b7   : > { %3667 = vrot.lane.b32.xlu0 %v6423_v31, %s6715_s20 }
0x28f5   : > { %v3503_v8 = vpop.xlane.xlu0 %3502 }
0x28f6   : > { %5479 = vrcp.f32 %v3503_v8  ;;  %v4613_v8 = vld [vmem:[%s6661_s6 + $0x3c] sm:$0xf] }
0x28f9   : > { %v3508_v10 = vpop.permute.xlu0 %3507 }
0x28fa   : > { %v3513_v37 = vsel %vm706_vm4, %v3508_v10, 0 }
0x28fb   : > { %5156 = vmatpush3.bf16.msra.mxu1 %v3513_v37 }
0x28fc   : > { %5161 = vmatprep.subr.bf16.mxu1 %v5572_v32 }
0x28fd   : > { %v3823_v11 = vpop.xlane.xlu1 %3822  ;;  %v3928_v19 = vpop.permute.xlu0 %3927 }
0x28fe   : > { %5481 = vrcp.f32 %v3823_v11  ;;  %v3933_v22 = vsel %vm642_vm3, %v3928_v19, 0  ;;  %v4042_v11 = vsel %vm706_vm4, %v4613_v8, 0 }
0x2900   : > { %v5480_v12 = vpop.eup %5479 }
0x2901   : > { %v3505_v13 = vmul.f32 %v5480_v12, %v5476_v2  ;;  %v3828_v14 = vpop.permute.xlu1 %3827 }
0x2902   : > { %v3833_v16 = vsel %vm706_vm4, %v3828_v14, 0 }
0x2903   : > { %5192 = vmatpush3.bf16.msra.mxu0 %v3833_v16  ;;  %v3506_v43 = vpack.c.bf16 %v3505_v13, %v3505_v13 }
0x2904   : > { %5203 = vmatprep.subr.bf16.mxu0 %v5572_v32 }
0x2905   : > { %5158 = vmatmul.mubr.msk.bf16.vlgmr.msra.gmra.mrb[76].mxu1 %vm642_vm3, %v3506_v43  ;;  %v3926_v23 = vpop.permute.xlu1 %3925 }
0x2906   : > { %5163 = vmatprep.mubr.msk.bf16.mxu1 %vm5573_vm2, %v5572_v32  ;;  %5162 = vmatpush3.bf16.msra.mxu1 %v3562_v33 }
0x2907   : > { %5173 = vmatprep.subr.bf16.mxu1 %v5572_v32 }
0x2908   : > { %v5482_v17 = vpop.eup %5481 }
0x2909   : > { %v3825_v18 = vmul.f32 %v5482_v17, %v5478_v4  ;;  %v4598_v17 = vld [vmem:[%s6662_s7 + $0x3] ss:$0 sm:$0xff] }
0x290b   : > { %v3826_v20 = vpack.c.bf16 %v3825_v18, %v3825_v18  ;;  %v3445_v18 = vadd.f32 %v4598_v17, %v6400_v9  ;;  %v5401_v9 = vld [vmem:[%s6665_s10 + $0x30] sm:$0xff]  }
0x290d   : > { %5194 = vmatmul.mubr.msk.bf16.vlgmr.msra.gmra.mrb[84].mxu0 %vm642_vm3, %v3826_v20 }
0x290e   : > { %5204 = vmatpush3.bf16.xpose.msra.mxu0 %v3933_v22  ;;  %5205 = vmatprep.mubr.msk.bf16.mxu0 %vm5573_vm2, %v5572_v32 }
0x290f   : > { %5221 = vmatprep.subr.bf16.mxu0 %v5572_v32 }
0x2915   : > { %5206 = vmatmul.mubr.msk.bf16.vlgmr.msra.gmra.mrb[88].mxu0 %vm642_vm3, %v3926_v23 }
0x2916   : > { %5225 = vmatprep.mubr.msk.bf16.mxu0 %vm5573_vm2, %v5572_v32  ;;  %5222 = vmatpush3.bf16.msra.mxu0 %v5401_v9 }
0x2917   : > { %5223 = vmatprep.subr.bf16.mxu0 %v5572_v32 }
0x292e   : > { %v3657_v25 = vpop.xlane.xlu0 %3656 }
0x292f   : > { %v3658_v26 = vsub.f32 %v3650_v6, %v3657_v25 }
0x2931   : > { %v3659_v27 = vmul.f32 1.442695, %v3658_v26 }
0x2932   : > { %v3668_v34 = vpop.permute.xlu0 %3667 }
0x2933   : > { %5483 = vpow2.f32 %v3659_v27  ;;  %v3673_v40 = vsel %vm706_vm4, %v3668_v34, 0 }
0x293d   : > { %v5484_v28 = vpop.eup %5483 }
0x293e   : > { %v3661_v29 = vsel %vm642_vm3, %v5484_v28, 0.0 }
0x293f   : > { %3662 = vadd.xlane.f32.xlu1 %v3661_v29 }
0x29cc   : > { %v3663_v45 = vpop.xlane.xlu1 %3662 }
0x29cd   : > { %5485 = vrcp.f32 %v3663_v45  ;;  %v5402_v45 = vld [vmem:[%s6665_s10 + $0x38] sm:$0xff]  }
0x29ce   : > { %5224 = vmatpush3.bf16.msra.mxu0 %v5402_v45 }
0x29cf   : > { %5229 = vmatprep.subr.bf16.mxu0 %v5572_v32 }
0x29d7   : > { %v5486_v39 = vpop.eup %5485 }
0x29d8   : > { %v3549_v35 = vpop.f32.mrb[76].mxu1  ;;  %v3665_v42 = vmul.f32 %v5486_v39, %v5484_v28  ;;  %v4615_v39 = vld [vmem:[%s6663_s8 + $0x3] ss:$0 sm:$0xff] }
0x29d9   : > { %v3555_v36 = vpack.c.bf16 %v3549_v35, %v3549_v35  ;;  %v5159_v38 = vpop.f32.mrb[77].mxu1 }
0x29da   : > { %v3552_v15 = vpop.f32.mrb[78].mxu1  ;;  %v3666_v21 = vpack.c.bf16 %v3665_v42, %v3665_v42 }
0x29db   : > { %v5160_v41 = vpop.f32.mrb[79].mxu1  ;;  %5164 = vmatmul.mubr.msk.bf16.vlgmr.msra.gmra.mrb[80].mxu1 %vm642_vm3, %v3555_v36 }
0x29dc   : > { %5174 = vmatpush3.bf16.msra.mxu1 %v3673_v40  ;;  %5175 = vmatprep.mubr.msk.bf16.mxu1 %vm5573_vm2, %v5572_v32  ;;  %v4616_v40 = vld [vmem:[%s6713_s17 + $0x3] ss:$0 sm:$0xff] }
0x29dd   : > { %5179 = vmatprep.subr.bf16.mxu1 %v5572_v32 }
0x29e0   : > { %v3869_v44 = vpop.f32.mrb[84].mxu0 }
0x29e1   : > { %v5195_v46 = vpop.f32.mrb[85].mxu0 }
0x29e2   : > { %v3872_v47 = vpop.f32.mrb[86].mxu0 }
0x29e3   : > { %5176 = vmatmul.mubr.msk.bf16.vlgmr.msra.gmra.mrb[84].mxu1 %vm642_vm3, %v3666_v21  ;;  %v5196_v48 = vpop.f32.mrb[87].mxu0  ;;  %v5404_v21 = vld [vmem:[%s6667_s12 + $0xc8] sm:$0xff]   ;;  %v5405_v47 = vld [vmem:[%s6667_s12 + $0xd0] sm:$0xff]  }
0x29e4   : > { %5181 = vmatprep.mubr.msk.bf16.mxu1 %vm5573_vm2, %v5572_v32  ;;  %5180 = vmatpush3.bf16.msra.mxu1 %v3722_v55  ;;  %v5406_v48 = vld [vmem:[%s6667_s12 + $0xd8] sm:$0xff]  }
0x29e5   : > { %5197 = vmatprep.subr.bf16.mxu1 %v5572_v32 }
0x29e8   : > { %v3969_v49 = vpop.f32.mrb[88].mxu0 }
0x29e9   : > { %v3970_v50 = vadd.f32 %v3969_v49, %v5835_v57  ;;  %v5207_v51 = vpop.f32.mrb[89].mxu0  ;;  %v5407_v49 = vld [vmem:[%s6667_s12 + $0xe0] sm:$0xff]  }
0x29ea   : > { %v3972_v24 = vpop.f32.mrb[90].mxu0  ;;  %v5409_v51 = vld [vmem:[%s6667_s12 + $0xf0] sm:$0xff]  }
0x29eb   : > { %v5208_v52 = vpop.f32.mrb[91].mxu0  ;;  %v3975_v53 = vsel %vm642_vm3, %v3970_v50, -inf  ;;  %v5410_v24 = vld [vmem:[%s6667_s12 + $0xf8] sm:$0xff]  }
0x29ec   : > { %3976 = vmax.xlane.f32.xlu1 %v3975_v53  ;;  %v4621_v52 = vld [vmem:[%s6666_s11 + $0x3] ss:$0 sm:$0xff] }
0x2a79   : > { %v3977_v56 = vpop.xlane.xlu1 %3976 }
0x2a7a   : > { %v3978_v58 = vsub.f32 %v3970_v50, %v3977_v56  ;;  %v5408_v50 = vld [vmem:[%s6667_s12 + $0xe8] sm:$0xff]  }
0x2a7c   : > { %v3979_v59 = vmul.f32 1.442695, %v3978_v58 }
0x2a7e   : > { %5487 = vpow2.f32 %v3979_v59 }
0x2a88   : > { %v5488_v57 = vpop.eup %5487 }
0x2a89   : > { %v3981_v60 = vsel %vm642_vm3, %v5488_v57, 0.0 }
0x2a8a   : > { %3982 = vadd.xlane.f32.xlu1 %v3981_v60  ;;  %v5411_v60 = vld [vmem:[%s6722_s29] sm:$0xff]  }
0x2a9b   : > { %3987 = vrot.lane.b32.xlu1 %v6423_v31, %s6716_s18  ;;  %v3875_v31 = vpack.c.bf16 %v3869_v44, %v3869_v44  ;;  %v5403_v44 = vld [vmem:[%s6667_s12 + $0xc0] sm:$0xff]   ;;  %s6723_s18 = smov %s6722_s29  ;;  %s6726_s29 = sld [smem:[#allocation22_spill]] }
0x2a9c   : > { %v5412_v61 = vld [vmem:[%s6723_s18 + $0x8] sm:$0xff]  }
0x2aa1   : > { %s6727_s25 = smov %s6726_s29  ;;  %s6613_s13 = scalar_lea.hbm %s6726_s29, %s5720_s22 }
0x2ab6   : > { %v3709_v62 = vpop.f32.mrb[84].mxu1 }
0x2ab7   : > { %v3715_v63 = vpack.c.bf16 %v3709_v62, %v3709_v62  ;;  %v5177_v0 = vpop.f32.mrb[85].mxu1  ;;  %v4641_v62 = vld [vmem:[%s6714_s0 + $0x3] ss:$0 sm:$0xff] }
0x2ab8   : > { %v3712_v2 = vpop.f32.mrb[86].mxu1 }
0x2ab9   : > { %v5178_v3 = vpop.f32.mrb[87].mxu1  ;;  %5182 = vmatmul.mubr.msk.bf16.vlgmr.msra.gmra.mrb[80].mxu1 %vm642_vm3, %v3715_v63 }
0x2aba   : > { %5198 = vmatpush3.bf16.msra.mxu1 %v3882_v1  ;;  %5199 = vmatprep.mubr.msk.bf16.mxu1 %vm5573_vm2, %v5572_v32 }
0x2abb   : > { %5209 = vmatprep.subr.bf16.mxu1 %v5572_v32 }
0x2ac5   : > { %5200 = vmatmul.mubr.msk.bf16.vlgmr.msra.gmra.mrb[80].mxu1 %vm642_vm3, %v3875_v31 }
0x2ac6   : > { %5211 = vmatprep.mubr.msk.bf16.mxu1 %vm5573_vm2, %v5572_v32 }
0x2b17   : > { %v3983_v4 = vpop.xlane.xlu1 %3982 }
0x2b18   : > { %5489 = vrcp.f32 %v3983_v4 }
0x2b1b   : > { %v3988_v5 = vpop.permute.xlu1 %3987 }
0x2b1c   : > { %v3993_v6 = vsel %vm706_vm4, %v3988_v5, 0 }
0x2b1d   : > { %5210 = vmatpush3.bf16.msra.mxu1 %v3993_v6 }
0x2b1e   : > { %5215 = vmatprep.subr.bf16.mxu1 %v5572_v32 }
0x2b22   : > { %v5490_v7 = vpop.eup %5489 }
0x2b23   : > { %v3985_v10 = vmul.f32 %v5490_v7, %v5488_v57 }
0x2b25   : > { %v3986_v37 = vpack.c.bf16 %v3985_v10, %v3985_v10 }
0x2b27   : > { %5212 = vmatmul.mubr.msk.bf16.vlgmr.msra.gmra.mrb[88].mxu1 %vm642_vm3, %v3986_v37 }
0x2b28   : > { %5216 = vmatpush3.bf16.msra.mxu1 %v4042_v11  ;;  %5217 = vmatprep.mubr.msk.bf16.mxu1 %vm5573_vm2, %v5572_v32 }
0x2b29   : > { %5249 = vmatprep.subr.bf16.mxu1 %v5572_v32 }
0x2bfa   : > { %v4029_v12 = vpop.f32.mrb[88].mxu1 }
0x2bfb   : > { %v4035_v13 = vpack.c.bf16 %v4029_v12, %v4029_v12  ;;  %v5213_v14 = vpop.f32.mrb[89].mxu1 }
0x2bfc   : > { %v4032_v16 = vpop.f32.mrb[90].mxu1 }
0x2bfd   : > { %v5214_v43 = vpop.f32.mrb[91].mxu1  ;;  %5218 = vmatmul.mubr.msk.bf16.vlgmr.msra.gmra.mrb[80].mxu1 %vm642_vm3, %v4035_v13 }
0x2bfe   : > { %5253 = vmatprep.mubr.msk.bf16.mxu1 %vm5573_vm2, %v5572_v32  ;;  %5250 = vmatpush3.bf16.msra.mxu1 %v5411_v60 }
0x2bff   : > { %5251 = vmatprep.subr.bf16.mxu1 %v5572_v32 }
0x2c02   : > { %5252 = vmatpush3.bf16.msra.mxu1 %v5412_v61 }
0x2cd0   : > { %v4078_v19 = vpop.f32.mrb[80].mxu1 }
0x2cd1   : > { %v6536_v20 = vadd.f32 %v4078_v19, %v3445_v18  ;;  %v5219_v22 = vpop.f32.mrb[81].mxu1 }
0x2cd2   : > { %v4081_v23 = vpop.f32.mrb[82].mxu1 }
0x2cd3   : > { %v5220_v25 = vpop.f32.mrb[83].mxu1  ;;  %v4087_v26 = vsel %vm547_vm1, %v6536_v20, 0.0 }
0x2cd4   : > { %4088 = vadd.xlane.f32.xlu0 %v4087_v26 }
0x2d61   : > { %v4089_v27 = vpop.xlane.xlu0 %4088 }
0x2d62   : > { %v4090_v28 = vmul.f32 0.03125, %v4089_v27 }
0x2d64   : > { %v4091_v29 = vsub.f32 %v6536_v20, %v4090_v28 }
0x2d66   : > { %v4092_v30 = vmul.f32 %v4091_v29, %v4091_v29 }
0x2d68   : > { %v4093_v33 = vsel %vm547_vm1, %v4092_v30, 0.0 }
0x2d69   : > { %4094 = vadd.xlane.f32.xlu1 %v4093_v33 }
0x2df6   : > { %v4095_v34 = vpop.xlane.xlu1 %4094 }
0x2df7   : > { %v4096_v35 = vmul.f32 0.03125, %v4095_v34 }
0x2df9   : > { %v4097_v36 = vadd.f32 1e-05, %v4096_v35 }
0x2dfb   : > { %5491 = vrsqrt.f32 %v4097_v36 }
0x2e05   : > { %v5492_v38 = vpop.eup %5491 }
0x2e06   : > { %v4099_v15 = vmul.f32 %v5492_v38, %v4091_v29 }
0x2e08   : > { %v4104_v41 = vmul.f32 %v4615_v39, %v4099_v15 }
0x2e0a   : > { %v4109_v42 = vadd.f32 %v4616_v40, %v4104_v41 }
0x2e0c   : > { %v4110_v46 = vpack.c.bf16 %v4109_v42, %v4109_v42 }
0x2e0e   : > { %5226 = vmatmul.mubr.msk.bf16.vlgmr.msra.gmra.mrb[92].mxu0 %vm547_vm1, %v4110_v46 }
0x2e0f   : > { %5230 = vmatpush3.bf16.msra.mxu0 %v5403_v44  ;;  %5245 = vmatprep.mubr.msk.bf16.mxu0 %vm5573_vm2, %v5572_v32 }
0x2e10   : > { %5231 = vmatprep.subr.bf16.mxu0 %v5572_v32 }
0x2e13   : > { %5232 = vmatpush3.bf16.msra.mxu0 %v5404_v21 }
0x2e14   : > { %5233 = vmatprep.subr.bf16.mxu0 %v5572_v32 }
0x2e17   : > { %5234 = vmatpush3.bf16.msra.mxu0 %v5405_v47 }
0x2e18   : > { %5235 = vmatprep.subr.bf16.mxu0 %v5572_v32 }
0x2e1b   : > { %5236 = vmatpush3.bf16.msra.mxu0 %v5406_v48 }
0x2e1c   : > { %5237 = vmatprep.subr.bf16.mxu0 %v5572_v32 }
0x2e1f   : > { %5238 = vmatpush3.bf16.msra.mxu0 %v5407_v49 }
0x2e20   : > { %5239 = vmatprep.subr.bf16.mxu0 %v5572_v32 }
0x2e23   : > { %5240 = vmatpush3.bf16.msra.mxu0 %v5408_v50 }
0x2e24   : > { %5241 = vmatprep.subr.bf16.mxu0 %v5572_v32 }
0x2e27   : > { %5242 = vmatpush3.bf16.msra.mxu0 %v5409_v51 }
0x2e28   : > { %5243 = vmatprep.subr.bf16.mxu0 %v5572_v32  ;;  %v4650_v32 = vld [vmem:[%s6725_s9] ss:$0 sm:$0xff] }
0x2e2b   : > { %5244 = vmatpush3.bf16.msra.mxu0 %v5410_v24 }
0x2ee1   : > { %v4170_v53 = vpop.f32.mrb[92].mxu0 }
0x2ee2   : > { %v4171_v54 = vadd.f32 %v4621_v52, %v4170_v53  ;;  %v5227_v55 = vpop.f32.mrb[93].mxu0 }
0x2ee3   : > { %v4173_v56 = vpop.f32.mrb[94].mxu0 }
0x2ee4   : > { %v4176_v58 = vmax.f32 %v4171_v54, 0.0  ;;  %v5228_v59 = vpop.f32.mrb[95].mxu0 }
0x2ee6   : > { %v4177_v57 = vpack.c.bf16 %v4176_v58, %v4176_v58 }
0x2ee8   : > { %5246 = vmatmul.mubr.bf16.vlgmr.msra.gmra.mrb[96].mxu0 %v4177_v57 }
0x2fbb   : > { %v4282_v63 = vpop.f32.mrb[96].mxu0 }
0x2fbc   : > { %v4283_v0 = vadd.f32 %v4641_v62, %v4282_v63  ;;  %v5247_v1 = vpop.f32.mrb[97].mxu0 }
0x2fbd   : > { %v4285_v2 = vpop.f32.mrb[98].mxu0 }
0x2fbe   : > { %v4288_v3 = vadd.f32 %v6536_v20, %v4283_v0  ;;  %v5248_v31 = vpop.f32.mrb[99].mxu0 }
0x2fc0   : > { %v4289_v4 = vpack.c.bf16 %v4288_v3, %v4288_v3 }
0x2fc2   : > { %5254 = vmatmul.mubr.msk.bf16.vlgmr.msra.gmra.mrb[92].mxu1 %vm547_vm1, %v4289_v4 }
0x3095   : > { %v4350_v5 = vpop.f32.mrb[92].mxu1 }
0x3096   : > { %v4351_v6 = vadd.f32 %v4650_v32, %v4350_v5  ;;  %v5255_v7 = vpop.f32.mrb[93].mxu1 }
0x3097   : > { %v4353_v8 = vpop.f32.mrb[94].mxu1 }
0x3098   : > { %4356 = vst [vmem:[%s479_s27] sm:$0xff] %v4351_v6  ;;  %v5256_v10 = vpop.f32.mrb[95].mxu1 }
0x3099   : > { %5518 = shalt.err (!%p5515_p7)
}
0x309a   : > { %s5519_s22 = scalar_lea.hbm %s6613_s13, 128  ;;  %s5523_s9 = scalar_lea.hbm %s6727_s25, 256 }
0x309b   : > { %p5520_p8 = scmp.ne.s32.totalorder %s6613_s13, %s5519_s22  ;;  %p5524_p13 = scmp.lt.u32.totalorder %s6613_s13, %s6727_s25 }
0x309c   : > { %p5525_p0 = scmp.lt.u32.totalorder %s5523_s9, %s5519_s22  ;;  %p5527_p2 = scmp.lt.u32.totalorder %s5519_s22, %s6613_s13 }
0x309d   : > { %p5521_p9 = pnand %p5520_p8, %p5710_p10 }
0x309e   : > { %p5526_p1 = por %p5525_p0, %p5524_p13 }
0x309f   : > { %p5522_p12 = pneg %p5521_p9 }
0x30a0   : > { %p5528_p3 = por %p5527_p2, %p5526_p1 }
0x30a2   : > { %p5529_p4 = pnand %p5528_p3, %p5522_p12 }
0x30a4   : > { %5532 = shalt.err (!%p5529_p4)
}
0x30a5   : > { %5309 = dma.vmem_to_hbm [thread:$0]  (%p5710_p10), %s6615_s23, 128, %s6613_s13, %s4358_s30  }
0x30a6 PF: > { %s6728_s19 = sld [smem:[#allocation12_spill]]  ;;  %s6729_s29 = sld [smem:[#allocation9_spill]] }
0x30ac   : > { %p5315_p5 = scmp.ge.s32.totalorder %s6728_s19, 2  ;;  %s4383_s16 = sand.u32 1, %s6729_s29  }
0x30ad   : > { %s4384_s28 = scalar_lea.sflag [#allocation6], %s4383_s16 }
0x30ae   : > { %p5312_p6 = pnand %p5315_p5, %p5714_p11 }
0x30b0   : > { %5552 = dma.done.wait (!%p5312_p6), %s4384_s28, 128  }
0x30b1   : > { %5554 = vsyncadd (!%p5312_p6), %s4384_s28, 4294967168  ;;  %s6731_s29 = sld [smem:[#allocation13_spill]]  ;;  %s6732_s26 = sld [smem:[#allocation10_spill]] }
0x30b2   : > { %s6733_s27 = sld [smem:[#allocation11_spill]]  ;;  %s6734_s28 = sld [smem:[#allocation14_spill]] }
0x30b7   : > { %p32_p7 = scmp.ge.s32.totalorder %s6731_s29, 4  }
0x30b9   :  { %34 = sbr.rel (!%p32_p7) target bundleno = 25 (0x19), region = 144 }
0x30c0   :  { %4389 = vsyncpa [#allocation6], 1 }
0x30c1   :  { %4391 = vsyncpa [#allocation6 + $0x1], 1 }

</bundles_post_ra>
